<compile_context>
chip_gen: v7x
topology: tpu7x:2x2x1
jax: 0.10.0
libtpu: 0.0.40
codegen_flags: <defaults>
</compile_context>

<pallas_src>
import functools

import jax
import jax.numpy as jnp
from jax.experimental import pallas as pl
from jax.experimental.pallas import tpu as pltpu


def _round_up(x, m):
    return (x + m - 1) // m * m


# ----------------------------------------------------------------------------
# Pallas kernels
# ----------------------------------------------------------------------------
def _matmul_bias_act_kernel(x_ref, w_ref, b_ref, o_ref, *, relu):
    # x: [tm, K] bf16, w: [K, N] bf16, b: [1, N] f32 -> o: [tm, N] f32
    acc = jnp.dot(x_ref[...], w_ref[...], preferred_element_type=jnp.float32)
    acc = acc + b_ref[...]
    if relu:
        acc = jnp.maximum(acc, 0.0)
    o_ref[...] = acc.astype(o_ref.dtype)


def matmul_bias_act(x, w, b, *, relu):
    """Fused (x @ w + b) [+ ReLU].

    Operands are cast to bf16 for the MXU; K and N are zero-padded to
    multiples of 128 (lane-dense output, unmasked vector load/store); the
    row dimension M is tiled over a 1-D "parallel" grid. Accumulation and
    the bias/ReLU epilogue stay in f32. Returns the un-padded [M, N] f32.
    """
    M, K = x.shape
    K2, N = w.shape
    assert K == K2
    Kp = _round_up(K, 128)
    Np = _round_up(N, 128)
    tm = 512 if M >= 512 else _round_up(max(M, 8), 8)
    Mp = _round_up(M, tm)

    xp = jnp.pad(x.astype(jnp.bfloat16), ((0, Mp - M), (0, Kp - K)))
    wp = jnp.pad(w.astype(jnp.bfloat16), ((0, Kp - K), (0, Np - N)))
    bp = jnp.pad(b.astype(jnp.float32).reshape(1, N), ((0, 0), (0, Np - N)))

    cost = pl.CostEstimate(
        flops=2 * Mp * Kp * Np,
        transcendentals=0,
        bytes_accessed=Mp * Kp * 2 + Kp * Np * 2 + Np * 4 + Mp * Np * 4,
    )
    out = pl.pallas_call(
        functools.partial(_matmul_bias_act_kernel, relu=relu),
        out_shape=jax.ShapeDtypeStruct((Mp, Np), jnp.float32),
        grid=(Mp // tm,),
        in_specs=[
            pl.BlockSpec((tm, Kp), lambda i: (i, 0)),
            pl.BlockSpec((Kp, Np), lambda i: (0, 0)),
            pl.BlockSpec((1, Np), lambda i: (0, 0)),
        ],
        out_specs=pl.BlockSpec((tm, Np), lambda i: (i, 0)),
        compiler_params=pltpu.CompilerParams(
            dimension_semantics=("parallel",)),
        cost_estimate=cost,
    )(xp, wp, bp)
    return out[:M, :N]


def _maxpool_kernel(p_ref, o_ref):
    # p: [9, TR, 128] window taps -> o: [TR, 128] max over the 9 taps (VPU).
    m = p_ref[0]
    for t in range(1, 9):
        m = jnp.maximum(m, p_ref[t])
    o_ref[...] = m


_POOL_TR = 64  # sublane rows per pool tile: [9, 64, 128] f32 ~ 0.3 MiB


def maxpool_reduce(patches):
    """patches: [9, N] f32 -> [N] f32 max over the 9 window taps."""
    _, N = patches.shape
    chunk = _POOL_TR * 128
    Npad = _round_up(N, chunk)
    pad_val = float(jnp.finfo(jnp.float32).min)
    p = jnp.pad(patches, ((0, 0), (0, Npad - N)), constant_values=pad_val)
    R = Npad // 128
    p = p.reshape(9, R, 128)
    out = pl.pallas_call(
        _maxpool_kernel,
        out_shape=jax.ShapeDtypeStruct((R, 128), jnp.float32),
        grid=(R // _POOL_TR,),
        in_specs=[pl.BlockSpec((9, _POOL_TR, 128), lambda r: (0, r, 0))],
        out_specs=pl.BlockSpec((_POOL_TR, 128), lambda r: (r, 0)),
        compiler_params=pltpu.CompilerParams(
            dimension_semantics=("parallel",)),
    )(p)
    return out.reshape(-1)[:N]


def _fused_fc_kernel(h_ref, w1_ref, b1_ref, w2_ref, b2_ref, o_ref):
    # h: [M, K1] bf16; w1: [K1, H1] bf16; b1: [1, H1] f32
    # w2: [H1, N2] bf16; b2: [1, N2] f32 -> o: [M, N2] f32
    h1 = jnp.dot(h_ref[...], w1_ref[...], preferred_element_type=jnp.float32)
    h1 = jnp.maximum(h1 + b1_ref[...], 0.0)
    out = jnp.dot(h1.astype(jnp.bfloat16), w2_ref[...],
                  preferred_element_type=jnp.float32)
    o_ref[...] = out + b2_ref[...]


def fused_fc(h, w1, b1, w2, b2):
    """relu(h @ w1 + b1) @ w2 + b2 in one Pallas call (no HBM round trip)."""
    B, K1 = h.shape
    H1 = w1.shape[1]
    N2 = w2.shape[1]
    Mp = _round_up(max(B, 8), 8)
    K1p = _round_up(K1, 128)
    H1p = _round_up(H1, 128)
    N2p = _round_up(N2, 128)

    hp = jnp.pad(h.astype(jnp.bfloat16), ((0, Mp - B), (0, K1p - K1)))
    w1p = jnp.pad(w1.astype(jnp.bfloat16), ((0, K1p - K1), (0, H1p - H1)))
    b1p = jnp.pad(b1.astype(jnp.float32).reshape(1, H1), ((0, 0), (0, H1p - H1)))
    w2p = jnp.pad(w2.astype(jnp.bfloat16), ((0, H1p - H1), (0, N2p - N2)))
    b2p = jnp.pad(b2.astype(jnp.float32).reshape(1, N2), ((0, 0), (0, N2p - N2)))

    vmem = pl.BlockSpec(memory_space=pltpu.MemorySpace.VMEM)
    out = pl.pallas_call(
        _fused_fc_kernel,
        out_shape=jax.ShapeDtypeStruct((Mp, N2p), jnp.float32),
        in_specs=[vmem] * 5,
        out_specs=vmem,
    )(hp, w1p, b1p, w2p, b2p)
    return out[:B, :N2]


# ----------------------------------------------------------------------------
# Glue: im2col (NHWC), pooling tap extraction, layer wrappers
# ----------------------------------------------------------------------------
def _im2col_nhwc(x, k, pad):
    """x: [B, H, W, C] -> [B*H*W, k*k*C] (same padding, stride 1).

    Column order is (tap, channel) with tap = di*k + dj, matching the
    weight-matrix layout built in conv2d_relu.
    """
    B, H, W, C = x.shape
    xp = jnp.pad(x, ((0, 0), (pad, pad), (pad, pad), (0, 0)))
    cols = [xp[:, di:di + H, dj:dj + W, :]
            for di in range(k) for dj in range(k)]
    patches = jnp.stack(cols, axis=3)            # [B, H, W, k*k, C]
    return patches.reshape(B * H * W, k * k * C)


def conv2d_relu(x, w, b):
    """Conv2d(k=5, pad=2, stride=1) + ReLU.  NHWC in / NHWC out (f32).

    x: [B, H, W, Cin], w: [Cout, Cin, 5, 5], b: [Cout] -> [B, H, W, Cout]
    """
    B, H, W, Cin = x.shape
    Cout = w.shape[0]
    # Cast to bf16 BEFORE im2col so the materialized patch matrix is half-width.
    patches = _im2col_nhwc(x.astype(jnp.bfloat16), 5, 2)      # [B*H*W, 25*Cin]
    w_mat = w.transpose(2, 3, 1, 0).reshape(25 * Cin, Cout)   # row=(di*5+dj)*Cin+ci
    out = matmul_bias_act(patches, w_mat, b, relu=True)       # [B*H*W, Cout] f32
    return out.reshape(B, H, W, Cout)


def maxpool_3x3_s2(x):
    """MaxPool2d(kernel_size=3, stride=2), no padding.  NHWC in / NHWC out."""
    B, H, W, C = x.shape
    Ho = (H - 3) // 2 + 1
    Wo = (W - 3) // 2 + 1
    taps = [x[:, di:di + 2 * Ho - 1:2, dj:dj + 2 * Wo - 1:2, :]
            for di in range(3) for dj in range(3)]
    patches = jnp.stack(taps, axis=0).reshape(9, B * Ho * Wo * C)
    pooled = maxpool_reduce(patches)                           # [B*Ho*Wo*C]
    return pooled.reshape(B, Ho, Wo, C)


# ----------------------------------------------------------------------------
# Parameter init (xavier_normal weights, zero bias) — deterministic
# ----------------------------------------------------------------------------
def _xavier_normal(key, shape, fan_in, fan_out):
    std = (2.0 / (fan_in + fan_out)) ** 0.5
    return std * jax.random.normal(key, shape, dtype=jnp.float32)


def init_params(key, numbers_bit):
    keys = jax.random.split(key, 5)
    params = {}
    # conv1: 3 -> 32, k=5
    params["w1"] = _xavier_normal(keys[0], (32, 3, 5, 5), 3 * 25, 32 * 25)
    params["b1"] = jnp.zeros((32,), jnp.float32)
    # conv2: 32 -> 64, k=5
    params["w2"] = _xavier_normal(keys[1], (64, 32, 5, 5), 32 * 25, 64 * 25)
    params["b2"] = jnp.zeros((64,), jnp.float32)
    # conv3: 64 -> 128, k=5
    params["w3"] = _xavier_normal(keys[2], (128, 64, 5, 5), 64 * 25, 128 * 25)
    params["b3"] = jnp.zeros((128,), jnp.float32)
    # fc1: 128*3*3 -> 500
    params["wf1"] = _xavier_normal(keys[3], (128 * 3 * 3, 500), 128 * 9, 500)
    params["bf1"] = jnp.zeros((500,), jnp.float32)
    # fc2: 500 -> numbers_bit
    params["wf2"] = _xavier_normal(keys[4], (500, numbers_bit), 500, numbers_bit)
    params["bf2"] = jnp.zeros((numbers_bit,), jnp.float32)
    return params


# ----------------------------------------------------------------------------
# Full forward (matches CNNH.forward)
# ----------------------------------------------------------------------------
def cnnh_forward(params, x):
    # NCHW -> NHWC once; the whole conv stack runs channels-last.
    h = x.transpose(0, 2, 3, 1)
    h = conv2d_relu(h, params["w1"], params["b1"])   # [B, 32, 32, 32]
    h = maxpool_3x3_s2(h)                            # [B, 15, 15, 32]
    h = conv2d_relu(h, params["w2"], params["b2"])   # [B, 15, 15, 64]
    h = maxpool_3x3_s2(h)                            # [B, 7, 7, 64]
    h = conv2d_relu(h, params["w3"], params["b3"])   # [B, 7, 7, 128]
    h = maxpool_3x3_s2(h)                            # [B, 3, 3, 128]
    # Flatten in NCHW (channel-major) order, like x.view(B, -1) in PyTorch.
    B = h.shape[0]
    h = h.transpose(0, 3, 1, 2).reshape(B, 128 * 3 * 3)
    # Fused fc1 (+ReLU) + fc2
    return fused_fc(h, params["wf1"], params["bf1"],
                    params["wf2"], params["bf2"])


if __name__ == "__main__":
    numbers_bit = 12
    key = jax.random.PRNGKey(0)
    pkey, xkey = jax.random.split(key)
    params = init_params(pkey, numbers_bit)

    # Input spatial size 32x32 is implied by the fc input dim 128*3*3
    # (32 -> pool 15 -> pool 7 -> pool 3).
    x = jax.random.normal(xkey, (2, 3, 32, 32), dtype=jnp.float32)

    out = jax.jit(cnnh_forward)(params, x)
    out = jax.block_until_ready(out)
    assert out.shape == (2, numbers_bit), out.shape
    assert jnp.all(jnp.isfinite(out))
    print("KERNEL_OK")
</pallas_src>

<mosaic_0001>
module attributes {stable_mosaic.version = 11 : i64} {
  func.func @_matmul_bias_act_kernel(%arg0: i32, %arg1: memref<512x128xbf16, #tpu.memory_space<vmem>>, %arg2: memref<128x128xbf16, #tpu.memory_space<vmem>>, %arg3: memref<1x128xf32, #tpu.memory_space<vmem>>, %arg4: memref<512x128xf32, #tpu.memory_space<vmem>>) attributes {dimension_semantics = [#tpu.dimension_semantics<parallel>], iteration_bounds = array<i64: 4>, scalar_prefetch = 0 : i64, scratch_operands = 0 : i64, tpu.core_type = #tpu.core_type<tc>, window_params = [{transform_indices = @transform_0, window_bounds = array<i64: 512, 128>}, {pipeline_mode = #tpu.pipeline_mode<synchronous>, transform_indices = @transform_1, window_bounds = array<i64: 128, 128>}, {pipeline_mode = #tpu.pipeline_mode<synchronous>, transform_indices = @transform_2, window_bounds = array<i64: 1, 128>}, {transform_indices = @transform_3, window_bounds = array<i64: 512, 128>}]} {
    %c0 = arith.constant 0 : index
    %c0_0 = arith.constant 0 : index
    %0 = vector.load %arg1[%c0, %c0_0] : memref<512x128xbf16, #tpu.memory_space<vmem>>, vector<512x128xbf16>
    %c0_1 = arith.constant 0 : index
    %c0_2 = arith.constant 0 : index
    %1 = vector.load %arg2[%c0_1, %c0_2] : memref<128x128xbf16, #tpu.memory_space<vmem>>, vector<128x128xbf16>
    %cst = arith.constant dense<0.000000e+00> : vector<512x128xf32>
    %2 = tpu.matmul %0, %1, %cst {dimension_numbers = #tpu.dot_dimension_numbers<[1], [0], [0], [1], [0, 0, 1, 1], [], []>} : vector<512x128xbf16>, vector<128x128xbf16>, vector<512x128xf32> -> vector<512x128xf32>
    %c0_3 = arith.constant 0 : index
    %c0_4 = arith.constant 0 : index
    %3 = vector.load %arg3[%c0_3, %c0_4] : memref<1x128xf32, #tpu.memory_space<vmem>>, vector<1x128xf32>
    %4 = vector.broadcast %3 : vector<1x128xf32> to vector<512x128xf32>
    %5 = arith.addf %2, %4 : vector<512x128xf32>
    %cst_5 = arith.constant 0.000000e+00 : f32
    %6 = vector.broadcast %cst_5 : f32 to vector<512x128xf32>
    %7 = arith.maximumf %5, %6 : vector<512x128xf32>
    %c0_6 = arith.constant 0 : index
    %c0_7 = arith.constant 0 : index
    %8 = vector.load %arg4[%c0_6, %c0_7] : memref<512x128xf32, #tpu.memory_space<vmem>>, vector<512x128xf32>
    tpu.vector_store %arg4[%c0_6, %c0_7], %7 {strides = array<i32>} : memref<512x128xf32, #tpu.memory_space<vmem>>, vector<512x128xf32>,
    return
  }
  func.func @transform_0(%arg0: i32) -> (i32, i32) {
    %c0_i32 = arith.constant 0 : i32
    %c0_i32_0 = arith.constant 0 : i32
    return %arg0, %c0_i32 : i32, i32
  }
  func.func @transform_1(%arg0: i32) -> (i32, i32) {
    %c0_i32 = arith.constant 0 : i32
    %c0_i32_0 = arith.constant 0 : i32
    %c0_i32_1 = arith.constant 0 : i32
    return %c0_i32, %c0_i32_0 : i32, i32
  }
  func.func @transform_2(%arg0: i32) -> (i32, i32) {
    %c0_i32 = arith.constant 0 : i32
    %c0_i32_0 = arith.constant 0 : i32
    %c0_i32_1 = arith.constant 0 : i32
    return %c0_i32, %c0_i32_0 : i32, i32
  }
  func.func @transform_3(%arg0: i32) -> (i32, i32) {
    %c0_i32 = arith.constant 0 : i32
    %c0_i32_0 = arith.constant 0 : i32
    return %arg0, %c0_i32 : i32, i32
  }
}

module attributes {stable_mosaic.version = 11 : i64} {
  func.func @_maxpool_kernel(%arg0: i32, %arg1: memref<9x64x128xf32, #tpu.memory_space<vmem>>, %arg2: memref<64x128xf32, #tpu.memory_space<vmem>>) attributes {dimension_semantics = [#tpu.dimension_semantics<parallel>], iteration_bounds = array<i64: 2>, scalar_prefetch = 0 : i64, scratch_operands = 0 : i64, tpu.core_type = #tpu.core_type<tc>, window_params = [{transform_indices = @transform_0, window_bounds = array<i64: 9, 64, 128>}, {transform_indices = @transform_1, window_bounds = array<i64: 64, 128>}]} {
    %c0 = arith.constant 0 : index
    %c0_0 = arith.constant 0 : index
    %c0_1 = arith.constant 0 : index
    %0 = vector.load %arg1[%c0, %c0_0, %c0_1] : memref<9x64x128xf32, #tpu.memory_space<vmem>>, vector<1x64x128xf32>
    %1 = vector.shape_cast %0 : vector<1x64x128xf32> to vector<64x128xf32>
    %c1 = arith.constant 1 : index
    %c0_2 = arith.constant 0 : index
    %c0_3 = arith.constant 0 : index
    %2 = vector.load %arg1[%c1, %c0_2, %c0_3] : memref<9x64x128xf32, #tpu.memory_space<vmem>>, vector<1x64x128xf32>
    %3 = vector.shape_cast %2 : vector<1x64x128xf32> to vector<64x128xf32>
    %4 = arith.maximumf %1, %3 : vector<64x128xf32>
    %c2 = arith.constant 2 : index
    %c0_4 = arith.constant 0 : index
    %c0_5 = arith.constant 0 : index
    %5 = vector.load %arg1[%c2, %c0_4, %c0_5] : memref<9x64x128xf32, #tpu.memory_space<vmem>>, vector<1x64x128xf32>
    %6 = vector.shape_cast %5 : vector<1x64x128xf32> to vector<64x128xf32>
    %7 = arith.maximumf %4, %6 : vector<64x128xf32>
    %c3 = arith.constant 3 : index
    %c0_6 = arith.constant 0 : index
    %c0_7 = arith.constant 0 : index
    %8 = vector.load %arg1[%c3, %c0_6, %c0_7] : memref<9x64x128xf32, #tpu.memory_space<vmem>>, vector<1x64x128xf32>
    %9 = vector.shape_cast %8 : vector<1x64x128xf32> to vector<64x128xf32>
    %10 = arith.maximumf %7, %9 : vector<64x128xf32>
    %c4 = arith.constant 4 : index
    %c0_8 = arith.constant 0 : index
    %c0_9 = arith.constant 0 : index
    %11 = vector.load %arg1[%c4, %c0_8, %c0_9] : memref<9x64x128xf32, #tpu.memory_space<vmem>>, vector<1x64x128xf32>
    %12 = vector.shape_cast %11 : vector<1x64x128xf32> to vector<64x128xf32>
    %13 = arith.maximumf %10, %12 : vector<64x128xf32>
    %c5 = arith.constant 5 : index
    %c0_10 = arith.constant 0 : index
    %c0_11 = arith.constant 0 : index
    %14 = vector.load %arg1[%c5, %c0_10, %c0_11] : memref<9x64x128xf32, #tpu.memory_space<vmem>>, vector<1x64x128xf32>
    %15 = vector.shape_cast %14 : vector<1x64x128xf32> to vector<64x128xf32>
    %16 = arith.maximumf %13, %15 : vector<64x128xf32>
    %c6 = arith.constant 6 : index
    %c0_12 = arith.constant 0 : index
    %c0_13 = arith.constant 0 : index
    %17 = vector.load %arg1[%c6, %c0_12, %c0_13] : memref<9x64x128xf32, #tpu.memory_space<vmem>>, vector<1x64x128xf32>
    %18 = vector.shape_cast %17 : vector<1x64x128xf32> to vector<64x128xf32>
    %19 = arith.maximumf %16, %18 : vector<64x128xf32>
    %c7 = arith.constant 7 : index
    %c0_14 = arith.constant 0 : index
    %c0_15 = arith.constant 0 : index
    %20 = vector.load %arg1[%c7, %c0_14, %c0_15] : memref<9x64x128xf32, #tpu.memory_space<vmem>>, vector<1x64x128xf32>
    %21 = vector.shape_cast %20 : vector<1x64x128xf32> to vector<64x128xf32>
    %22 = arith.maximumf %19, %21 : vector<64x128xf32>
    %c8 = arith.constant 8 : index
    %c0_16 = arith.constant 0 : index
    %c0_17 = arith.constant 0 : index
    %23 = vector.load %arg1[%c8, %c0_16, %c0_17] : memref<9x64x128xf32, #tpu.memory_space<vmem>>, vector<1x64x128xf32>
    %24 = vector.shape_cast %23 : vector<1x64x128xf32> to vector<64x128xf32>
    %25 = arith.maximumf %22, %24 : vector<64x128xf32>
    %c0_18 = arith.constant 0 : index
    %c0_19 = arith.constant 0 : index
    %26 = vector.load %arg2[%c0_18, %c0_19] : memref<64x128xf32, #tpu.memory_space<vmem>>, vector<64x128xf32>
    tpu.vector_store %arg2[%c0_18, %c0_19], %25 {strides = array<i32>} : memref<64x128xf32, #tpu.memory_space<vmem>>, vector<64x128xf32>,
    return
  }
  func.func @transform_0(%arg0: i32) -> (i32, i32, i32) {
    %c0_i32 = arith.constant 0 : i32
    %c0_i32_0 = arith.constant 0 : i32
    %c0_i32_1 = arith.constant 0 : i32
    return %c0_i32, %arg0, %c0_i32_0 : i32, i32, i32
  }
  func.func @transform_1(%arg0: i32) -> (i32, i32) {
    %c0_i32 = arith.constant 0 : i32
    %c0_i32_0 = arith.constant 0 : i32
    return %arg0, %c0_i32 : i32, i32
  }
}

module attributes {stable_mosaic.version = 11 : i64} {
  func.func @_matmul_bias_act_kernel(%arg0: i32, %arg1: memref<456x896xbf16, #tpu.memory_space<vmem>>, %arg2: memref<896x128xbf16, #tpu.memory_space<vmem>>, %arg3: memref<1x128xf32, #tpu.memory_space<vmem>>, %arg4: memref<456x128xf32, #tpu.memory_space<vmem>>) attributes {dimension_semantics = [#tpu.dimension_semantics<parallel>], iteration_bounds = array<i64: 1>, scalar_prefetch = 0 : i64, scratch_operands = 0 : i64, tpu.core_type = #tpu.core_type<tc>, window_params = [{transform_indices = @transform_0, window_bounds = array<i64: 456, 896>}, {pipeline_mode = #tpu.pipeline_mode<synchronous>, transform_indices = @transform_1, window_bounds = array<i64: 896, 128>}, {pipeline_mode = #tpu.pipeline_mode<synchronous>, transform_indices = @transform_2, window_bounds = array<i64: 1, 128>}, {transform_indices = @transform_3, window_bounds = array<i64: 456, 128>}]} {
    %c0 = arith.constant 0 : index
    %c0_0 = arith.constant 0 : index
    %0 = vector.load %arg1[%c0, %c0_0] : memref<456x896xbf16, #tpu.memory_space<vmem>>, vector<456x896xbf16>
    %c0_1 = arith.constant 0 : index
    %c0_2 = arith.constant 0 : index
    %1 = vector.load %arg2[%c0_1, %c0_2] : memref<896x128xbf16, #tpu.memory_space<vmem>>, vector<896x128xbf16>
    %cst = arith.constant dense<0.000000e+00> : vector<456x128xf32>
    %2 = tpu.matmul %0, %1, %cst {dimension_numbers = #tpu.dot_dimension_numbers<[1], [0], [0], [1], [0, 0, 1, 1], [], []>} : vector<456x896xbf16>, vector<896x128xbf16>, vector<456x128xf32> -> vector<456x128xf32>
    %c0_3 = arith.constant 0 : index
    %c0_4 = arith.constant 0 : index
    %3 = vector.load %arg3[%c0_3, %c0_4] : memref<1x128xf32, #tpu.memory_space<vmem>>, vector<1x128xf32>
    %4 = vector.broadcast %3 : vector<1x128xf32> to vector<456x128xf32>
    %5 = arith.addf %2, %4 : vector<456x128xf32>
    %cst_5 = arith.constant 0.000000e+00 : f32
    %6 = vector.broadcast %cst_5 : f32 to vector<456x128xf32>
    %7 = arith.maximumf %5, %6 : vector<456x128xf32>
    %c0_6 = arith.constant 0 : index
    %c0_7 = arith.constant 0 : index
    %8 = vector.load %arg4[%c0_6, %c0_7] : memref<456x128xf32, #tpu.memory_space<vmem>>, vector<456x128xf32>
    tpu.vector_store %arg4[%c0_6, %c0_7], %7 {strides = array<i32>} : memref<456x128xf32, #tpu.memory_space<vmem>>, vector<456x128xf32>,
    return
  }
  func.func @transform_0(%arg0: i32) -> (i32, i32) {
    %c0_i32 = arith.constant 0 : i32
    %c0_i32_0 = arith.constant 0 : i32
    return %arg0, %c0_i32 : i32, i32
  }
  func.func @transform_1(%arg0: i32) -> (i32, i32) {
    %c0_i32 = arith.constant 0 : i32
    %c0_i32_0 = arith.constant 0 : i32
    %c0_i32_1 = arith.constant 0 : i32
    return %c0_i32, %c0_i32_0 : i32, i32
  }
  func.func @transform_2(%arg0: i32) -> (i32, i32) {
    %c0_i32 = arith.constant 0 : i32
    %c0_i32_0 = arith.constant 0 : i32
    %c0_i32_1 = arith.constant 0 : i32
    return %c0_i32, %c0_i32_0 : i32, i32
  }
  func.func @transform_3(%arg0: i32) -> (i32, i32) {
    %c0_i32 = arith.constant 0 : i32
    %c0_i32_0 = arith.constant 0 : i32
    return %arg0, %c0_i32 : i32, i32
  }
}

module attributes {stable_mosaic.version = 11 : i64} {
  func.func @_maxpool_kernel(%arg0: i32, %arg1: memref<9x64x128xf32, #tpu.memory_space<vmem>>, %arg2: memref<64x128xf32, #tpu.memory_space<vmem>>) attributes {dimension_semantics = [#tpu.dimension_semantics<parallel>], iteration_bounds = array<i64: 1>, scalar_prefetch = 0 : i64, scratch_operands = 0 : i64, tpu.core_type = #tpu.core_type<tc>, window_params = [{transform_indices = @transform_0, window_bounds = array<i64: 9, 64, 128>}, {transform_indices = @transform_1, window_bounds = array<i64: 64, 128>}]} {
    %c0 = arith.constant 0 : index
    %c0_0 = arith.constant 0 : index
    %c0_1 = arith.constant 0 : index
    %0 = vector.load %arg1[%c0, %c0_0, %c0_1] : memref<9x64x128xf32, #tpu.memory_space<vmem>>, vector<1x64x128xf32>
    %1 = vector.shape_cast %0 : vector<1x64x128xf32> to vector<64x128xf32>
    %c1 = arith.constant 1 : index
    %c0_2 = arith.constant 0 : index
    %c0_3 = arith.constant 0 : index
    %2 = vector.load %arg1[%c1, %c0_2, %c0_3] : memref<9x64x128xf32, #tpu.memory_space<vmem>>, vector<1x64x128xf32>
    %3 = vector.shape_cast %2 : vector<1x64x128xf32> to vector<64x128xf32>
    %4 = arith.maximumf %1, %3 : vector<64x128xf32>
    %c2 = arith.constant 2 : index
    %c0_4 = arith.constant 0 : index
    %c0_5 = arith.constant 0 : index
    %5 = vector.load %arg1[%c2, %c0_4, %c0_5] : memref<9x64x128xf32, #tpu.memory_space<vmem>>, vector<1x64x128xf32>
    %6 = vector.shape_cast %5 : vector<1x64x128xf32> to vector<64x128xf32>
    %7 = arith.maximumf %4, %6 : vector<64x128xf32>
    %c3 = arith.constant 3 : index
    %c0_6 = arith.constant 0 : index
    %c0_7 = arith.constant 0 : index
    %8 = vector.load %arg1[%c3, %c0_6, %c0_7] : memref<9x64x128xf32, #tpu.memory_space<vmem>>, vector<1x64x128xf32>
    %9 = vector.shape_cast %8 : vector<1x64x128xf32> to vector<64x128xf32>
    %10 = arith.maximumf %7, %9 : vector<64x128xf32>
    %c4 = arith.constant 4 : index
    %c0_8 = arith.constant 0 : index
    %c0_9 = arith.constant 0 : index
    %11 = vector.load %arg1[%c4, %c0_8, %c0_9] : memref<9x64x128xf32, #tpu.memory_space<vmem>>, vector<1x64x128xf32>
    %12 = vector.shape_cast %11 : vector<1x64x128xf32> to vector<64x128xf32>
    %13 = arith.maximumf %10, %12 : vector<64x128xf32>
    %c5 = arith.constant 5 : index
    %c0_10 = arith.constant 0 : index
    %c0_11 = arith.constant 0 : index
    %14 = vector.load %arg1[%c5, %c0_10, %c0_11] : memref<9x64x128xf32, #tpu.memory_space<vmem>>, vector<1x64x128xf32>
    %15 = vector.shape_cast %14 : vector<1x64x128xf32> to vector<64x128xf32>
    %16 = arith.maximumf %13, %15 : vector<64x128xf32>
    %c6 = arith.constant 6 : index
    %c0_12 = arith.constant 0 : index
    %c0_13 = arith.constant 0 : index
    %17 = vector.load %arg1[%c6, %c0_12, %c0_13] : memref<9x64x128xf32, #tpu.memory_space<vmem>>, vector<1x64x128xf32>
    %18 = vector.shape_cast %17 : vector<1x64x128xf32> to vector<64x128xf32>
    %19 = arith.maximumf %16, %18 : vector<64x128xf32>
    %c7 = arith.constant 7 : index
    %c0_14 = arith.constant 0 : index
    %c0_15 = arith.constant 0 : index
    %20 = vector.load %arg1[%c7, %c0_14, %c0_15] : memref<9x64x128xf32, #tpu.memory_space<vmem>>, vector<1x64x128xf32>
    %21 = vector.shape_cast %20 : vector<1x64x128xf32> to vector<64x128xf32>
    %22 = arith.maximumf %19, %21 : vector<64x128xf32>
    %c8 = arith.constant 8 : index
    %c0_16 = arith.constant 0 : index
    %c0_17 = arith.constant 0 : index
    %23 = vector.load %arg1[%c8, %c0_16, %c0_17] : memref<9x64x128xf32, #tpu.memory_space<vmem>>, vector<1x64x128xf32>
    %24 = vector.shape_cast %23 : vector<1x64x128xf32> to vector<64x128xf32>
    %25 = arith.maximumf %22, %24 : vector<64x128xf32>
    %c0_18 = arith.constant 0 : index
    %c0_19 = arith.constant 0 : index
    %26 = vector.load %arg2[%c0_18, %c0_19] : memref<64x128xf32, #tpu.memory_space<vmem>>, vector<64x128xf32>
    tpu.vector_store %arg2[%c0_18, %c0_19], %25 {strides = array<i32>} : memref<64x128xf32, #tpu.memory_space<vmem>>, vector<64x128xf32>,
    return
  }
  func.func @transform_0(%arg0: i32) -> (i32, i32, i32) {
    %c0_i32 = arith.constant 0 : i32
    %c0_i32_0 = arith.constant 0 : i32
    %c0_i32_1 = arith.constant 0 : i32
    return %c0_i32, %arg0, %c0_i32_0 : i32, i32, i32
  }
  func.func @transform_1(%arg0: i32) -> (i32, i32) {
    %c0_i32 = arith.constant 0 : i32
    %c0_i32_0 = arith.constant 0 : i32
    return %arg0, %c0_i32 : i32, i32
  }
}

module attributes {stable_mosaic.version = 11 : i64} {
  func.func @_matmul_bias_act_kernel(%arg0: i32, %arg1: memref<104x1664xbf16, #tpu.memory_space<vmem>>, %arg2: memref<1664x128xbf16, #tpu.memory_space<vmem>>, %arg3: memref<1x128xf32, #tpu.memory_space<vmem>>, %arg4: memref<104x128xf32, #tpu.memory_space<vmem>>) attributes {dimension_semantics = [#tpu.dimension_semantics<parallel>], iteration_bounds = array<i64: 1>, scalar_prefetch = 0 : i64, scratch_operands = 0 : i64, tpu.core_type = #tpu.core_type<tc>, window_params = [{transform_indices = @transform_0, window_bounds = array<i64: 104, 1664>}, {pipeline_mode = #tpu.pipeline_mode<synchronous>, transform_indices = @transform_1, window_bounds = array<i64: 1664, 128>}, {pipeline_mode = #tpu.pipeline_mode<synchronous>, transform_indices = @transform_2, window_bounds = array<i64: 1, 128>}, {transform_indices = @transform_3, window_bounds = array<i64: 104, 128>}]} {
    %c0 = arith.constant 0 : index
    %c0_0 = arith.constant 0 : index
    %0 = vector.load %arg1[%c0, %c0_0] : memref<104x1664xbf16, #tpu.memory_space<vmem>>, vector<104x1664xbf16>
    %c0_1 = arith.constant 0 : index
    %c0_2 = arith.constant 0 : index
    %1 = vector.load %arg2[%c0_1, %c0_2] : memref<1664x128xbf16, #tpu.memory_space<vmem>>, vector<1664x128xbf16>
    %cst = arith.constant dense<0.000000e+00> : vector<104x128xf32>
    %2 = tpu.matmul %0, %1, %cst {dimension_numbers = #tpu.dot_dimension_numbers<[1], [0], [0], [1], [0, 0, 1, 1], [], []>} : vector<104x1664xbf16>, vector<1664x128xbf16>, vector<104x128xf32> -> vector<104x128xf32>
    %c0_3 = arith.constant 0 : index
    %c0_4 = arith.constant 0 : index
    %3 = vector.load %arg3[%c0_3, %c0_4] : memref<1x128xf32, #tpu.memory_space<vmem>>, vector<1x128xf32>
    %4 = vector.broadcast %3 : vector<1x128xf32> to vector<104x128xf32>
    %5 = arith.addf %2, %4 : vector<104x128xf32>
    %cst_5 = arith.constant 0.000000e+00 : f32
    %6 = vector.broadcast %cst_5 : f32 to vector<104x128xf32>
    %7 = arith.maximumf %5, %6 : vector<104x128xf32>
    %c0_6 = arith.constant 0 : index
    %c0_7 = arith.constant 0 : index
    %8 = vector.load %arg4[%c0_6, %c0_7] : memref<104x128xf32, #tpu.memory_space<vmem>>, vector<104x128xf32>
    tpu.vector_store %arg4[%c0_6, %c0_7], %7 {strides = array<i32>} : memref<104x128xf32, #tpu.memory_space<vmem>>, vector<104x128xf32>,
    return
  }
  func.func @transform_0(%arg0: i32) -> (i32, i32) {
    %c0_i32 = arith.constant 0 : i32
    %c0_i32_0 = arith.constant 0 : i32
    return %arg0, %c0_i32 : i32, i32
  }
  func.func @transform_1(%arg0: i32) -> (i32, i32) {
    %c0_i32 = arith.constant 0 : i32
    %c0_i32_0 = arith.constant 0 : i32
    %c0_i32_1 = arith.constant 0 : i32
    return %c0_i32, %c0_i32_0 : i32, i32
  }
  func.func @transform_2(%arg0: i32) -> (i32, i32) {
    %c0_i32 = arith.constant 0 : i32
    %c0_i32_0 = arith.constant 0 : i32
    %c0_i32_1 = arith.constant 0 : i32
    return %c0_i32, %c0_i32_0 : i32, i32
  }
  func.func @transform_3(%arg0: i32) -> (i32, i32) {
    %c0_i32 = arith.constant 0 : i32
    %c0_i32_0 = arith.constant 0 : i32
    return %arg0, %c0_i32 : i32, i32
  }
}

module attributes {stable_mosaic.version = 11 : i64} {
  func.func @_fused_fc_kernel(%arg0: memref<8x1152xbf16, #tpu.memory_space<vmem>>, %arg1: memref<1152x512xbf16, #tpu.memory_space<vmem>>, %arg2: memref<1x512xf32, #tpu.memory_space<vmem>>, %arg3: memref<512x128xbf16, #tpu.memory_space<vmem>>, %arg4: memref<1x128xf32, #tpu.memory_space<vmem>>, %arg5: memref<8x128xf32, #tpu.memory_space<vmem>>) attributes {dimension_semantics = [], scalar_prefetch = 0 : i64, scratch_operands = 0 : i64, tpu.core_type = #tpu.core_type<tc>} {
    %c0 = arith.constant 0 : index
    %c0_0 = arith.constant 0 : index
    %0 = vector.load %arg0[%c0, %c0_0] : memref<8x1152xbf16, #tpu.memory_space<vmem>>, vector<8x1152xbf16>
    %c0_1 = arith.constant 0 : index
    %c0_2 = arith.constant 0 : index
    %1 = vector.load %arg1[%c0_1, %c0_2] : memref<1152x512xbf16, #tpu.memory_space<vmem>>, vector<1152x512xbf16>
    %cst = arith.constant dense<0.000000e+00> : vector<8x512xf32>
    %2 = tpu.matmul %0, %1, %cst {dimension_numbers = #tpu.dot_dimension_numbers<[1], [0], [0], [1], [0, 0, 1, 1], [], []>} : vector<8x1152xbf16>, vector<1152x512xbf16>, vector<8x512xf32> -> vector<8x512xf32>
    %c0_3 = arith.constant 0 : index
    %c0_4 = arith.constant 0 : index
    %3 = vector.load %arg2[%c0_3, %c0_4] : memref<1x512xf32, #tpu.memory_space<vmem>>, vector<1x512xf32>
    %4 = vector.broadcast %3 : vector<1x512xf32> to vector<8x512xf32>
    %5 = arith.addf %2, %4 : vector<8x512xf32>
    %cst_5 = arith.constant 0.000000e+00 : f32
    %6 = vector.broadcast %cst_5 : f32 to vector<8x512xf32>
    %7 = arith.maximumf %5, %6 : vector<8x512xf32>
    %8 = arith.truncf %7 : vector<8x512xf32> to vector<8x512xbf16>
    %c0_6 = arith.constant 0 : index
    %c0_7 = arith.constant 0 : index
    %9 = vector.load %arg3[%c0_6, %c0_7] : memref<512x128xbf16, #tpu.memory_space<vmem>>, vector<512x128xbf16>
    %cst_8 = arith.constant dense<0.000000e+00> : vector<8x128xf32>
    %10 = tpu.matmul %8, %9, %cst_8 {dimension_numbers = #tpu.dot_dimension_numbers<[1], [0], [0], [1], [0, 0, 1, 1], [], []>} : vector<8x512xbf16>, vector<512x128xbf16>, vector<8x128xf32> -> vector<8x128xf32>
    %c0_9 = arith.constant 0 : index
    %c0_10 = arith.constant 0 : index
    %11 = vector.load %arg4[%c0_9, %c0_10] : memref<1x128xf32, #tpu.memory_space<vmem>>, vector<1x128xf32>
    %12 = vector.broadcast %11 : vector<1x128xf32> to vector<8x128xf32>
    %13 = arith.addf %10, %12 : vector<8x128xf32>
    %c0_11 = arith.constant 0 : index
    %c0_12 = arith.constant 0 : index
    %14 = vector.load %arg5[%c0_11, %c0_12] : memref<8x128xf32, #tpu.memory_space<vmem>>, vector<8x128xf32>
    tpu.vector_store %arg5[%c0_11, %c0_12], %13 {strides = array<i32>} : memref<8x128xf32, #tpu.memory_space<vmem>>, vector<8x128xf32>,
    return
  }
}

</mosaic_0001>

<bundles_post_ra>
// kernel: cnnh_forward.7
= control target key start
LH: loop header
LB: loop body
LE: loop exit
PB: predicated region body
PF: predicated region fallthrough
CT: control target
= control target key end

     0   :  { %s1239_s12 = smov 0   ;;  %s1453_s0 = inlined_call_operand.vmem [shape: bf16[2048,128], index: 0, kind: input, shape index: {}]   ;;  %s1454_s1 = inlined_call_operand.vmem [shape: bf16[128,128], index: 1, kind: input, shape index: {}]   ;;  %s1455_s2 = inlined_call_operand.vmem [shape: f32[1,128], index: 2, kind: input, shape index: {}]   ;;  %s1456_s3 = inlined_call_operand.vmem [shape: f32[2048,128], index: 3, kind: output, shape index: {}]  }
   0x1 LB: > { %s975_s13 = sadd.s32 4294967295, %s1217_s12   ;;  %p979_p0 = scmp.ge.s32.totalorder %s1217_s12, 1  ;;  %s1217_s12 = sphi %s1239_s12, %s13_s12  }
   0x2   : > { %p138_p1 = scmp.lt.s32.totalorder %s1217_s12, 5 }
   0x4   : > { %p139_p2 = pnand %p979_p0, %p138_p1 }
   0x5   : > { %v1171_v0 = vld [vmem:[%s1454_s1] sm:$0xff] (!%p139_p2)   ;;  %s980_s16 = sshll.u32 (!%p139_p2), %s975_s13, 6  ;;  %v1172_v1 = vld [vmem:[%s1454_s1 + $0x8] sm:$0xff] (!%p139_p2)   ;;  %v1173_v2 = vld [vmem:[%s1454_s1 + $0x10] sm:$0xff] (!%p139_p2)  }
   0x6   : > { %142 = sbr.rel (%p139_p2) target bundleno = 314 (0x13a), region = 32  ;;  %p163_p3 = scmp.lt.s32.totalorder (!%p139_p2), %s980_s16, 255  ;;  %1067 = vmatprep.subr.bf16.mxu0 (!%p139_p2), %v1171_v0  ;;  %1147 = vmatprep.subr.bf16.mxu1 (!%p139_p2), %v1171_v0  ;;  %v1174_v3 = vld [vmem:[%s1454_s1 + $0x18] sm:$0xff] (!%p139_p2)   ;;  %v1175_v6 = vld [vmem:[%s1454_s1 + $0x20] sm:$0xff] (!%p139_p2)   ;;  %v1176_v7 = vld [vmem:[%s1454_s1 + $0x28] sm:$0xff] (!%p139_p2)  }
   0x7   : > { %1068 = vmatpush3.bf16.msra.mxu0 (!%p139_p2), %v1171_v0  ;;  %1155 = vmatpush3.bf16.msra.mxu1 (!%p139_p2), %v1171_v0  ;;  %v1177_v8 = vld [vmem:[%s1454_s1 + $0x30] sm:$0xff] (!%p139_p2)   ;;  %v1178_v9 = vld [vmem:[%s1454_s1 + $0x38] sm:$0xff] (!%p139_p2)   ;;  %v1314_v40 = vld [vmem:[%s1455_s2] ss:$0 sm:$0xff] (!%p139_p2) }
   0x8   : > { %1069 = vmatprep.subr.bf16.mxu0 (!%p139_p2), %v1172_v1  ;;  %1148 = vmatprep.subr.bf16.mxu1 (!%p139_p2), %v1172_v1 }
   0xb   : > { %1070 = vmatpush3.bf16.msra.mxu0 (!%p139_p2), %v1172_v1  ;;  %1156 = vmatpush3.bf16.msra.mxu1 (!%p139_p2), %v1172_v1 }
   0xc   : > { %1071 = vmatprep.subr.bf16.mxu0 (!%p139_p2), %v1173_v2  ;;  %1149 = vmatprep.subr.bf16.mxu1 (!%p139_p2), %v1173_v2 }
   0xd   : > { %s1458_s16 = smov (!%p163_p3, %s980_s16), 255 }
   0xe   : > { %s981_s21 = sshll.u32 %s1458_s16, 2  ;;  %s983_s10 = sshll.u32 %s1458_s16, 3 }
   0xf   : > { %s1262_s24 = scalar_lea.vmem %s1453_s0, %s981_s21  ;;  %1072 = vmatpush3.bf16.msra.mxu0 %v1173_v2  ;;  %1157 = vmatpush3.bf16.msra.mxu1 %v1173_v2  ;;  %s1322_s14 = scalar_lea.vmem %s1456_s3, %s983_s10 }
  0x10   : > { %v1179_v4 = vld [vmem:[%s1262_s24] sm:$0xff]   ;;  %1073 = vmatprep.subr.bf16.mxu0 %v1174_v3  ;;  %1150 = vmatprep.subr.bf16.mxu1 %v1174_v3  ;;  %v1181_v10 = vld [vmem:[%s1262_s24 + $0x8] sm:$0xff]   ;;  %v1183_v12 = vld [vmem:[%s1262_s24 + $0x10] sm:$0xff]  }
  0x11   : > { %v1180_v5 = vld [vmem:[%s1262_s24 + $0x80] sm:$0xff]   ;;  %1083 = vmatprep.mubr.bf16.mxu0 %v1179_v4  ;;  %v1182_v11 = vld [vmem:[%s1262_s24 + $0x88] sm:$0xff]   ;;  %v1184_v13 = vld [vmem:[%s1262_s24 + $0x90] sm:$0xff]  }
  0x12   : > { %1115 = vmatprep.mubr.bf16.mxu1 %v1180_v5  ;;  %v1185_v14 = vld [vmem:[%s1262_s24 + $0x18] sm:$0xff]   ;;  %v1187_v16 = vld [vmem:[%s1262_s24 + $0x20] sm:$0xff]   ;;  %v1189_v18 = vld [vmem:[%s1262_s24 + $0x28] sm:$0xff]  }
  0x13   : > { %1074 = vmatpush3.bf16.msra.mxu0 %v1174_v3  ;;  %1158 = vmatpush3.bf16.msra.mxu1 %v1174_v3  ;;  %v1186_v15 = vld [vmem:[%s1262_s24 + $0x98] sm:$0xff]   ;;  %v1188_v17 = vld [vmem:[%s1262_s24 + $0xa0] sm:$0xff]   ;;  %v1190_v19 = vld [vmem:[%s1262_s24 + $0xa8] sm:$0xff]  }
  0x14   : > { %1075 = vmatprep.subr.bf16.mxu0 %v1175_v6  ;;  %1151 = vmatprep.subr.bf16.mxu1 %v1175_v6  ;;  %v1191_v20 = vld [vmem:[%s1262_s24 + $0x30] sm:$0xff]   ;;  %v1193_v22 = vld [vmem:[%s1262_s24 + $0x38] sm:$0xff]   ;;  %v1195_v24 = vld [vmem:[%s1262_s24 + $0x40] sm:$0xff]  }
  0x15   : > { %v1192_v21 = vld [vmem:[%s1262_s24 + $0xb0] sm:$0xff]   ;;  %v1194_v23 = vld [vmem:[%s1262_s24 + $0xb8] sm:$0xff]   ;;  %v1196_v25 = vld [vmem:[%s1262_s24 + $0xc0] sm:$0xff]  }
  0x16   : > { %v1197_v26 = vld [vmem:[%s1262_s24 + $0x48] sm:$0xff]   ;;  %v1199_v28 = vld [vmem:[%s1262_s24 + $0x50] sm:$0xff]   ;;  %v1201_v30 = vld [vmem:[%s1262_s24 + $0x58] sm:$0xff]  }
  0x17   : > { %1076 = vmatpush3.bf16.msra.mxu0 %v1175_v6  ;;  %1159 = vmatpush3.bf16.msra.mxu1 %v1175_v6  ;;  %v1198_v27 = vld [vmem:[%s1262_s24 + $0xc8] sm:$0xff]   ;;  %v1200_v29 = vld [vmem:[%s1262_s24 + $0xd0] sm:$0xff]   ;;  %v1202_v31 = vld [vmem:[%s1262_s24 + $0xd8] sm:$0xff]  }
  0x18   : > { %1077 = vmatprep.subr.bf16.mxu0 %v1176_v7  ;;  %1152 = vmatprep.subr.bf16.mxu1 %v1176_v7  ;;  %v1203_v32 = vld [vmem:[%s1262_s24 + $0x60] sm:$0xff]   ;;  %v1205_v34 = vld [vmem:[%s1262_s24 + $0x68] sm:$0xff]   ;;  %v1207_v36 = vld [vmem:[%s1262_s24 + $0x70] sm:$0xff]  }
  0x19   : > { %v1204_v33 = vld [vmem:[%s1262_s24 + $0xe0] sm:$0xff]   ;;  %v1206_v35 = vld [vmem:[%s1262_s24 + $0xe8] sm:$0xff]   ;;  %v1208_v37 = vld [vmem:[%s1262_s24 + $0xf0] sm:$0xff]  }
  0x1a   : > { %v1209_v38 = vld [vmem:[%s1262_s24 + $0x78] sm:$0xff]  }
  0x1b   : > { %1078 = vmatpush3.bf16.msra.mxu0 %v1176_v7  ;;  %1160 = vmatpush3.bf16.msra.mxu1 %v1176_v7  ;;  %v1210_v39 = vld [vmem:[%s1262_s24 + $0xf8] sm:$0xff]  }
  0x1c   : > { %1079 = vmatprep.subr.bf16.mxu0 %v1177_v8  ;;  %1153 = vmatprep.subr.bf16.mxu1 %v1177_v8 }
  0x1f   : > { %1080 = vmatpush3.bf16.msra.mxu0 %v1177_v8  ;;  %1161 = vmatpush3.bf16.msra.mxu1 %v1177_v8 }
  0x20   : > { %1081 = vmatprep.subr.bf16.mxu0 %v1178_v9  ;;  %1154 = vmatprep.subr.bf16.mxu1 %v1178_v9 }
  0x23   : > { %1082 = vmatpush3.bf16.msra.mxu0 %v1178_v9  ;;  %1162 = vmatpush3.bf16.msra.mxu1 %v1178_v9 }
  0x26   : > { %1084 = vmatmul.mubr.bf16.vlgmr.msra.gmra.mrb[0].mxu0 %v1181_v10  ;;  %1116 = vmatmul.mubr.bf16.vlgmr.msra.gmra.mrb[0].mxu1 %v1182_v11 }
  0x27   : > { %1087 = vmatprep.mubr.bf16.mxu0 %v1183_v12  ;;  %1119 = vmatprep.mubr.bf16.mxu1 %v1184_v13 }
  0x2e   : > { %1088 = vmatmul.mubr.bf16.gmra.mrb[4].mxu0 %v1185_v14  ;;  %1120 = vmatmul.mubr.bf16.gmra.mrb[4].mxu1 %v1186_v15 }
  0x2f   : > { %1091 = vmatprep.mubr.bf16.mxu0 %v1187_v16  ;;  %1123 = vmatprep.mubr.bf16.mxu1 %v1188_v17 }
  0x36   : > { %1092 = vmatmul.mubr.bf16.gmra.mrb[8].mxu0 %v1189_v18  ;;  %1124 = vmatmul.mubr.bf16.gmra.mrb[8].mxu1 %v1190_v19 }
  0x37   : > { %1095 = vmatprep.mubr.bf16.mxu0 %v1191_v20  ;;  %1127 = vmatprep.mubr.bf16.mxu1 %v1192_v21 }
  0x3e   : > { %1096 = vmatmul.mubr.bf16.gmra.mrb[12].mxu0 %v1193_v22  ;;  %1128 = vmatmul.mubr.bf16.gmra.mrb[12].mxu1 %v1194_v23 }
  0x3f   : > { %1099 = vmatprep.mubr.bf16.mxu0 %v1195_v24  ;;  %1131 = vmatprep.mubr.bf16.mxu1 %v1196_v25 }
  0x46   : > { %1100 = vmatmul.mubr.bf16.gmra.mrb[16].mxu0 %v1197_v26  ;;  %1132 = vmatmul.mubr.bf16.gmra.mrb[16].mxu1 %v1198_v27 }
  0x47   : > { %1103 = vmatprep.mubr.bf16.mxu0 %v1199_v28  ;;  %1135 = vmatprep.mubr.bf16.mxu1 %v1200_v29 }
  0x4e   : > { %1104 = vmatmul.mubr.bf16.gmra.mrb[20].mxu0 %v1201_v30  ;;  %1136 = vmatmul.mubr.bf16.gmra.mrb[20].mxu1 %v1202_v31 }
  0x4f   : > { %1107 = vmatprep.mubr.bf16.mxu0 %v1203_v32  ;;  %1139 = vmatprep.mubr.bf16.mxu1 %v1204_v33 }
  0x56   : > { %1108 = vmatmul.mubr.bf16.gmra.mrb[24].mxu0 %v1205_v34  ;;  %1140 = vmatmul.mubr.bf16.gmra.mrb[24].mxu1 %v1206_v35 }
  0x57   : > { %1111 = vmatprep.mubr.bf16.mxu0 %v1207_v36  ;;  %1143 = vmatprep.mubr.bf16.mxu1 %v1208_v37 }
  0x5e   : > { %1112 = vmatmul.mubr.bf16.gmra.mrb[28].mxu0 %v1209_v38  ;;  %1144 = vmatmul.mubr.bf16.gmra.mrb[28].mxu1 %v1210_v39 }
  0xf9   : > { %v1085_v41 = vpop.f32.mrb[0].mxu0  ;;  %v1117_v42 = vpop.f32.mrb[0].mxu1 }
  0xfa   : > { %v545_v43 = vadd.f32 %v1085_v41, %v1314_v40  ;;  %v673_v44 = vadd.f32 %v1117_v42, %v1314_v40  ;;  %v536_v45 = vpop.f32.mrb[1].mxu0  ;;  %v664_v46 = vpop.f32.mrb[1].mxu1 }
  0xfb   : > { %v537_v47 = vadd.f32 %v1314_v40, %v536_v45  ;;  %v665_v48 = vadd.f32 %v1314_v40, %v664_v46  ;;  %v1086_v49 = vpop.f32.mrb[2].mxu0  ;;  %v1118_v50 = vpop.f32.mrb[2].mxu1 }
  0xfc   : > { %v793_v51 = vmax.f32 %v545_v43, 0.0  ;;  %v825_v52 = vmax.f32 %v673_v44, 0.0  ;;  %v548_v53 = vadd.f32 %v1086_v49, %v1314_v40  ;;  %v676_v54 = vadd.f32 %v1118_v50, %v1314_v40  ;;  %v539_v55 = vpop.f32.mrb[3].mxu0  ;;  %v667_v56 = vpop.f32.mrb[3].mxu1 }
  0xfd   : > { %v791_v57 = vmax.f32 %v537_v47, 0.0  ;;  %v823_v58 = vmax.f32 %v665_v48, 0.0  ;;  %v540_v59 = vadd.f32 %v1314_v40, %v539_v55  ;;  %v668_v60 = vadd.f32 %v1314_v40, %v667_v56 }
  0xfe   : > { %857 = vst [vmem:[%s1322_s14 + $0x10] sm:$0xff] %v793_v51  ;;  %889 = vst [vmem:[%s1322_s14 + $0x110] sm:$0xff] %v825_v52  ;;  %v794_v61 = vmax.f32 %v548_v53, 0.0  ;;  %v826_v62 = vmax.f32 %v676_v54, 0.0 }
  0xff   : > { %855 = vst [vmem:[%s1322_s14] sm:$0xff] %v791_v57  ;;  %887 = vst [vmem:[%s1322_s14 + $0x100] sm:$0xff] %v823_v58  ;;  %v792_v63 = vmax.f32 %v540_v59, 0.0  ;;  %v824_v0 = vmax.f32 %v668_v60, 0.0 }
 0x100   : > { %858 = vst [vmem:[%s1322_s14 + $0x18] sm:$0xff] %v794_v61  ;;  %890 = vst [vmem:[%s1322_s14 + $0x118] sm:$0xff] %v826_v62 }
 0x101   : > { %856 = vst [vmem:[%s1322_s14 + $0x8] sm:$0xff] %v792_v63  ;;  %888 = vst [vmem:[%s1322_s14 + $0x108] sm:$0xff] %v824_v0  ;;  %v1089_v1 = vpop.f32.mrb[4].mxu0  ;;  %v1121_v2 = vpop.f32.mrb[4].mxu1 }
 0x102   : > { %v561_v3 = vadd.f32 %v1089_v1, %v1314_v40  ;;  %v689_v4 = vadd.f32 %v1121_v2, %v1314_v40  ;;  %v552_v5 = vpop.f32.mrb[5].mxu0  ;;  %v680_v6 = vpop.f32.mrb[5].mxu1 }
 0x103   : > { %v553_v7 = vadd.f32 %v1314_v40, %v552_v5  ;;  %v681_v8 = vadd.f32 %v1314_v40, %v680_v6  ;;  %v1090_v9 = vpop.f32.mrb[6].mxu0  ;;  %v1122_v10 = vpop.f32.mrb[6].mxu1 }
 0x104   : > { %v797_v11 = vmax.f32 %v561_v3, 0.0  ;;  %v829_v12 = vmax.f32 %v689_v4, 0.0  ;;  %v564_v13 = vadd.f32 %v1090_v9, %v1314_v40  ;;  %v692_v14 = vadd.f32 %v1122_v10, %v1314_v40  ;;  %v555_v15 = vpop.f32.mrb[7].mxu0  ;;  %v683_v16 = vpop.f32.mrb[7].mxu1 }
 0x105   : > { %v795_v17 = vmax.f32 %v553_v7, 0.0  ;;  %v827_v18 = vmax.f32 %v681_v8, 0.0  ;;  %v556_v19 = vadd.f32 %v1314_v40, %v555_v15  ;;  %v684_v20 = vadd.f32 %v1314_v40, %v683_v16 }
 0x106   : > { %861 = vst [vmem:[%s1322_s14 + $0x30] sm:$0xff] %v797_v11  ;;  %893 = vst [vmem:[%s1322_s14 + $0x130] sm:$0xff] %v829_v12  ;;  %v798_v21 = vmax.f32 %v564_v13, 0.0  ;;  %v830_v22 = vmax.f32 %v692_v14, 0.0 }
 0x107   : > { %859 = vst [vmem:[%s1322_s14 + $0x20] sm:$0xff] %v795_v17  ;;  %891 = vst [vmem:[%s1322_s14 + $0x120] sm:$0xff] %v827_v18  ;;  %v796_v23 = vmax.f32 %v556_v19, 0.0  ;;  %v828_v24 = vmax.f32 %v684_v20, 0.0 }
 0x108   : > { %862 = vst [vmem:[%s1322_s14 + $0x38] sm:$0xff] %v798_v21  ;;  %894 = vst [vmem:[%s1322_s14 + $0x138] sm:$0xff] %v830_v22 }
 0x109   : > { %860 = vst [vmem:[%s1322_s14 + $0x28] sm:$0xff] %v796_v23  ;;  %892 = vst [vmem:[%s1322_s14 + $0x128] sm:$0xff] %v828_v24  ;;  %v1093_v25 = vpop.f32.mrb[8].mxu0  ;;  %v1125_v26 = vpop.f32.mrb[8].mxu1 }
 0x10a   : > { %v577_v27 = vadd.f32 %v1093_v25, %v1314_v40  ;;  %v705_v28 = vadd.f32 %v1125_v26, %v1314_v40  ;;  %v568_v29 = vpop.f32.mrb[9].mxu0  ;;  %v696_v30 = vpop.f32.mrb[9].mxu1 }
 0x10b   : > { %v569_v31 = vadd.f32 %v1314_v40, %v568_v29  ;;  %v697_v32 = vadd.f32 %v1314_v40, %v696_v30  ;;  %v1094_v33 = vpop.f32.mrb[10].mxu0  ;;  %v1126_v34 = vpop.f32.mrb[10].mxu1 }
 0x10c   : > { %v801_v35 = vmax.f32 %v577_v27, 0.0  ;;  %v833_v36 = vmax.f32 %v705_v28, 0.0  ;;  %v580_v37 = vadd.f32 %v1094_v33, %v1314_v40  ;;  %v708_v38 = vadd.f32 %v1126_v34, %v1314_v40  ;;  %v571_v39 = vpop.f32.mrb[11].mxu0  ;;  %v699_v41 = vpop.f32.mrb[11].mxu1 }
 0x10d   : > { %v799_v42 = vmax.f32 %v569_v31, 0.0  ;;  %v831_v43 = vmax.f32 %v697_v32, 0.0  ;;  %v572_v44 = vadd.f32 %v1314_v40, %v571_v39  ;;  %v700_v45 = vadd.f32 %v1314_v40, %v699_v41 }
 0x10e   : > { %865 = vst [vmem:[%s1322_s14 + $0x50] sm:$0xff] %v801_v35  ;;  %897 = vst [vmem:[%s1322_s14 + $0x150] sm:$0xff] %v833_v36  ;;  %v802_v46 = vmax.f32 %v580_v37, 0.0  ;;  %v834_v47 = vmax.f32 %v708_v38, 0.0 }
 0x10f   : > { %863 = vst [vmem:[%s1322_s14 + $0x40] sm:$0xff] %v799_v42  ;;  %895 = vst [vmem:[%s1322_s14 + $0x140] sm:$0xff] %v831_v43  ;;  %v800_v48 = vmax.f32 %v572_v44, 0.0  ;;  %v832_v49 = vmax.f32 %v700_v45, 0.0 }
 0x110   : > { %866 = vst [vmem:[%s1322_s14 + $0x58] sm:$0xff] %v802_v46  ;;  %898 = vst [vmem:[%s1322_s14 + $0x158] sm:$0xff] %v834_v47 }
 0x111   : > { %864 = vst [vmem:[%s1322_s14 + $0x48] sm:$0xff] %v800_v48  ;;  %896 = vst [vmem:[%s1322_s14 + $0x148] sm:$0xff] %v832_v49  ;;  %v1097_v50 = vpop.f32.mrb[12].mxu0  ;;  %v1129_v51 = vpop.f32.mrb[12].mxu1 }
 0x112   : > { %v593_v52 = vadd.f32 %v1097_v50, %v1314_v40  ;;  %v721_v53 = vadd.f32 %v1129_v51, %v1314_v40  ;;  %v584_v54 = vpop.f32.mrb[13].mxu0  ;;  %v712_v55 = vpop.f32.mrb[13].mxu1 }
 0x113   : > { %v585_v56 = vadd.f32 %v1314_v40, %v584_v54  ;;  %v713_v57 = vadd.f32 %v1314_v40, %v712_v55  ;;  %v1098_v58 = vpop.f32.mrb[14].mxu0  ;;  %v1130_v59 = vpop.f32.mrb[14].mxu1 }
 0x114   : > { %v805_v60 = vmax.f32 %v593_v52, 0.0  ;;  %v837_v61 = vmax.f32 %v721_v53, 0.0  ;;  %v596_v62 = vadd.f32 %v1098_v58, %v1314_v40  ;;  %v724_v63 = vadd.f32 %v1130_v59, %v1314_v40  ;;  %v587_v0 = vpop.f32.mrb[15].mxu0  ;;  %v715_v1 = vpop.f32.mrb[15].mxu1 }
 0x115   : > { %v803_v2 = vmax.f32 %v585_v56, 0.0  ;;  %v835_v3 = vmax.f32 %v713_v57, 0.0  ;;  %v588_v4 = vadd.f32 %v1314_v40, %v587_v0  ;;  %v716_v5 = vadd.f32 %v1314_v40, %v715_v1 }
 0x116   : > { %869 = vst [vmem:[%s1322_s14 + $0x70] sm:$0xff] %v805_v60  ;;  %901 = vst [vmem:[%s1322_s14 + $0x170] sm:$0xff] %v837_v61  ;;  %v806_v6 = vmax.f32 %v596_v62, 0.0  ;;  %v838_v7 = vmax.f32 %v724_v63, 0.0 }
 0x117   : > { %867 = vst [vmem:[%s1322_s14 + $0x60] sm:$0xff] %v803_v2  ;;  %899 = vst [vmem:[%s1322_s14 + $0x160] sm:$0xff] %v835_v3  ;;  %v804_v8 = vmax.f32 %v588_v4, 0.0  ;;  %v836_v9 = vmax.f32 %v716_v5, 0.0 }
 0x118   : > { %870 = vst [vmem:[%s1322_s14 + $0x78] sm:$0xff] %v806_v6  ;;  %902 = vst [vmem:[%s1322_s14 + $0x178] sm:$0xff] %v838_v7 }
 0x119   : > { %868 = vst [vmem:[%s1322_s14 + $0x68] sm:$0xff] %v804_v8  ;;  %900 = vst [vmem:[%s1322_s14 + $0x168] sm:$0xff] %v836_v9  ;;  %v1101_v10 = vpop.f32.mrb[16].mxu0  ;;  %v1133_v11 = vpop.f32.mrb[16].mxu1 }
 0x11a   : > { %v609_v12 = vadd.f32 %v1101_v10, %v1314_v40  ;;  %v737_v13 = vadd.f32 %v1133_v11, %v1314_v40  ;;  %v600_v14 = vpop.f32.mrb[17].mxu0  ;;  %v728_v15 = vpop.f32.mrb[17].mxu1 }
 0x11b   : > { %v601_v16 = vadd.f32 %v1314_v40, %v600_v14  ;;  %v729_v17 = vadd.f32 %v1314_v40, %v728_v15  ;;  %v1102_v18 = vpop.f32.mrb[18].mxu0  ;;  %v1134_v19 = vpop.f32.mrb[18].mxu1 }
 0x11c   : > { %v809_v20 = vmax.f32 %v609_v12, 0.0  ;;  %v841_v21 = vmax.f32 %v737_v13, 0.0  ;;  %v612_v22 = vadd.f32 %v1102_v18, %v1314_v40  ;;  %v740_v23 = vadd.f32 %v1134_v19, %v1314_v40  ;;  %v603_v24 = vpop.f32.mrb[19].mxu0  ;;  %v731_v25 = vpop.f32.mrb[19].mxu1 }
 0x11d   : > { %v807_v26 = vmax.f32 %v601_v16, 0.0  ;;  %v839_v27 = vmax.f32 %v729_v17, 0.0  ;;  %v604_v28 = vadd.f32 %v1314_v40, %v603_v24  ;;  %v732_v29 = vadd.f32 %v1314_v40, %v731_v25 }
 0x11e   : > { %873 = vst [vmem:[%s1322_s14 + $0x90] sm:$0xff] %v809_v20  ;;  %905 = vst [vmem:[%s1322_s14 + $0x190] sm:$0xff] %v841_v21  ;;  %v810_v30 = vmax.f32 %v612_v22, 0.0  ;;  %v842_v31 = vmax.f32 %v740_v23, 0.0 }
 0x11f   : > { %871 = vst [vmem:[%s1322_s14 + $0x80] sm:$0xff] %v807_v26  ;;  %903 = vst [vmem:[%s1322_s14 + $0x180] sm:$0xff] %v839_v27  ;;  %v808_v32 = vmax.f32 %v604_v28, 0.0  ;;  %v840_v33 = vmax.f32 %v732_v29, 0.0 }
 0x120   : > { %874 = vst [vmem:[%s1322_s14 + $0x98] sm:$0xff] %v810_v30  ;;  %906 = vst [vmem:[%s1322_s14 + $0x198] sm:$0xff] %v842_v31 }
 0x121   : > { %872 = vst [vmem:[%s1322_s14 + $0x88] sm:$0xff] %v808_v32  ;;  %904 = vst [vmem:[%s1322_s14 + $0x188] sm:$0xff] %v840_v33  ;;  %v1105_v34 = vpop.f32.mrb[20].mxu0  ;;  %v1137_v35 = vpop.f32.mrb[20].mxu1 }
 0x122   : > { %v625_v36 = vadd.f32 %v1105_v34, %v1314_v40  ;;  %v753_v37 = vadd.f32 %v1137_v35, %v1314_v40  ;;  %v616_v38 = vpop.f32.mrb[21].mxu0  ;;  %v744_v39 = vpop.f32.mrb[21].mxu1 }
 0x123   : > { %v617_v41 = vadd.f32 %v1314_v40, %v616_v38  ;;  %v745_v42 = vadd.f32 %v1314_v40, %v744_v39  ;;  %v1106_v43 = vpop.f32.mrb[22].mxu0  ;;  %v1138_v44 = vpop.f32.mrb[22].mxu1 }
 0x124   : > { %v813_v45 = vmax.f32 %v625_v36, 0.0  ;;  %v845_v46 = vmax.f32 %v753_v37, 0.0  ;;  %v628_v47 = vadd.f32 %v1106_v43, %v1314_v40  ;;  %v756_v48 = vadd.f32 %v1138_v44, %v1314_v40  ;;  %v619_v49 = vpop.f32.mrb[23].mxu0  ;;  %v747_v50 = vpop.f32.mrb[23].mxu1 }
 0x125   : > { %v811_v51 = vmax.f32 %v617_v41, 0.0  ;;  %v843_v52 = vmax.f32 %v745_v42, 0.0  ;;  %v620_v53 = vadd.f32 %v1314_v40, %v619_v49  ;;  %v748_v54 = vadd.f32 %v1314_v40, %v747_v50 }
 0x126   : > { %877 = vst [vmem:[%s1322_s14 + $0xb0] sm:$0xff] %v813_v45  ;;  %909 = vst [vmem:[%s1322_s14 + $0x1b0] sm:$0xff] %v845_v46  ;;  %v814_v55 = vmax.f32 %v628_v47, 0.0  ;;  %v846_v56 = vmax.f32 %v756_v48, 0.0 }
 0x127   : > { %875 = vst [vmem:[%s1322_s14 + $0xa0] sm:$0xff] %v811_v51  ;;  %907 = vst [vmem:[%s1322_s14 + $0x1a0] sm:$0xff] %v843_v52  ;;  %v812_v57 = vmax.f32 %v620_v53, 0.0  ;;  %v844_v58 = vmax.f32 %v748_v54, 0.0 }
 0x128   : > { %878 = vst [vmem:[%s1322_s14 + $0xb8] sm:$0xff] %v814_v55  ;;  %910 = vst [vmem:[%s1322_s14 + $0x1b8] sm:$0xff] %v846_v56 }
 0x129   : > { %876 = vst [vmem:[%s1322_s14 + $0xa8] sm:$0xff] %v812_v57  ;;  %908 = vst [vmem:[%s1322_s14 + $0x1a8] sm:$0xff] %v844_v58  ;;  %v1109_v59 = vpop.f32.mrb[24].mxu0  ;;  %v1141_v60 = vpop.f32.mrb[24].mxu1 }
 0x12a   : > { %v641_v61 = vadd.f32 %v1109_v59, %v1314_v40  ;;  %v769_v62 = vadd.f32 %v1141_v60, %v1314_v40  ;;  %v632_v63 = vpop.f32.mrb[25].mxu0  ;;  %v760_v0 = vpop.f32.mrb[25].mxu1 }
 0x12b   : > { %v633_v1 = vadd.f32 %v1314_v40, %v632_v63  ;;  %v761_v2 = vadd.f32 %v1314_v40, %v760_v0  ;;  %v1110_v3 = vpop.f32.mrb[26].mxu0  ;;  %v1142_v4 = vpop.f32.mrb[26].mxu1 }
 0x12c   : > { %v817_v5 = vmax.f32 %v641_v61, 0.0  ;;  %v849_v6 = vmax.f32 %v769_v62, 0.0  ;;  %v644_v7 = vadd.f32 %v1110_v3, %v1314_v40  ;;  %v772_v8 = vadd.f32 %v1142_v4, %v1314_v40  ;;  %v635_v9 = vpop.f32.mrb[27].mxu0  ;;  %v763_v10 = vpop.f32.mrb[27].mxu1 }
 0x12d   : > { %v815_v11 = vmax.f32 %v633_v1, 0.0  ;;  %v847_v12 = vmax.f32 %v761_v2, 0.0  ;;  %v636_v13 = vadd.f32 %v1314_v40, %v635_v9  ;;  %v764_v14 = vadd.f32 %v1314_v40, %v763_v10 }
 0x12e   : > { %881 = vst [vmem:[%s1322_s14 + $0xd0] sm:$0xff] %v817_v5  ;;  %913 = vst [vmem:[%s1322_s14 + $0x1d0] sm:$0xff] %v849_v6  ;;  %v818_v15 = vmax.f32 %v644_v7, 0.0  ;;  %v850_v16 = vmax.f32 %v772_v8, 0.0 }
 0x12f   : > { %879 = vst [vmem:[%s1322_s14 + $0xc0] sm:$0xff] %v815_v11  ;;  %911 = vst [vmem:[%s1322_s14 + $0x1c0] sm:$0xff] %v847_v12  ;;  %v816_v17 = vmax.f32 %v636_v13, 0.0  ;;  %v848_v18 = vmax.f32 %v764_v14, 0.0 }
 0x130   : > { %882 = vst [vmem:[%s1322_s14 + $0xd8] sm:$0xff] %v818_v15  ;;  %914 = vst [vmem:[%s1322_s14 + $0x1d8] sm:$0xff] %v850_v16 }
 0x131   : > { %880 = vst [vmem:[%s1322_s14 + $0xc8] sm:$0xff] %v816_v17  ;;  %912 = vst [vmem:[%s1322_s14 + $0x1c8] sm:$0xff] %v848_v18  ;;  %v1113_v19 = vpop.f32.mrb[28].mxu0  ;;  %v1145_v20 = vpop.f32.mrb[28].mxu1 }
 0x132   : > { %v657_v21 = vadd.f32 %v1113_v19, %v1314_v40  ;;  %v785_v22 = vadd.f32 %v1145_v20, %v1314_v40  ;;  %v648_v23 = vpop.f32.mrb[29].mxu0  ;;  %v776_v24 = vpop.f32.mrb[29].mxu1 }
 0x133   : > { %v649_v25 = vadd.f32 %v1314_v40, %v648_v23  ;;  %v777_v26 = vadd.f32 %v1314_v40, %v776_v24  ;;  %v1114_v27 = vpop.f32.mrb[30].mxu0  ;;  %v1146_v28 = vpop.f32.mrb[30].mxu1 }
 0x134   : > { %v821_v29 = vmax.f32 %v657_v21, 0.0  ;;  %v853_v30 = vmax.f32 %v785_v22, 0.0  ;;  %v660_v31 = vadd.f32 %v1114_v27, %v1314_v40  ;;  %v788_v32 = vadd.f32 %v1146_v28, %v1314_v40  ;;  %v651_v33 = vpop.f32.mrb[31].mxu0  ;;  %v779_v34 = vpop.f32.mrb[31].mxu1 }
 0x135   : > { %v819_v35 = vmax.f32 %v649_v25, 0.0  ;;  %v851_v36 = vmax.f32 %v777_v26, 0.0  ;;  %v652_v37 = vadd.f32 %v1314_v40, %v651_v33  ;;  %v780_v38 = vadd.f32 %v1314_v40, %v779_v34 }
 0x136   : > { %885 = vst [vmem:[%s1322_s14 + $0xf0] sm:$0xff] %v821_v29  ;;  %917 = vst [vmem:[%s1322_s14 + $0x1f0] sm:$0xff] %v853_v30  ;;  %v822_v39 = vmax.f32 %v660_v31, 0.0  ;;  %v854_v41 = vmax.f32 %v788_v32, 0.0 }
 0x137   : > { %883 = vst [vmem:[%s1322_s14 + $0xe0] sm:$0xff] %v819_v35  ;;  %915 = vst [vmem:[%s1322_s14 + $0x1e0] sm:$0xff] %v851_v36  ;;  %v820_v42 = vmax.f32 %v652_v37, 0.0  ;;  %v852_v43 = vmax.f32 %v780_v38, 0.0 }
 0x138   : > { %886 = vst [vmem:[%s1322_s14 + $0xf8] sm:$0xff] %v822_v39  ;;  %918 = vst [vmem:[%s1322_s14 + $0x1f8] sm:$0xff] %v854_v41 }
 0x139   : > { %884 = vst [vmem:[%s1322_s14 + $0xe8] sm:$0xff] %v820_v42  ;;  %916 = vst [vmem:[%s1322_s14 + $0x1e8] sm:$0xff] %v852_v43 }
 0x13a PF: > { %s13_s12 = sadd.s32 1, %s1217_s12  }
 0x13b   : > { %p10_p4 = scmp.ge.s32.totalorder %s13_s12, 6  }
 0x13d   :  { %12 = sbr.rel (!%p10_p4) target bundleno = 1 (0x1), region = 62 }

// kernel: cnnh_forward.8
= control target key start
LH: loop header
LB: loop body
LE: loop exit
PB: predicated region body
PF: predicated region fallthrough
CT: control target
= control target key end

     0   :  { %s788_s6 = smov 0   ;;  %s790_s7 = smov 0   ;;  %s1076_s0 = inlined_call_operand.vmem [shape: f32[9,128,128], index: 0, kind: input, shape index: {}]   ;;  %s1077_s1 = inlined_call_operand.vmem [shape: f32[128,128], index: 1, kind: output, shape index: {}]  }
   0x1   :  { %s792_s8 = smov 0  }
   0x2 LB: > { %s652_s9 = sadd.s32 4294967295, %s776_s8   ;;  %s805_s10 = sadd.s32 1, %s776_s8   ;;  %s776_s8 = sphi %s792_s8, %s1080_s8   ;;  %s772_s7 = sphi %s790_s7, %s1079_s7   ;;  %s768_s6 = sphi %s788_s6, %s1078_s6  }
   0x3   : > { %s15_s11 = ssub.s32 %s776_s8, %s805_s10  ;;  %s18_s12 = sadd.s32 1, %s772_s7 }
   0x4   : > { %p16_p0 = scmp.eq.s32.totalorder %s15_s11, 0  ;;  %p25_p1 = scmp.ne.s32.totalorder %s772_s7, %s768_s6 }
   0x5   : > { %p26_p2 = scmp.eq.s32.totalorder %s776_s8, 0  ;;  %p655_p4 = scmp.ge.s32.totalorder %s776_s8, 2 }
   0x6   : > { %s814_s13 = scalar_select %p16_p0, %s772_s7, %s18_s12  }
   0x7   : > { %p27_p3 = por %p26_p2, %p25_p1  ;;  %77 = sbr.rel (%p655_p4) target bundleno = 55 (0x37), region = 16 }
   0xe   : > { %80 = sbr.rel (!%p27_p3) target bundleno = 55 (0x37), region = 20  ;;  %s82_s14 = sand.u32 (%p27_p3), 1, %s772_s7  }
   0xf   : > { %s727_s15 = sshll.u32 (%p27_p3), %s776_s8, 6  ;;  %s728_s16 = smul.u32 (%p27_p3), 576, %s82_s14 }
  0x10   : > { %s822_s19 = scalar_lea.vmem (%p27_p3), %s1076_s0, %s727_s15 }
  0x11   : > { %v257_v0 = vld [vmem:[%s822_s19] sm:$0xff] (%p27_p3)  ;;  %v259_v1 = vld [vmem:[%s822_s19 + $0x8] sm:$0xff] (%p27_p3)  ;;  %v261_v2 = vld [vmem:[%s822_s19 + $0x10] sm:$0xff] (%p27_p3)  ;;  %s830_s20 = scalar_lea.vmem (%p27_p3), [#allocation2], %s728_s16 }
  0x12   : > { %v263_v3 = vld [vmem:[%s822_s19 + $0x18] sm:$0xff] (%p27_p3)  ;;  %v265_v4 = vld [vmem:[%s822_s19 + $0x20] sm:$0xff] (%p27_p3)  ;;  %v267_v5 = vld [vmem:[%s822_s19 + $0x28] sm:$0xff] (%p27_p3)  ;;  %258 = vst [vmem:[%s830_s20] sm:$0xff] (%p27_p3), %v257_v0 }
  0x13   : > { %260 = vst [vmem:[%s830_s20 + $0x8] sm:$0xff] (%p27_p3), %v259_v1  ;;  %262 = vst [vmem:[%s830_s20 + $0x10] sm:$0xff] (%p27_p3), %v261_v2  ;;  %v269_v6 = vld [vmem:[%s822_s19 + $0x30] sm:$0xff] (%p27_p3)  ;;  %v271_v7 = vld [vmem:[%s822_s19 + $0x38] sm:$0xff] (%p27_p3) }
  0x14   : > { %264 = vst [vmem:[%s830_s20 + $0x18] sm:$0xff] (%p27_p3), %v263_v3  ;;  %266 = vst [vmem:[%s830_s20 + $0x20] sm:$0xff] (%p27_p3), %v265_v4  ;;  %v273_v8 = vld [vmem:[%s822_s19 + $0x80] sm:$0xff] (%p27_p3)  ;;  %v275_v9 = vld [vmem:[%s822_s19 + $0x88] sm:$0xff] (%p27_p3) }
  0x15   : > { %268 = vst [vmem:[%s830_s20 + $0x28] sm:$0xff] %v267_v5  ;;  %270 = vst [vmem:[%s830_s20 + $0x30] sm:$0xff] %v269_v6  ;;  %v277_v10 = vld [vmem:[%s822_s19 + $0x90] sm:$0xff]  ;;  %v279_v11 = vld [vmem:[%s822_s19 + $0x98] sm:$0xff] }
  0x16   : > { %272 = vst [vmem:[%s830_s20 + $0x38] sm:$0xff] %v271_v7  ;;  %274 = vst [vmem:[%s830_s20 + $0x40] sm:$0xff] %v273_v8  ;;  %v281_v12 = vld [vmem:[%s822_s19 + $0xa0] sm:$0xff]  ;;  %v283_v13 = vld [vmem:[%s822_s19 + $0xa8] sm:$0xff] }
  0x17   : > { %276 = vst [vmem:[%s830_s20 + $0x48] sm:$0xff] %v275_v9  ;;  %278 = vst [vmem:[%s830_s20 + $0x50] sm:$0xff] %v277_v10  ;;  %v285_v14 = vld [vmem:[%s822_s19 + $0xb0] sm:$0xff]  ;;  %v287_v15 = vld [vmem:[%s822_s19 + $0xb8] sm:$0xff] }
  0x18   : > { %280 = vst [vmem:[%s830_s20 + $0x58] sm:$0xff] %v279_v11  ;;  %282 = vst [vmem:[%s830_s20 + $0x60] sm:$0xff] %v281_v12  ;;  %v289_v16 = vld [vmem:[%s822_s19 + $0x100] sm:$0xff]  ;;  %v291_v17 = vld [vmem:[%s822_s19 + $0x108] sm:$0xff] }
  0x19   : > { %284 = vst [vmem:[%s830_s20 + $0x68] sm:$0xff] %v283_v13  ;;  %286 = vst [vmem:[%s830_s20 + $0x70] sm:$0xff] %v285_v14  ;;  %v293_v18 = vld [vmem:[%s822_s19 + $0x110] sm:$0xff]  ;;  %v295_v19 = vld [vmem:[%s822_s19 + $0x118] sm:$0xff] }
  0x1a   : > { %288 = vst [vmem:[%s830_s20 + $0x78] sm:$0xff] %v287_v15  ;;  %290 = vst [vmem:[%s830_s20 + $0x80] sm:$0xff] %v289_v16  ;;  %v297_v20 = vld [vmem:[%s822_s19 + $0x120] sm:$0xff]  ;;  %v299_v21 = vld [vmem:[%s822_s19 + $0x128] sm:$0xff] }
  0x1b   : > { %292 = vst [vmem:[%s830_s20 + $0x88] sm:$0xff] %v291_v17  ;;  %294 = vst [vmem:[%s830_s20 + $0x90] sm:$0xff] %v293_v18  ;;  %v301_v22 = vld [vmem:[%s822_s19 + $0x130] sm:$0xff]  ;;  %v303_v23 = vld [vmem:[%s822_s19 + $0x138] sm:$0xff] }
  0x1c   : > { %296 = vst [vmem:[%s830_s20 + $0x98] sm:$0xff] %v295_v19  ;;  %298 = vst [vmem:[%s830_s20 + $0xa0] sm:$0xff] %v297_v20  ;;  %v305_v24 = vld [vmem:[%s822_s19 + $0x180] sm:$0xff]  ;;  %v307_v25 = vld [vmem:[%s822_s19 + $0x188] sm:$0xff] }
  0x1d   : > { %300 = vst [vmem:[%s830_s20 + $0xa8] sm:$0xff] %v299_v21  ;;  %302 = vst [vmem:[%s830_s20 + $0xb0] sm:$0xff] %v301_v22  ;;  %v309_v26 = vld [vmem:[%s822_s19 + $0x190] sm:$0xff]  ;;  %v311_v27 = vld [vmem:[%s822_s19 + $0x198] sm:$0xff] }
  0x1e   : > { %304 = vst [vmem:[%s830_s20 + $0xb8] sm:$0xff] %v303_v23  ;;  %306 = vst [vmem:[%s830_s20 + $0xc0] sm:$0xff] %v305_v24  ;;  %v313_v28 = vld [vmem:[%s822_s19 + $0x1a0] sm:$0xff]  ;;  %v315_v29 = vld [vmem:[%s822_s19 + $0x1a8] sm:$0xff] }
  0x1f   : > { %308 = vst [vmem:[%s830_s20 + $0xc8] sm:$0xff] %v307_v25  ;;  %310 = vst [vmem:[%s830_s20 + $0xd0] sm:$0xff] %v309_v26  ;;  %v317_v30 = vld [vmem:[%s822_s19 + $0x1b0] sm:$0xff]  ;;  %v319_v31 = vld [vmem:[%s822_s19 + $0x1b8] sm:$0xff] }
  0x20   : > { %312 = vst [vmem:[%s830_s20 + $0xd8] sm:$0xff] %v311_v27  ;;  %314 = vst [vmem:[%s830_s20 + $0xe0] sm:$0xff] %v313_v28  ;;  %v321_v32 = vld [vmem:[%s822_s19 + $0x200] sm:$0xff]  ;;  %v323_v33 = vld [vmem:[%s822_s19 + $0x208] sm:$0xff] }
  0x21   : > { %316 = vst [vmem:[%s830_s20 + $0xe8] sm:$0xff] %v315_v29  ;;  %318 = vst [vmem:[%s830_s20 + $0xf0] sm:$0xff] %v317_v30  ;;  %v325_v34 = vld [vmem:[%s822_s19 + $0x210] sm:$0xff]  ;;  %v327_v35 = vld [vmem:[%s822_s19 + $0x218] sm:$0xff] }
  0x22   : > { %320 = vst [vmem:[%s830_s20 + $0xf8] sm:$0xff] %v319_v31  ;;  %322 = vst [vmem:[%s830_s20 + $0x100] sm:$0xff] %v321_v32  ;;  %v329_v36 = vld [vmem:[%s822_s19 + $0x220] sm:$0xff]  ;;  %v331_v37 = vld [vmem:[%s822_s19 + $0x228] sm:$0xff] }
  0x23   : > { %324 = vst [vmem:[%s830_s20 + $0x108] sm:$0xff] %v323_v33  ;;  %326 = vst [vmem:[%s830_s20 + $0x110] sm:$0xff] %v325_v34  ;;  %v333_v38 = vld [vmem:[%s822_s19 + $0x230] sm:$0xff]  ;;  %v335_v39 = vld [vmem:[%s822_s19 + $0x238] sm:$0xff] }
  0x24   : > { %328 = vst [vmem:[%s830_s20 + $0x118] sm:$0xff] %v327_v35  ;;  %330 = vst [vmem:[%s830_s20 + $0x120] sm:$0xff] %v329_v36  ;;  %v337_v40 = vld [vmem:[%s822_s19 + $0x280] sm:$0xff]  ;;  %v339_v41 = vld [vmem:[%s822_s19 + $0x288] sm:$0xff] }
  0x25   : > { %332 = vst [vmem:[%s830_s20 + $0x128] sm:$0xff] %v331_v37  ;;  %334 = vst [vmem:[%s830_s20 + $0x130] sm:$0xff] %v333_v38  ;;  %v341_v42 = vld [vmem:[%s822_s19 + $0x290] sm:$0xff]  ;;  %v343_v43 = vld [vmem:[%s822_s19 + $0x298] sm:$0xff] }
  0x26   : > { %336 = vst [vmem:[%s830_s20 + $0x138] sm:$0xff] %v335_v39  ;;  %338 = vst [vmem:[%s830_s20 + $0x140] sm:$0xff] %v337_v40  ;;  %v345_v44 = vld [vmem:[%s822_s19 + $0x2a0] sm:$0xff]  ;;  %v347_v45 = vld [vmem:[%s822_s19 + $0x2a8] sm:$0xff] }
  0x27   : > { %340 = vst [vmem:[%s830_s20 + $0x148] sm:$0xff] %v339_v41  ;;  %342 = vst [vmem:[%s830_s20 + $0x150] sm:$0xff] %v341_v42  ;;  %v349_v46 = vld [vmem:[%s822_s19 + $0x2b0] sm:$0xff]  ;;  %v351_v47 = vld [vmem:[%s822_s19 + $0x2b8] sm:$0xff] }
  0x28   : > { %344 = vst [vmem:[%s830_s20 + $0x158] sm:$0xff] %v343_v43  ;;  %346 = vst [vmem:[%s830_s20 + $0x160] sm:$0xff] %v345_v44  ;;  %v353_v48 = vld [vmem:[%s822_s19 + $0x300] sm:$0xff]  ;;  %v355_v49 = vld [vmem:[%s822_s19 + $0x308] sm:$0xff] }
  0x29   : > { %348 = vst [vmem:[%s830_s20 + $0x168] sm:$0xff] %v347_v45  ;;  %350 = vst [vmem:[%s830_s20 + $0x170] sm:$0xff] %v349_v46  ;;  %v357_v50 = vld [vmem:[%s822_s19 + $0x310] sm:$0xff]  ;;  %v359_v51 = vld [vmem:[%s822_s19 + $0x318] sm:$0xff] }
  0x2a   : > { %352 = vst [vmem:[%s830_s20 + $0x178] sm:$0xff] %v351_v47  ;;  %354 = vst [vmem:[%s830_s20 + $0x180] sm:$0xff] %v353_v48  ;;  %v361_v52 = vld [vmem:[%s822_s19 + $0x320] sm:$0xff]  ;;  %v363_v53 = vld [vmem:[%s822_s19 + $0x328] sm:$0xff] }
  0x2b   : > { %356 = vst [vmem:[%s830_s20 + $0x188] sm:$0xff] %v355_v49  ;;  %358 = vst [vmem:[%s830_s20 + $0x190] sm:$0xff] %v357_v50  ;;  %v365_v54 = vld [vmem:[%s822_s19 + $0x330] sm:$0xff]  ;;  %v367_v55 = vld [vmem:[%s822_s19 + $0x338] sm:$0xff] }
  0x2c   : > { %360 = vst [vmem:[%s830_s20 + $0x198] sm:$0xff] %v359_v51  ;;  %362 = vst [vmem:[%s830_s20 + $0x1a0] sm:$0xff] %v361_v52  ;;  %v369_v56 = vld [vmem:[%s822_s19 + $0x380] sm:$0xff]  ;;  %v371_v57 = vld [vmem:[%s822_s19 + $0x388] sm:$0xff] }
  0x2d   : > { %364 = vst [vmem:[%s830_s20 + $0x1a8] sm:$0xff] %v363_v53  ;;  %366 = vst [vmem:[%s830_s20 + $0x1b0] sm:$0xff] %v365_v54  ;;  %v373_v58 = vld [vmem:[%s822_s19 + $0x390] sm:$0xff]  ;;  %v375_v59 = vld [vmem:[%s822_s19 + $0x398] sm:$0xff] }
  0x2e   : > { %368 = vst [vmem:[%s830_s20 + $0x1b8] sm:$0xff] %v367_v55  ;;  %370 = vst [vmem:[%s830_s20 + $0x1c0] sm:$0xff] %v369_v56  ;;  %v377_v60 = vld [vmem:[%s822_s19 + $0x3a0] sm:$0xff]  ;;  %v379_v61 = vld [vmem:[%s822_s19 + $0x3a8] sm:$0xff] }
  0x2f   : > { %372 = vst [vmem:[%s830_s20 + $0x1c8] sm:$0xff] %v371_v57  ;;  %374 = vst [vmem:[%s830_s20 + $0x1d0] sm:$0xff] %v373_v58  ;;  %v381_v62 = vld [vmem:[%s822_s19 + $0x3b0] sm:$0xff]  ;;  %v383_v63 = vld [vmem:[%s822_s19 + $0x3b8] sm:$0xff] }
  0x30   : > { %376 = vst [vmem:[%s830_s20 + $0x1d8] sm:$0xff] %v375_v59  ;;  %378 = vst [vmem:[%s830_s20 + $0x1e0] sm:$0xff] %v377_v60  ;;  %v385_v0 = vld [vmem:[%s822_s19 + $0x400] sm:$0xff]  ;;  %v387_v1 = vld [vmem:[%s822_s19 + $0x408] sm:$0xff] }
  0x31   : > { %380 = vst [vmem:[%s830_s20 + $0x1e8] sm:$0xff] %v379_v61  ;;  %382 = vst [vmem:[%s830_s20 + $0x1f0] sm:$0xff] %v381_v62  ;;  %v389_v2 = vld [vmem:[%s822_s19 + $0x410] sm:$0xff]  ;;  %v391_v3 = vld [vmem:[%s822_s19 + $0x418] sm:$0xff] }
  0x32   : > { %384 = vst [vmem:[%s830_s20 + $0x1f8] sm:$0xff] %v383_v63  ;;  %386 = vst [vmem:[%s830_s20 + $0x200] sm:$0xff] %v385_v0  ;;  %v393_v4 = vld [vmem:[%s822_s19 + $0x420] sm:$0xff]  ;;  %v395_v5 = vld [vmem:[%s822_s19 + $0x428] sm:$0xff] }
  0x33   : > { %388 = vst [vmem:[%s830_s20 + $0x208] sm:$0xff] %v387_v1  ;;  %390 = vst [vmem:[%s830_s20 + $0x210] sm:$0xff] %v389_v2  ;;  %v397_v6 = vld [vmem:[%s822_s19 + $0x430] sm:$0xff]  ;;  %v399_v7 = vld [vmem:[%s822_s19 + $0x438] sm:$0xff] }
  0x34   : > { %392 = vst [vmem:[%s830_s20 + $0x218] sm:$0xff] %v391_v3  ;;  %394 = vst [vmem:[%s830_s20 + $0x220] sm:$0xff] %v393_v4 }
  0x35   : > { %396 = vst [vmem:[%s830_s20 + $0x228] sm:$0xff] %v395_v5  ;;  %398 = vst [vmem:[%s830_s20 + $0x230] sm:$0xff] %v397_v6 }
  0x36   : > { %400 = vst [vmem:[%s830_s20 + $0x238] sm:$0xff] %v399_v7 }
  0x37 PF: > { %p658_p5 = scmp.ge.s32.totalorder %s776_s8, 1  ;;  %p405_p6 = scmp.lt.s32.totalorder %s776_s8, 3 }
  0x39   : > { %p406_p7 = pnand %p658_p5, %p405_p6 }
  0x3a   : > { %s412_s21 = sand.u32 (!%p406_p7), 1, %s768_s6   ;;  %s659_s23 = sshll.u32 (!%p406_p7), %s652_s9, 3 }
  0x3b   : > { %409 = sbr.rel (%p406_p7) target bundleno = 99 (0x63), region = 58  ;;  %p433_p8 = scmp.lt.s32.totalorder (!%p406_p7), %s659_s23, 15 }
  0x3c   : > { %s729_s22 = smul.u32 (!%p406_p7), 576, %s412_s21 }
  0x3e   : > { %s975_s24 = scalar_lea.vmem (!%p406_p7), [#allocation2], %s729_s22 }
  0x3f   : > { %v438_v8 = vld [vmem:[%s975_s24] sm:$0xff] (!%p406_p7)  ;;  %v439_v14 = vld [vmem:[%s975_s24 + $0x8] sm:$0xff] (!%p406_p7)  ;;  %v440_v23 = vld [vmem:[%s975_s24 + $0x10] sm:$0xff] (!%p406_p7) }
  0x40   : > { %v661_v9 = vld [vmem:[%s975_s24 + $0x40] sm:$0xff] (!%p406_p7)  ;;  %v662_v15 = vld [vmem:[%s975_s24 + $0x48] sm:$0xff] (!%p406_p7)  ;;  %v663_v24 = vld [vmem:[%s975_s24 + $0x50] sm:$0xff] (!%p406_p7) }
  0x41   : > { %v669_v10 = vld [vmem:[%s975_s24 + $0x80] sm:$0xff] (!%p406_p7)  ;;  %v455_v11 = vmax.f32 (!%p406_p7), %v438_v8, %v661_v9  ;;  %v670_v16 = vld [vmem:[%s975_s24 + $0x88] sm:$0xff] (!%p406_p7)  ;;  %v456_v18 = vmax.f32 (!%p406_p7), %v439_v14, %v662_v15  ;;  %v671_v25 = vld [vmem:[%s975_s24 + $0x90] sm:$0xff] (!%p406_p7)  ;;  %v457_v28 = vmax.f32 (!%p406_p7), %v440_v23, %v663_v24 }
  0x42   : > { %v677_v12 = vld [vmem:[%s975_s24 + $0xc0] sm:$0xff]  ;;  %v678_v21 = vld [vmem:[%s975_s24 + $0xc8] sm:$0xff]  ;;  %s1082_s23 = smov (!%p433_p8, %s659_s23), 15  ;;  %v679_v32 = vld [vmem:[%s975_s24 + $0xd0] sm:$0xff] }
  0x43   : > { %v472_v13 = vmax.f32 %v455_v11, %v669_v10  ;;  %v685_v17 = vld [vmem:[%s975_s24 + $0x100] sm:$0xff]  ;;  %v473_v22 = vmax.f32 %v456_v18, %v670_v16  ;;  %v686_v27 = vld [vmem:[%s975_s24 + $0x108] sm:$0xff]  ;;  %v474_v34 = vmax.f32 %v457_v28, %v671_v25  ;;  %v441_v35 = vld [vmem:[%s975_s24 + $0x18] sm:$0xff]  ;;  %s660_s25 = sshll.u32 %s1082_s23, 3 }
  0x44   : > { %v693_v20 = vld [vmem:[%s975_s24 + $0x140] sm:$0xff]  ;;  %v694_v31 = vld [vmem:[%s975_s24 + $0x148] sm:$0xff]  ;;  %v664_v36 = vld [vmem:[%s975_s24 + $0x58] sm:$0xff]  ;;  %s1016_s28 = scalar_lea.vmem %s1077_s1, %s660_s25 }
  0x45   : > { %v489_v19 = vmax.f32 %v472_v13, %v677_v12  ;;  %v701_v29 = vld [vmem:[%s975_s24 + $0x180] sm:$0xff]  ;;  %v490_v30 = vmax.f32 %v473_v22, %v678_v21  ;;  %v672_v37 = vld [vmem:[%s975_s24 + $0x98] sm:$0xff]  ;;  %v687_v41 = vld [vmem:[%s975_s24 + $0x110] sm:$0xff]  ;;  %v458_v42 = vmax.f32 %v441_v35, %v664_v36  ;;  %v491_v45 = vmax.f32 %v474_v34, %v679_v32 }
  0x46   : > { %v709_v38 = vld [vmem:[%s975_s24 + $0x1c0] sm:$0xff]  ;;  %v702_v44 = vld [vmem:[%s975_s24 + $0x188] sm:$0xff]  ;;  %v695_v46 = vld [vmem:[%s975_s24 + $0x150] sm:$0xff] }
  0x47   : > { %v506_v26 = vmax.f32 %v489_v19, %v685_v17  ;;  %v717_v39 = vld [vmem:[%s975_s24 + $0x200] sm:$0xff]  ;;  %v507_v40 = vmax.f32 %v490_v30, %v686_v27  ;;  %v680_v47 = vld [vmem:[%s975_s24 + $0xd8] sm:$0xff]  ;;  %v475_v49 = vmax.f32 %v458_v42, %v672_v37  ;;  %v710_v54 = vld [vmem:[%s975_s24 + $0x1c8] sm:$0xff]  ;;  %v508_v56 = vmax.f32 %v491_v45, %v687_v41 }
  0x48   : > { %v442_v50 = vld [vmem:[%s975_s24 + $0x20] sm:$0xff]  ;;  %v718_v55 = vld [vmem:[%s975_s24 + $0x208] sm:$0xff]  ;;  %v688_v57 = vld [vmem:[%s975_s24 + $0x118] sm:$0xff] }
  0x49   : > { %v523_v33 = vmax.f32 %v506_v26, %v693_v20  ;;  %v524_v48 = vmax.f32 %v507_v40, %v694_v31  ;;  %v665_v51 = vld [vmem:[%s975_s24 + $0x60] sm:$0xff]  ;;  %v703_v60 = vld [vmem:[%s975_s24 + $0x190] sm:$0xff]  ;;  %v492_v61 = vmax.f32 %v475_v49, %v680_v47  ;;  %v696_v62 = vld [vmem:[%s975_s24 + $0x158] sm:$0xff]  ;;  %v525_v1 = vmax.f32 %v508_v56, %v695_v46 }
  0x4a   : > { %v673_v52 = vld [vmem:[%s975_s24 + $0xa0] sm:$0xff]  ;;  %v459_v58 = vmax.f32 %v442_v50, %v665_v51  ;;  %v443_v3 = vld [vmem:[%s975_s24 + $0x28] sm:$0xff]  ;;  %v711_v7 = vld [vmem:[%s975_s24 + $0x1d0] sm:$0xff] }
  0x4b   : > { %v540_v43 = vmax.f32 %v523_v33, %v701_v29  ;;  %v541_v59 = vmax.f32 %v524_v48, %v702_v44  ;;  %v681_v63 = vld [vmem:[%s975_s24 + $0xe0] sm:$0xff]  ;;  %v666_v4 = vld [vmem:[%s975_s24 + $0x68] sm:$0xff]  ;;  %v719_v8 = vld [vmem:[%s975_s24 + $0x210] sm:$0xff]  ;;  %v509_v9 = vmax.f32 %v492_v61, %v688_v57  ;;  %v542_v12 = vmax.f32 %v525_v1, %v703_v60 }
  0x4c   : > { %v476_v2 = vmax.f32 %v459_v58, %v673_v52  ;;  %v674_v5 = vld [vmem:[%s975_s24 + $0xa8] sm:$0xff]  ;;  %v689_v10 = vld [vmem:[%s975_s24 + $0x120] sm:$0xff]  ;;  %v460_v11 = vmax.f32 %v443_v3, %v666_v4  ;;  %v704_v13 = vld [vmem:[%s975_s24 + $0x198] sm:$0xff] }
  0x4d   : > { %v557_v53 = vmax.f32 %v540_v43, %v709_v38  ;;  %v558_v6 = vmax.f32 %v541_v59, %v710_v54  ;;  %v697_v15 = vld [vmem:[%s975_s24 + $0x160] sm:$0xff]  ;;  %v682_v16 = vld [vmem:[%s975_s24 + $0xe8] sm:$0xff]  ;;  %v526_v18 = vmax.f32 %v509_v9, %v696_v62  ;;  %v444_v20 = vld [vmem:[%s975_s24 + $0x30] sm:$0xff]  ;;  %v559_v23 = vmax.f32 %v542_v12, %v711_v7 }
  0x4e   : > { %v493_v14 = vmax.f32 %v476_v2, %v681_v63  ;;  %v477_v19 = vmax.f32 %v460_v11, %v674_v5  ;;  %v667_v21 = vld [vmem:[%s975_s24 + $0x70] sm:$0xff]  ;;  %v712_v24 = vld [vmem:[%s975_s24 + $0x1d8] sm:$0xff]  ;;  %v690_v27 = vld [vmem:[%s975_s24 + $0x128] sm:$0xff] }
  0x4f   : > { %v574_v0 = vmax.f32 %v557_v53, %v717_v39  ;;  %v575_v17 = vmax.f32 %v558_v6, %v718_v55  ;;  %v675_v22 = vld [vmem:[%s975_s24 + $0xb0] sm:$0xff]  ;;  %v720_v25 = vld [vmem:[%s975_s24 + $0x218] sm:$0xff]  ;;  %v461_v28 = vmax.f32 %v444_v20, %v667_v21  ;;  %v543_v29 = vmax.f32 %v526_v18, %v704_v13  ;;  %v705_v30 = vld [vmem:[%s975_s24 + $0x1a0] sm:$0xff] }
  0x50   : > { %v510_v26 = vmax.f32 %v493_v14, %v689_v10  ;;  %v494_v31 = vmax.f32 %v477_v19, %v682_v16  ;;  %v698_v32 = vld [vmem:[%s975_s24 + $0x168] sm:$0xff]  ;;  %v683_v33 = vld [vmem:[%s975_s24 + $0xf0] sm:$0xff]  ;;  %v576_v34 = vmax.f32 %v559_v23, %v719_v8  ;;  %v445_v37 = vld [vmem:[%s975_s24 + $0x38] sm:$0xff] }
  0x51   : > { %582 = vst [vmem:[%s1016_s28] sm:$0xff] %v574_v0  ;;  %583 = vst [vmem:[%s1016_s28 + $0x8] sm:$0xff] %v575_v17  ;;  %v478_v36 = vmax.f32 %v461_v28, %v675_v22  ;;  %v668_v38 = vld [vmem:[%s975_s24 + $0x78] sm:$0xff]  ;;  %v560_v40 = vmax.f32 %v543_v29, %v712_v24  ;;  %v713_v41 = vld [vmem:[%s975_s24 + $0x1e0] sm:$0xff] }
  0x52   : > { %v527_v35 = vmax.f32 %v510_v26, %v697_v15  ;;  %v676_v39 = vld [vmem:[%s975_s24 + $0xb8] sm:$0xff]  ;;  %v511_v42 = vmax.f32 %v494_v31, %v690_v27  ;;  %v691_v43 = vld [vmem:[%s975_s24 + $0x130] sm:$0xff]  ;;  %v462_v44 = vmax.f32 %v445_v37, %v668_v38  ;;  %584 = vst [vmem:[%s1016_s28 + $0x10] sm:$0xff] %v576_v34  ;;  %v706_v46 = vld [vmem:[%s975_s24 + $0x1a8] sm:$0xff] }
  0x53   : > { %v495_v47 = vmax.f32 %v478_v36, %v683_v33  ;;  %v684_v48 = vld [vmem:[%s975_s24 + $0xf8] sm:$0xff]  ;;  %v577_v49 = vmax.f32 %v560_v40, %v720_v25  ;;  %v721_v50 = vld [vmem:[%s975_s24 + $0x220] sm:$0xff]  ;;  %v699_v52 = vld [vmem:[%s975_s24 + $0x170] sm:$0xff] }
  0x54   : > { %v544_v45 = vmax.f32 %v527_v35, %v705_v30  ;;  %v528_v51 = vmax.f32 %v511_v42, %v698_v32  ;;  %v479_v53 = vmax.f32 %v462_v44, %v676_v39  ;;  %v714_v55 = vld [vmem:[%s975_s24 + $0x1e8] sm:$0xff]  ;;  %v692_v57 = vld [vmem:[%s975_s24 + $0x138] sm:$0xff]  ;;  %v707_v59 = vld [vmem:[%s975_s24 + $0x1b0] sm:$0xff] }
  0x55   : > { %v512_v56 = vmax.f32 %v495_v47, %v691_v43  ;;  %585 = vst [vmem:[%s1016_s28 + $0x18] sm:$0xff] %v577_v49  ;;  %v722_v62 = vld [vmem:[%s975_s24 + $0x228] sm:$0xff]  ;;  %v700_v0 = vld [vmem:[%s975_s24 + $0x178] sm:$0xff]  ;;  %v715_v2 = vld [vmem:[%s975_s24 + $0x1f0] sm:$0xff] }
  0x56   : > { %v561_v54 = vmax.f32 %v544_v45, %v713_v41  ;;  %v545_v58 = vmax.f32 %v528_v51, %v706_v46  ;;  %v496_v60 = vmax.f32 %v479_v53, %v684_v48  ;;  %v708_v5 = vld [vmem:[%s975_s24 + $0x1b8] sm:$0xff]  ;;  %v723_v7 = vld [vmem:[%s975_s24 + $0x230] sm:$0xff] }
  0x57   : > { %v529_v63 = vmax.f32 %v512_v56, %v699_v52  ;;  %v716_v10 = vld [vmem:[%s975_s24 + $0x1f8] sm:$0xff] }
  0x58   : > { %v578_v61 = vmax.f32 %v561_v54, %v721_v50  ;;  %v562_v1 = vmax.f32 %v545_v58, %v714_v55  ;;  %v513_v3 = vmax.f32 %v496_v60, %v692_v57  ;;  %v724_v13 = vld [vmem:[%s975_s24 + $0x238] sm:$0xff] }
  0x59   : > { %v546_v4 = vmax.f32 %v529_v63, %v707_v59 }
  0x5a   : > { %586 = vst [vmem:[%s1016_s28 + $0x20] sm:$0xff] %v578_v61  ;;  %v579_v6 = vmax.f32 %v562_v1, %v722_v62  ;;  %v530_v8 = vmax.f32 %v513_v3, %v700_v0 }
  0x5b   : > { %v563_v9 = vmax.f32 %v546_v4, %v715_v2 }
  0x5c   : > { %587 = vst [vmem:[%s1016_s28 + $0x28] sm:$0xff] %v579_v6  ;;  %v547_v11 = vmax.f32 %v530_v8, %v708_v5 }
  0x5d   : > { %v580_v12 = vmax.f32 %v563_v9, %v723_v7 }
  0x5e   : > { %v564_v14 = vmax.f32 %v547_v11, %v716_v10 }
  0x5f   : > { %588 = vst [vmem:[%s1016_s28 + $0x30] sm:$0xff] %v580_v12 }
  0x60   : > { %v581_v15 = vmax.f32 %v564_v14, %v724_v13 }
  0x62   : > { %589 = vst [vmem:[%s1016_s28 + $0x38] sm:$0xff] %v581_v15 }
  0x63 PF: > { %p8_p9 = scmp.ge.s32.totalorder %s805_s10, 4   ;;  %s1078_s6 = smov %s772_s7 }
  0x64   : > { %s1079_s7 = smov %s814_s13  ;;  %s1080_s8 = smov %s805_s10 }
  0x65   :  { %10 = sbr.rel (!%p8_p9) target bundleno = 2 (0x2), region = 105 }

// kernel: cnnh_forward.9
= control target key start
LH: loop header
LB: loop body
LE: loop exit
PB: predicated region body
PF: predicated region fallthrough
CT: control target
= control target key end

     0   :  { %v4026_v0 = vmov 0   ;;  %v4027_v40 = vmov 0.0   ;;  %vm4028_vm0 = vmmov 0   ;;  %s5164_s1 = inlined_call_operand.vmem [shape: bf16[896,128], index: 1, kind: input, shape index: {}]   ;;  %s5165_s0 = inlined_call_operand.vmem [shape: bf16[456,896], index: 0, kind: input, shape index: {}]   ;;  %s5166_s2 = inlined_call_operand.vmem [shape: f32[1,128], index: 2, kind: input, shape index: {}]   ;;  %s5167_s3 = inlined_call_operand.vmem [shape: f32[456,128], index: 3, kind: output, shape index: {}]  }
   0x1   :  { %1731 = vmatprep.subr.bf16.mxu1 %v4026_v0  ;;  %2259 = vmatprep.subr.bf16.mxu0 %v4026_v0  ;;  %v3683_v1 = vld [vmem:[%s5164_s1] sm:$0xff]   ;;  %v3685_v3 = vld [vmem:[%s5164_s1 + $0x8] sm:$0xff]   ;;  %v3687_v5 = vld [vmem:[%s5164_s1 + $0x10] sm:$0xff]  }
   0x2   :  { %v3684_v2 = vld [vmem:[%s5164_s1 + $0x100] sm:$0xff]   ;;  %1732 = vmatpush1.bf16.msra.mxu1 %v3683_v1  ;;  %v3686_v4 = vld [vmem:[%s5164_s1 + $0x108] sm:$0xff]   ;;  %v3688_v6 = vld [vmem:[%s5164_s1 + $0x110] sm:$0xff]  }
   0x3   :  { %2260 = vmatpush1.bf16.msra.mxu0 %v3684_v2  ;;  %1733 = vmatprep.subr.bf16.mxu1 %v4026_v0  ;;  %v3689_v7 = vld [vmem:[%s5164_s1 + $0x18] sm:$0xff]   ;;  %v3691_v9 = vld [vmem:[%s5164_s1 + $0x20] sm:$0xff]   ;;  %v3693_v11 = vld [vmem:[%s5164_s1 + $0x28] sm:$0xff]  }
   0x4   :  { %2261 = vmatprep.subr.bf16.mxu0 %v4026_v0  ;;  %v3690_v8 = vld [vmem:[%s5164_s1 + $0x118] sm:$0xff]   ;;  %v3692_v10 = vld [vmem:[%s5164_s1 + $0x120] sm:$0xff]   ;;  %v3694_v12 = vld [vmem:[%s5164_s1 + $0x128] sm:$0xff]  }
   0x5   :  { %v3695_v13 = vld [vmem:[%s5164_s1 + $0x30] sm:$0xff]   ;;  %v3697_v15 = vld [vmem:[%s5164_s1 + $0x38] sm:$0xff]   ;;  %v3699_v17 = vld [vmem:[%s5164_s1 + $0x40] sm:$0xff]  }
   0x6   :  { %1734 = vmatpush1.bf16.msra.mxu1 %v3685_v3  ;;  %v3696_v14 = vld [vmem:[%s5164_s1 + $0x130] sm:$0xff]   ;;  %v3698_v16 = vld [vmem:[%s5164_s1 + $0x138] sm:$0xff]   ;;  %v3700_v18 = vld [vmem:[%s5164_s1 + $0x140] sm:$0xff]  }
   0x7   :  { %2262 = vmatpush1.bf16.msra.mxu0 %v3686_v4  ;;  %1735 = vmatprep.subr.bf16.mxu1 %v4026_v0  ;;  %v3717_v19 = vld [vmem:[%s5165_s0 + $0x4] ss:$28 sps:$4 sm:$0xff]   ;;  %v3701_v20 = vld [vmem:[%s5164_s1 + $0x48] sm:$0xff]   ;;  %v3720_v21 = vld [vmem:[%s5165_s0 + $0x14] ss:$28 sps:$4 sm:$0xff]  }
   0x8   :  { %2263 = vmatprep.subr.bf16.mxu0 %v4026_v0  ;;  %v3702_v22 = vld [vmem:[%s5164_s1 + $0x148] sm:$0xff]   ;;  %1763 = vmatprep.mubr.bf16.mxu1 %v3717_v19  ;;  %v3703_v23 = vld [vmem:[%s5164_s1 + $0x50] sm:$0xff]   ;;  %v3705_v25 = vld [vmem:[%s5164_s1 + $0x58] sm:$0xff]  }
   0x9   :  { %2291 = vmatprep.mubr.bf16.mxu0 %v3720_v21  ;;  %v3704_v24 = vld [vmem:[%s5164_s1 + $0x150] sm:$0xff]   ;;  %v3706_v26 = vld [vmem:[%s5164_s1 + $0x158] sm:$0xff]   ;;  %v3707_v27 = vld [vmem:[%s5164_s1 + $0x60] sm:$0xff]  }
   0xa   :  { %1736 = vmatpush1.bf16.msra.mxu1 %v3687_v5  ;;  %v3708_v28 = vld [vmem:[%s5164_s1 + $0x160] sm:$0xff]   ;;  %v3709_v29 = vld [vmem:[%s5164_s1 + $0x68] sm:$0xff]   ;;  %v3711_v31 = vld [vmem:[%s5164_s1 + $0x70] sm:$0xff]  }
   0xb   :  { %2264 = vmatpush1.bf16.msra.mxu0 %v3688_v6  ;;  %1737 = vmatprep.subr.bf16.mxu1 %v4026_v0  ;;  %v3710_v30 = vld [vmem:[%s5164_s1 + $0x168] sm:$0xff]   ;;  %v3712_v32 = vld [vmem:[%s5164_s1 + $0x170] sm:$0xff]   ;;  %v3713_v33 = vld [vmem:[%s5164_s1 + $0x78] sm:$0xff]  }
   0xc   :  { %2265 = vmatprep.subr.bf16.mxu0 %v4026_v0  ;;  %v3714_v34 = vld [vmem:[%s5164_s1 + $0x178] sm:$0xff]   ;;  %v3718_v36 = vld [vmem:[%s5165_s0 + $0x10] ss:$28 sps:$4 sm:$0xff]   ;;  %v3721_v37 = vld [vmem:[%s5164_s1 + $0x80] sm:$0xff]  }
   0xd   :  { %v3715_v35 = vld [vmem:[%s5165_s0] ss:$28 sps:$4 sm:$0xff]   ;;  %v3725_v41 = vld [vmem:[%s5165_s0 + $0x4c] ss:$28 sps:$4 sm:$0xff]   ;;  %v3727_v44 = vld [vmem:[%s5165_s0 + $0x38] ss:$28 sps:$4 sm:$0xff]  }
   0xe   :  { %1738 = vmatpush1.bf16.msra.mxu1 %v3689_v7  ;;  %v3722_v38 = vld [vmem:[%s5164_s1 + $0x180] sm:$0xff]   ;;  %v3723_v39 = vld [vmem:[%s5165_s0 + $0x3c] ss:$28 sps:$4 sm:$0xff]   ;;  %v3734_v42 = vld [vmem:[%s5164_s1 + $0x88] sm:$0xff]  }
   0xf   :  { %2266 = vmatpush1.bf16.msra.mxu0 %v3690_v8  ;;  %1739 = vmatprep.subr.bf16.mxu1 %v4026_v0  ;;  %v3749_v43 = vld [vmem:[%s5164_s1 + $0x188] sm:$0xff]   ;;  %v3729_v46 = vld [vmem:[%s5165_s0 + $0x74] ss:$28 sps:$4 sm:$0xff]   ;;  %v3731_v47 = vld [vmem:[%s5165_s0 + $0x84] ss:$28 sps:$4 sm:$0xff]  }
  0x10   :  { %2267 = vmatprep.subr.bf16.mxu0 %v4026_v0  ;;  %v3728_v45 = vld [vmem:[%s5165_s0 + $0x48] ss:$28 sps:$4 sm:$0xff]   ;;  %v3742_v48 = vld [vmem:[%s5164_s1 + $0x90] sm:$0xff]   ;;  %v3756_v51 = vld [vmem:[%s5164_s1 + $0x98] sm:$0xff]  }
  0x11   :  { %v3770_v49 = vld [vmem:[%s5164_s1 + $0x190] sm:$0xff]   ;;  %v3797_v52 = vld [vmem:[%s5164_s1 + $0x198] sm:$0xff]   ;;  %v3736_v54 = vld [vmem:[%s5165_s0 + $0xac] ss:$28 sps:$4 sm:$0xff]  }
  0x12   :  { %1740 = vmatpush1.bf16.msra.mxu1 %v3691_v9  ;;  %v3733_v50 = vld [vmem:[%s5165_s0 + $0x70] ss:$28 sps:$4 sm:$0xff]   ;;  %v3735_v53 = vld [vmem:[%s5165_s0 + $0x80] ss:$28 sps:$4 sm:$0xff]   ;;  %v3740_v57 = vld [vmem:[%s5165_s0 + $0xa8] ss:$28 sps:$4 sm:$0xff]  }
  0x13   :  { %2268 = vmatpush1.bf16.msra.mxu0 %v3692_v10  ;;  %1741 = vmatprep.subr.bf16.mxu1 %v4026_v0  ;;  %v3738_v55 = vld [vmem:[%s5165_s0 + $0xbc] ss:$28 sps:$4 sm:$0xff]   ;;  %v3769_v56 = vld [vmem:[%s5164_s1 + $0xa0] sm:$0xff]   ;;  %v3783_v58 = vld [vmem:[%s5164_s1 + $0xa8] sm:$0xff]  }
  0x14   :  { %2269 = vmatprep.subr.bf16.mxu0 %v4026_v0  ;;  %v3741_v59 = vld [vmem:[%s5165_s0 + $0xb8] ss:$28 sps:$4 sm:$0xff]   ;;  %v3743_v60 = vld [vmem:[%s5165_s0 + $0xe4] ss:$28 sps:$4 sm:$0xff]   ;;  %v3748_v3 = vld [vmem:[%s5165_s0 + $0xf0] ss:$28 sps:$4 sm:$0xff]  }
  0x15   :  { %v3745_v61 = vld [vmem:[%s5165_s0 + $0xf4] ss:$28 sps:$4 sm:$0xff]   ;;  %v3822_v63 = vld [vmem:[%s5164_s1 + $0x1a0] sm:$0xff]   ;;  %v3806_v1 = vld [vmem:[%s5164_s1 + $0xb8] sm:$0xff]  }
  0x16   :  { %1742 = vmatpush1.bf16.msra.mxu1 %v3693_v11  ;;  %v3795_v62 = vld [vmem:[%s5164_s1 + $0xb0] sm:$0xff]   ;;  %v3747_v2 = vld [vmem:[%s5165_s0 + $0xe0] ss:$28 sps:$4 sm:$0xff]   ;;  %v3752_v5 = vld [vmem:[%s5165_s0 + $0x12c] ss:$28 sps:$4 sm:$0xff]  }
  0x17   :  { %2270 = vmatpush1.bf16.msra.mxu0 %v3694_v12  ;;  %1743 = vmatprep.subr.bf16.mxu1 %v4026_v0  ;;  %v3750_v4 = vld [vmem:[%s5165_s0 + $0x11c] ss:$28 sps:$4 sm:$0xff]   ;;  %v3817_v6 = vld [vmem:[%s5164_s1 + $0xc0] sm:$0xff]   ;;  %v3831_v7 = vld [vmem:[%s5164_s1 + $0xc8] sm:$0xff]  }
  0x18   :  { %2271 = vmatprep.subr.bf16.mxu0 %v4026_v0  ;;  %v3845_v8 = vld [vmem:[%s5164_s1 + $0x1a8] sm:$0xff]   ;;  %v3754_v9 = vld [vmem:[%s5165_s0 + $0x118] ss:$28 sps:$4 sm:$0xff]   ;;  %v3759_v12 = vld [vmem:[%s5165_s0 + $0x164] ss:$28 sps:$4 sm:$0xff]  }
  0x19   :  { %v3755_v10 = vld [vmem:[%s5165_s0 + $0x128] ss:$28 sps:$4 sm:$0xff]   ;;  %v3757_v11 = vld [vmem:[%s5165_s0 + $0x154] ss:$28 sps:$4 sm:$0xff]  }
  0x1a   :  { %1744 = vmatpush1.bf16.msra.mxu1 %v3695_v13  ;;  %v3844_v13 = vld [vmem:[%s5164_s1 + $0xd0] sm:$0xff]   ;;  %v3867_v19 = vld [vmem:[%s5164_s1 + $0xe0] sm:$0xff]  }
  0x1b   :  { %2272 = vmatpush1.bf16.msra.mxu0 %v3696_v14  ;;  %1745 = vmatprep.subr.bf16.mxu1 %v4026_v0  ;;  %v3858_v14 = vld [vmem:[%s5164_s1 + $0xd8] sm:$0xff]   ;;  %v3767_v21 = vld [vmem:[%s5165_s0 + $0x188] ss:$28 sps:$4 sm:$0xff]  }
  0x1c   :  { %2273 = vmatprep.subr.bf16.mxu0 %v4026_v0 }
  0x1e   :  { %1746 = vmatpush1.bf16.msra.mxu1 %v3697_v15  ;;  %v3761_v15 = vld [vmem:[%s5165_s0 + $0x150] ss:$28 sps:$4 sm:$0xff]  }
  0x1f   :  { %2274 = vmatpush1.bf16.msra.mxu0 %v3698_v16  ;;  %1747 = vmatprep.subr.bf16.mxu1 %v4026_v0  ;;  %v3762_v16 = vld [vmem:[%s5165_s0 + $0x160] ss:$28 sps:$4 sm:$0xff]  }
  0x20   :  { %2275 = vmatprep.subr.bf16.mxu0 %v4026_v0 }
  0x22   :  { %1748 = vmatpush1.bf16.msra.mxu1 %v3699_v17  ;;  %v3763_v17 = vld [vmem:[%s5165_s0 + $0x18c] ss:$28 sps:$4 sm:$0xff]  }
  0x23   :  { %2276 = vmatpush1.bf16.msra.mxu0 %v3700_v18  ;;  %1749 = vmatprep.subr.bf16.mxu1 %v4026_v0  ;;  %v3765_v18 = vld [vmem:[%s5165_s0 + $0x19c] ss:$28 sps:$4 sm:$0xff]  }
  0x24   :  { %2277 = vmatprep.subr.bf16.mxu0 %v4026_v0 }
  0x26   :  { %1750 = vmatpush1.bf16.msra.mxu1 %v3701_v20  ;;  %v3872_v20 = vld [vmem:[%s5164_s1 + $0x1b0] sm:$0xff]  }
  0x27   :  { %2278 = vmatpush1.bf16.msra.mxu0 %v3702_v22  ;;  %1751 = vmatprep.subr.bf16.mxu1 %v4026_v0  ;;  %v3768_v22 = vld [vmem:[%s5165_s0 + $0x198] ss:$28 sps:$4 sm:$0xff]  }
  0x28   :  { %2279 = vmatprep.subr.bf16.mxu0 %v4026_v0 }
  0x2a   :  { %1752 = vmatpush1.bf16.msra.mxu1 %v3703_v23  ;;  %v3771_v23 = vld [vmem:[%s5165_s0 + $0x1c4] ss:$28 sps:$4 sm:$0xff]  }
  0x2b   :  { %2280 = vmatpush1.bf16.msra.mxu0 %v3704_v24  ;;  %1753 = vmatprep.subr.bf16.mxu1 %v4026_v0  ;;  %v3773_v24 = vld [vmem:[%s5165_s0 + $0x1d4] ss:$28 sps:$4 sm:$0xff]  }
  0x2c   :  { %2281 = vmatprep.subr.bf16.mxu0 %v4026_v0 }
  0x2e   :  { %1754 = vmatpush1.bf16.msra.mxu1 %v3705_v25  ;;  %v3879_v25 = vld [vmem:[%s5164_s1 + $0xe8] sm:$0xff]  }
  0x2f   :  { %2282 = vmatpush1.bf16.msra.mxu0 %v3706_v26  ;;  %1755 = vmatprep.subr.bf16.mxu1 %v4026_v0  ;;  %v3775_v26 = vld [vmem:[%s5165_s0 + $0x1c0] ss:$28 sps:$4 sm:$0xff]  }
  0x30   :  { %2283 = vmatprep.subr.bf16.mxu0 %v4026_v0 }
  0x32   :  { %1756 = vmatpush1.bf16.msra.mxu1 %v3707_v27  ;;  %v3776_v27 = vld [vmem:[%s5165_s0 + $0x1d0] ss:$28 sps:$4 sm:$0xff]  }
  0x33   :  { %2284 = vmatpush1.bf16.msra.mxu0 %v3708_v28  ;;  %1757 = vmatprep.subr.bf16.mxu1 %v4026_v0  ;;  %v3777_v28 = vld [vmem:[%s5165_s0 + $0x1fc] ss:$28 sps:$4 sm:$0xff]  }
  0x34   :  { %2285 = vmatprep.subr.bf16.mxu0 %v4026_v0 }
  0x36   :  { %1758 = vmatpush1.bf16.msra.mxu1 %v3709_v29  ;;  %v3779_v29 = vld [vmem:[%s5165_s0 + $0x20c] ss:$28 sps:$4 sm:$0xff]  }
  0x37   :  { %2286 = vmatpush1.bf16.msra.mxu0 %v3710_v30  ;;  %1759 = vmatprep.subr.bf16.mxu1 %v4026_v0  ;;  %v3781_v30 = vld [vmem:[%s5165_s0 + $0x1f8] ss:$28 sps:$4 sm:$0xff]  }
  0x38   :  { %2287 = vmatprep.subr.bf16.mxu0 %v4026_v0 }
  0x3a   :  { %1760 = vmatpush1.bf16.msra.mxu1 %v3711_v31  ;;  %v3782_v31 = vld [vmem:[%s5165_s0 + $0x208] ss:$28 sps:$4 sm:$0xff]  }
  0x3b   :  { %2288 = vmatpush1.bf16.msra.mxu0 %v3712_v32  ;;  %1761 = vmatprep.subr.bf16.mxu1 %v4026_v0  ;;  %v3784_v32 = vld [vmem:[%s5165_s0 + $0x234] ss:$28 sps:$4 sm:$0xff]  }
  0x3c   :  { %2289 = vmatprep.subr.bf16.mxu0 %v4026_v0 }
  0x3e   :  { %1762 = vmatpush1.bf16.msra.mxu1 %v3713_v33  ;;  %v3786_v33 = vld [vmem:[%s5165_s0 + $0x244] ss:$28 sps:$4 sm:$0xff]  }
  0x3f   :  { %2290 = vmatpush1.bf16.msra.mxu0 %v3714_v34  ;;  %1995 = vmatprep.subr.bf16.mxu1 %v4026_v0  ;;  %v3892_v34 = vld [vmem:[%s5164_s1 + $0xf0] sm:$0xff]  }
  0x40   :  { %3202 = vmatprep.subr.bf16.mxu0 %v4027_v40 }
  0x41   :  { %1764 = vmatmul.mubr.bf16.vlgmr.msra.gmra.mrb[0].mxu1 %v3715_v35  ;;  %v3893_v35 = vld [vmem:[%s5164_s1 + $0x1b8] sm:$0xff]  }
  0x42   :  { %2292 = vmatmul.mubr.bf16.vlgmr.msra.gmra.mrb[0].mxu0 %v3718_v36  ;;  %1996 = vmatpush1.bf16.msra.mxu1 %v3721_v37  ;;  %v3788_v36 = vld [vmem:[%s5165_s0 + $0x230] ss:$28 sps:$4 sm:$0xff]   ;;  %v3789_v37 = vld [vmem:[%s5165_s0 + $0x240] ss:$28 sps:$4 sm:$0xff]  }
  0x43   :  { %3203 = vmatpush3.bf16.msra.mxu0 %v3722_v38  ;;  %1771 = vmatprep.mubr.bf16.mxu1 %v3723_v39  ;;  %v3790_v38 = vld [vmem:[%s5165_s0 + $0x26c] ss:$28 sps:$4 sm:$0xff]   ;;  %v3792_v39 = vld [vmem:[%s5165_s0 + $0x27c] ss:$28 sps:$4 sm:$0xff]  }
  0x44   :  { %2299 = vmatprep.mubr.bf16.mxu0 %v3725_v41  ;;  %1997 = vmatprep.subr.bf16.mxu1 %v4026_v0  ;;  %v3794_v41 = vld [vmem:[%s5165_s0 + $0x268] ss:$28 sps:$4 sm:$0xff]  }
  0x45   :  { %3204 = vmatprep.subr.bf16.mxu0 %v4027_v40 }
  0x46   :  { %1998 = vmatpush1.bf16.msra.mxu1 %v3734_v42  ;;  %v3796_v42 = vld [vmem:[%s5165_s0 + $0x278] ss:$28 sps:$4 sm:$0xff]  }
  0x47   :  { %1999 = vmatprep.subr.bf16.mxu1 %v4026_v0  ;;  %3205 = vmatpush3.bf16.msra.mxu0 %v3749_v43  ;;  %v3798_v43 = vld [vmem:[%s5165_s0 + $0x2a4] ss:$28 sps:$4 sm:$0xff]  }
  0x48   :  { %3206 = vmatprep.subr.bf16.mxu0 %v4027_v40 }
  0x49   :  { %1772 = vmatmul.mubr.bf16.gmra.mrb[4].mxu1 %v3727_v44  ;;  %v3906_v44 = vld [vmem:[%s5164_s1 + $0xf8] sm:$0xff]  }
  0x4a   :  { %2300 = vmatmul.mubr.bf16.gmra.mrb[4].mxu0 %v3728_v45  ;;  %1779 = vmatprep.mubr.bf16.mxu1 %v3729_v46  ;;  %v3802_v45 = vld [vmem:[%s5165_s0 + $0x2a0] ss:$28 sps:$4 sm:$0xff]   ;;  %v3803_v46 = vld [vmem:[%s5165_s0 + $0x2b0] ss:$28 sps:$4 sm:$0xff]  }
  0x4b   :  { %2307 = vmatprep.mubr.bf16.mxu0 %v3731_v47  ;;  %2000 = vmatpush1.bf16.msra.mxu1 %v3742_v48  ;;  %v3804_v47 = vld [vmem:[%s5165_s0 + $0x2dc] ss:$28 sps:$4 sm:$0xff]   ;;  %v3807_v48 = vld [vmem:[%s5165_s0 + $0x2ec] ss:$28 sps:$4 sm:$0xff]  }
  0x4c   :  { %2001 = vmatprep.subr.bf16.mxu1 %v4026_v0  ;;  %3207 = vmatpush3.bf16.msra.mxu0 %v3770_v49  ;;  %v3809_v49 = vld [vmem:[%s5165_s0 + $0x2d8] ss:$28 sps:$4 sm:$0xff]  }
  0x4d   :  { %3208 = vmatprep.subr.bf16.mxu0 %v4027_v40 }
  0x4f   :  { %2002 = vmatpush1.bf16.msra.mxu1 %v3756_v51  ;;  %v3811_v51 = vld [vmem:[%s5165_s0 + $0x314] ss:$28 sps:$4 sm:$0xff]  }
  0x50   :  { %2003 = vmatprep.subr.bf16.mxu1 %v4026_v0  ;;  %3209 = vmatpush3.bf16.msra.mxu0 %v3797_v52  ;;  %v3813_v52 = vld [vmem:[%s5165_s0 + $0x324] ss:$28 sps:$4 sm:$0xff]  }
  0x51   :  { %1780 = vmatmul.mubr.bf16.gmra.mrb[8].mxu1 %v3733_v50  ;;  %3210 = vmatprep.subr.bf16.mxu0 %v4027_v40  ;;  %v3810_v50 = vld [vmem:[%s5165_s0 + $0x2e8] ss:$28 sps:$4 sm:$0xff]  }
  0x52   :  { %2308 = vmatmul.mubr.bf16.gmra.mrb[8].mxu0 %v3735_v53  ;;  %1787 = vmatprep.mubr.bf16.mxu1 %v3736_v54  ;;  %v3815_v53 = vld [vmem:[%s5165_s0 + $0x310] ss:$28 sps:$4 sm:$0xff]   ;;  %v3816_v54 = vld [vmem:[%s5165_s0 + $0x320] ss:$28 sps:$4 sm:$0xff]  }
  0x53   :  { %2315 = vmatprep.mubr.bf16.mxu0 %v3738_v55  ;;  %2004 = vmatpush1.bf16.msra.mxu1 %v3769_v56  ;;  %v3818_v55 = vld [vmem:[%s5165_s0 + $0x34c] ss:$28 sps:$4 sm:$0xff]   ;;  %v3820_v56 = vld [vmem:[%s5165_s0 + $0x35c] ss:$28 sps:$4 sm:$0xff]  }
  0x54   :  { %2005 = vmatprep.subr.bf16.mxu1 %v4026_v0  ;;  %3211 = vmatpush3.bf16.msra.mxu0 %v3822_v63  ;;  %v3832_v63 = vld [vmem:[%s5165_s0 + $0x3bc] ss:$28 sps:$4 sm:$0xff]  }
  0x55   :  { %3212 = vmatprep.subr.bf16.mxu0 %v4027_v40 }
  0x57   :  { %2006 = vmatpush1.bf16.msra.mxu1 %v3783_v58  ;;  %v3824_v58 = vld [vmem:[%s5165_s0 + $0x358] ss:$28 sps:$4 sm:$0xff]  }
  0x58   :  { %2007 = vmatprep.subr.bf16.mxu1 %v4026_v0  ;;  %3213 = vmatpush3.bf16.msra.mxu0 %v3845_v8  ;;  %v3846_v8 = vld [vmem:[%s5165_s0 + $0x42c] ss:$28 sps:$4 sm:$0xff]  }
  0x59   :  { %1788 = vmatmul.mubr.bf16.gmra.mrb[12].mxu1 %v3740_v57  ;;  %3214 = vmatprep.subr.bf16.mxu0 %v4027_v40  ;;  %v3823_v57 = vld [vmem:[%s5165_s0 + $0x348] ss:$28 sps:$4 sm:$0xff]  }
  0x5a   :  { %2316 = vmatmul.mubr.bf16.gmra.mrb[12].mxu0 %v3741_v59  ;;  %1795 = vmatprep.mubr.bf16.mxu1 %v3743_v60  ;;  %v3825_v59 = vld [vmem:[%s5165_s0 + $0x384] ss:$28 sps:$4 sm:$0xff]   ;;  %v3827_v60 = vld [vmem:[%s5165_s0 + $0x394] ss:$28 sps:$4 sm:$0xff]  }
  0x5b   :  { %2323 = vmatprep.mubr.bf16.mxu0 %v3745_v61  ;;  %2008 = vmatpush1.bf16.msra.mxu1 %v3795_v62  ;;  %v3829_v61 = vld [vmem:[%s5165_s0 + $0x380] ss:$28 sps:$4 sm:$0xff]   ;;  %v3830_v62 = vld [vmem:[%s5165_s0 + $0x390] ss:$28 sps:$4 sm:$0xff]  }
  0x5c   :  { %2009 = vmatprep.subr.bf16.mxu1 %v4026_v0  ;;  %3215 = vmatpush3.bf16.msra.mxu0 %v3872_v20  ;;  %v3865_v20 = vld [vmem:[%s5165_s0 + $0x4d4] ss:$28 sps:$4 sm:$0xff]  }
  0x5d   :  { %3216 = vmatprep.subr.bf16.mxu0 %v4027_v40 }
  0x5f   :  { %2010 = vmatpush1.bf16.msra.mxu1 %v3806_v1  ;;  %v3834_v1 = vld [vmem:[%s5165_s0 + $0x3cc] ss:$28 sps:$4 sm:$0xff]  }
  0x60   :  { %2011 = vmatprep.subr.bf16.mxu1 %v4026_v0  ;;  %3217 = vmatpush3.bf16.msra.mxu0 %v3893_v35  ;;  %v3891_v35 = vld [vmem:[%s5165_s0 + $0x588] ss:$28 sps:$4 sm:$0xff]  }
  0x61   :  { %1796 = vmatmul.mubr.bf16.gmra.mrb[16].mxu1 %v3747_v2  ;;  %v3836_v2 = vld [vmem:[%s5165_s0 + $0x3b8] ss:$28 sps:$4 sm:$0xff]  }
  0x62   :  { %2324 = vmatmul.mubr.bf16.gmra.mrb[16].mxu0 %v3748_v3  ;;  %1803 = vmatprep.mubr.bf16.mxu1 %v3750_v4  ;;  %v3837_v3 = vld [vmem:[%s5165_s0 + $0x3c8] ss:$28 sps:$4 sm:$0xff]   ;;  %v3838_v4 = vld [vmem:[%s5165_s0 + $0x3f4] ss:$28 sps:$4 sm:$0xff]  }
  0x63   :  { %2331 = vmatprep.mubr.bf16.mxu0 %v3752_v5  ;;  %2012 = vmatpush1.bf16.msra.mxu1 %v3817_v6  ;;  %v3840_v5 = vld [vmem:[%s5165_s0 + $0x404] ss:$28 sps:$4 sm:$0xff]   ;;  %v3842_v6 = vld [vmem:[%s5165_s0 + $0x3f0] ss:$28 sps:$4 sm:$0xff]  }
  0x64   :  { %2013 = vmatprep.subr.bf16.mxu1 %v4026_v0 }
  0x67   :  { %2014 = vmatpush1.bf16.msra.mxu1 %v3831_v7  ;;  %v3843_v7 = vld [vmem:[%s5165_s0 + $0x400] ss:$28 sps:$4 sm:$0xff]  }
  0x68   :  { %2015 = vmatprep.subr.bf16.mxu1 %v4026_v0 }
  0x69   :  { %1804 = vmatmul.mubr.bf16.gmra.mrb[20].mxu1 %v3754_v9  ;;  %v3848_v9 = vld [vmem:[%s5165_s0 + $0x43c] ss:$28 sps:$4 sm:$0xff]  }
  0x6a   :  { %2332 = vmatmul.mubr.bf16.gmra.mrb[20].mxu0 %v3755_v10  ;;  %1811 = vmatprep.mubr.bf16.mxu1 %v3757_v11  ;;  %v3850_v10 = vld [vmem:[%s5165_s0 + $0x428] ss:$28 sps:$4 sm:$0xff]   ;;  %v3851_v11 = vld [vmem:[%s5165_s0 + $0x438] ss:$28 sps:$4 sm:$0xff]  }
  0x6b   :  { %2339 = vmatprep.mubr.bf16.mxu0 %v3759_v12  ;;  %2016 = vmatpush1.bf16.msra.mxu1 %v3844_v13  ;;  %v3852_v12 = vld [vmem:[%s5165_s0 + $0x464] ss:$28 sps:$4 sm:$0xff]   ;;  %v3854_v13 = vld [vmem:[%s5165_s0 + $0x474] ss:$28 sps:$4 sm:$0xff]  }
  0x6c   :  { %2017 = vmatprep.subr.bf16.mxu1 %v4026_v0 }
  0x6f   :  { %2018 = vmatpush1.bf16.msra.mxu1 %v3858_v14  ;;  %v3856_v14 = vld [vmem:[%s5165_s0 + $0x460] ss:$28 sps:$4 sm:$0xff]  }
  0x70   :  { %2019 = vmatprep.subr.bf16.mxu1 %v4026_v0 }
  0x71   :  { %1812 = vmatmul.mubr.bf16.gmra.mrb[24].mxu1 %v3761_v15  ;;  %v3857_v15 = vld [vmem:[%s5165_s0 + $0x470] ss:$28 sps:$4 sm:$0xff]  }
  0x72   :  { %2340 = vmatmul.mubr.bf16.gmra.mrb[24].mxu0 %v3762_v16  ;;  %1819 = vmatprep.mubr.bf16.mxu1 %v3763_v17  ;;  %v3859_v16 = vld [vmem:[%s5165_s0 + $0x49c] ss:$28 sps:$4 sm:$0xff]   ;;  %v3861_v17 = vld [vmem:[%s5165_s0 + $0x4ac] ss:$28 sps:$4 sm:$0xff]  }
  0x73   :  { %2347 = vmatprep.mubr.bf16.mxu0 %v3765_v18  ;;  %2020 = vmatpush1.bf16.msra.mxu1 %v3867_v19  ;;  %v3863_v18 = vld [vmem:[%s5165_s0 + $0x498] ss:$28 sps:$4 sm:$0xff]   ;;  %v3864_v19 = vld [vmem:[%s5165_s0 + $0x4a8] ss:$28 sps:$4 sm:$0xff]  }
  0x74   :  { %2021 = vmatprep.subr.bf16.mxu1 %v4026_v0 }
  0x77   :  { %2022 = vmatpush1.bf16.msra.mxu1 %v3879_v25  ;;  %v3875_v25 = vld [vmem:[%s5165_s0 + $0x51c] ss:$28 sps:$4 sm:$0xff]  }
  0x78   :  { %2023 = vmatprep.subr.bf16.mxu1 %v4026_v0 }
  0x79   :  { %1820 = vmatmul.mubr.bf16.gmra.mrb[28].mxu1 %v3767_v21  ;;  %v3868_v21 = vld [vmem:[%s5165_s0 + $0x4e4] ss:$28 sps:$4 sm:$0xff]  }
  0x7a   :  { %2348 = vmatmul.mubr.bf16.gmra.mrb[28].mxu0 %v3768_v22  ;;  %1827 = vmatprep.mubr.bf16.mxu1 %v3771_v23  ;;  %v3870_v22 = vld [vmem:[%s5165_s0 + $0x4d0] ss:$28 sps:$4 sm:$0xff]   ;;  %v3871_v23 = vld [vmem:[%s5165_s0 + $0x4e0] ss:$28 sps:$4 sm:$0xff]  }
  0x7b   :  { %2355 = vmatprep.mubr.bf16.mxu0 %v3773_v24  ;;  %2024 = vmatpush1.bf16.msra.mxu1 %v3892_v34  ;;  %v3873_v24 = vld [vmem:[%s5165_s0 + $0x50c] ss:$28 sps:$4 sm:$0xff]   ;;  %v3890_v34 = vld [vmem:[%s5165_s0 + $0x578] ss:$28 sps:$4 sm:$0xff]  }
  0x7c   :  { %2025 = vmatprep.subr.bf16.mxu1 %v4026_v0  ;;  %v3800_v0 = vld [vmem:[%s5165_s0 + $0x2b4] ss:$28 sps:$4 sm:$0xff]  }
  0x7f   :  { %2026 = vmatpush1.bf16.msra.mxu1 %v3906_v44  ;;  %v3904_v44 = vld [vmem:[%s5165_s0 + $0x5e8] ss:$28 sps:$4 sm:$0xff]  }
  0x81   :  { %1828 = vmatmul.mubr.bf16.gmra.mrb[32].mxu1 %v3775_v26  ;;  %v3877_v26 = vld [vmem:[%s5165_s0 + $0x508] ss:$28 sps:$4 sm:$0xff]  }
  0x82   :  { %2356 = vmatmul.mubr.bf16.gmra.mrb[32].mxu0 %v3776_v27  ;;  %1835 = vmatprep.mubr.bf16.mxu1 %v3777_v28  ;;  %v3878_v27 = vld [vmem:[%s5165_s0 + $0x518] ss:$28 sps:$4 sm:$0xff]   ;;  %v3880_v28 = vld [vmem:[%s5165_s0 + $0x544] ss:$28 sps:$4 sm:$0xff]  }
  0x83   :  { %2363 = vmatprep.mubr.bf16.mxu0 %v3779_v29  ;;  %v3882_v29 = vld [vmem:[%s5165_s0 + $0x554] ss:$28 sps:$4 sm:$0xff]  }
  0x89   :  { %1836 = vmatmul.mubr.bf16.gmra.mrb[36].mxu1 %v3781_v30  ;;  %v3884_v30 = vld [vmem:[%s5165_s0 + $0x540] ss:$28 sps:$4 sm:$0xff]  }
  0x8a   :  { %2364 = vmatmul.mubr.bf16.gmra.mrb[36].mxu0 %v3782_v31  ;;  %1843 = vmatprep.mubr.bf16.mxu1 %v3784_v32  ;;  %v3885_v31 = vld [vmem:[%s5165_s0 + $0x550] ss:$28 sps:$4 sm:$0xff]   ;;  %v3886_v32 = vld [vmem:[%s5165_s0 + $0x57c] ss:$28 sps:$4 sm:$0xff]  }
  0x8b   :  { %2371 = vmatprep.mubr.bf16.mxu0 %v3786_v33  ;;  %v3888_v33 = vld [vmem:[%s5165_s0 + $0x58c] ss:$28 sps:$4 sm:$0xff]  }
  0x91   :  { %1844 = vmatmul.mubr.bf16.gmra.mrb[40].mxu1 %v3788_v36  ;;  %v3894_v36 = vld [vmem:[%s5165_s0 + $0x5b4] ss:$28 sps:$4 sm:$0xff]  }
  0x92   :  { %2372 = vmatmul.mubr.bf16.gmra.mrb[40].mxu0 %v3789_v37  ;;  %1851 = vmatprep.mubr.bf16.mxu1 %v3790_v38  ;;  %v3896_v37 = vld [vmem:[%s5165_s0 + $0x5c4] ss:$28 sps:$4 sm:$0xff]   ;;  %v3898_v38 = vld [vmem:[%s5165_s0 + $0x5b0] ss:$28 sps:$4 sm:$0xff]  }
  0x93   :  { %2379 = vmatprep.mubr.bf16.mxu0 %v3792_v39  ;;  %v3899_v39 = vld [vmem:[%s5165_s0 + $0x5c0] ss:$28 sps:$4 sm:$0xff]  }
  0x99   :  { %1852 = vmatmul.mubr.bf16.gmra.mrb[44].mxu1 %v3794_v41  ;;  %v3900_v41 = vld [vmem:[%s5165_s0 + $0x5ec] ss:$28 sps:$4 sm:$0xff]  }
  0x9a   :  { %2380 = vmatmul.mubr.bf16.gmra.mrb[44].mxu0 %v3796_v42  ;;  %1859 = vmatprep.mubr.bf16.mxu1 %v3798_v43  ;;  %v3902_v42 = vld [vmem:[%s5165_s0 + $0x5fc] ss:$28 sps:$4 sm:$0xff]   ;;  %v239_v43 = vld [vmem:[%s5165_s0 + $0x620] sm:$0xff] }
  0x9b   :  { %2387 = vmatprep.mubr.bf16.mxu0 %v3800_v0  ;;  %v241_v0 = vld [vmem:[%s5165_s0 + $0x630] sm:$0xff] }
  0xa1   :  { %1860 = vmatmul.mubr.bf16.gmra.mrb[48].mxu1 %v3802_v45  ;;  %v3905_v45 = vld [vmem:[%s5165_s0 + $0x5f8] ss:$28 sps:$4 sm:$0xff]  }
  0xa2   :  { %2388 = vmatmul.mubr.bf16.gmra.mrb[48].mxu0 %v3803_v46  ;;  %1867 = vmatprep.mubr.bf16.mxu1 %v3804_v47  ;;  %v3103_v46 = vcombine.high %v239_v43, %v239_v43  ;;  %v3107_v47 = vcombine.high %v241_v0, %v241_v0 }
  0xa3   :  { %2395 = vmatprep.mubr.bf16.mxu0 %v3807_v48  ;;  %v3102_v48 = vcombine.low %v239_v43, %v239_v43  ;;  %v3985_v43 = vld [vmem:[%s5165_s0 + $0x3f8] ss:$28 sps:$4 sm:$0xff]  }
  0xa9   :  { %1868 = vmatmul.mubr.bf16.gmra.mrb[52].mxu1 %v3809_v49  ;;  %v3106_v49 = vcombine.low %v241_v0, %v241_v0  ;;  %v3986_v0 = vld [vmem:[%s5165_s0 + $0x408] ss:$28 sps:$4 sm:$0xff]  }
  0xaa   :  { %2396 = vmatmul.mubr.bf16.gmra.mrb[52].mxu0 %v3810_v50  ;;  %1875 = vmatprep.mubr.bf16.mxu1 %v3811_v51  ;;  %v3913_v50 = vld [vmem:[%s5165_s0 + $0xc] ss:$28 sps:$4 sm:$0xff]  }
  0xab   :  { %2403 = vmatprep.mubr.bf16.mxu0 %v3813_v52  ;;  %v3911_v51 = vld [vmem:[%s5165_s0 + $0x8] ss:$28 sps:$4 sm:$0xff]   ;;  %v3914_v52 = vld [vmem:[%s5165_s0 + $0x18] ss:$28 sps:$4 sm:$0xff]  }
  0xb1   :  { %1876 = vmatmul.mubr.bf16.gmra.mrb[56].mxu1 %v3815_v53  ;;  %v3915_v53 = vld [vmem:[%s5165_s0 + $0x44] ss:$28 sps:$4 sm:$0xff]  }
  0xb2   :  { %2404 = vmatmul.mubr.bf16.gmra.mrb[56].mxu0 %v3816_v54  ;;  %1883 = vmatprep.mubr.bf16.mxu1 %v3818_v55  ;;  %v3917_v54 = vld [vmem:[%s5165_s0 + $0x40] ss:$28 sps:$4 sm:$0xff]   ;;  %v3918_v55 = vld [vmem:[%s5165_s0 + $0x50] ss:$28 sps:$4 sm:$0xff]  }
  0xb3   :  { %2411 = vmatprep.mubr.bf16.mxu0 %v3820_v56  ;;  %v3919_v56 = vld [vmem:[%s5165_s0 + $0x7c] ss:$28 sps:$4 sm:$0xff]  }
  0xb9   :  { %1884 = vmatmul.mubr.bf16.gmra.mrb[60].mxu1 %v3823_v57  ;;  %v3921_v57 = vld [vmem:[%s5165_s0 + $0x78] ss:$28 sps:$4 sm:$0xff]  }
  0xba   :  { %2412 = vmatmul.mubr.bf16.gmra.mrb[60].mxu0 %v3824_v58  ;;  %1891 = vmatprep.mubr.bf16.mxu1 %v3825_v59  ;;  %v3922_v58 = vld [vmem:[%s5165_s0 + $0x88] ss:$28 sps:$4 sm:$0xff]   ;;  %v3923_v59 = vld [vmem:[%s5165_s0 + $0xb4] ss:$28 sps:$4 sm:$0xff]  }
  0xbb   :  { %2419 = vmatprep.mubr.bf16.mxu0 %v3827_v60  ;;  %v3925_v60 = vld [vmem:[%s5165_s0 + $0xb0] ss:$28 sps:$4 sm:$0xff]  }
  0xc1   :  { %1892 = vmatmul.mubr.bf16.gmra.mrb[64].mxu1 %v3829_v61  ;;  %v3926_v61 = vld [vmem:[%s5165_s0 + $0xc0] ss:$28 sps:$4 sm:$0xff]  }
  0xc2   :  { %2420 = vmatmul.mubr.bf16.gmra.mrb[64].mxu0 %v3830_v62  ;;  %1899 = vmatprep.mubr.bf16.mxu1 %v3832_v63  ;;  %v3927_v62 = vld [vmem:[%s5165_s0 + $0xec] ss:$28 sps:$4 sm:$0xff]  }
  0xc3   :  { %2427 = vmatprep.mubr.bf16.mxu0 %v3834_v1  ;;  %v3929_v63 = vld [vmem:[%s5165_s0 + $0xe8] ss:$28 sps:$4 sm:$0xff]   ;;  %v3930_v1 = vld [vmem:[%s5165_s0 + $0xf8] ss:$28 sps:$4 sm:$0xff]  }
  0xc9   :  { %1900 = vmatmul.mubr.bf16.gmra.mrb[68].mxu1 %v3836_v2  ;;  %v3931_v2 = vld [vmem:[%s5165_s0 + $0x124] ss:$28 sps:$4 sm:$0xff]  }
  0xca   :  { %2428 = vmatmul.mubr.bf16.gmra.mrb[68].mxu0 %v3837_v3  ;;  %1907 = vmatprep.mubr.bf16.mxu1 %v3838_v4  ;;  %v3933_v3 = vld [vmem:[%s5165_s0 + $0x120] ss:$28 sps:$4 sm:$0xff]   ;;  %v3934_v4 = vld [vmem:[%s5165_s0 + $0x130] ss:$28 sps:$4 sm:$0xff]  }
  0xcb   :  { %2435 = vmatprep.mubr.bf16.mxu0 %v3840_v5  ;;  %v3935_v5 = vld [vmem:[%s5165_s0 + $0x15c] ss:$28 sps:$4 sm:$0xff]  }
  0xd1   :  { %1908 = vmatmul.mubr.bf16.gmra.mrb[72].mxu1 %v3842_v6  ;;  %v3937_v6 = vld [vmem:[%s5165_s0 + $0x158] ss:$28 sps:$4 sm:$0xff]  }
  0xd2   :  { %2436 = vmatmul.mubr.bf16.gmra.mrb[72].mxu0 %v3843_v7  ;;  %1915 = vmatprep.mubr.bf16.mxu1 %v3846_v8  ;;  %v3938_v7 = vld [vmem:[%s5165_s0 + $0x168] ss:$28 sps:$4 sm:$0xff]   ;;  %v3939_v8 = vld [vmem:[%s5165_s0 + $0x194] ss:$28 sps:$4 sm:$0xff]  }
  0xd3   :  { %2443 = vmatprep.mubr.bf16.mxu0 %v3848_v9  ;;  %v3941_v9 = vld [vmem:[%s5165_s0 + $0x190] ss:$28 sps:$4 sm:$0xff]  }
  0xd9   :  { %1916 = vmatmul.mubr.bf16.gmra.mrb[76].mxu1 %v3850_v10  ;;  %v3942_v10 = vld [vmem:[%s5165_s0 + $0x1a0] ss:$28 sps:$4 sm:$0xff]  }
  0xda   :  { %2444 = vmatmul.mubr.bf16.gmra.mrb[76].mxu0 %v3851_v11  ;;  %1923 = vmatprep.mubr.bf16.mxu1 %v3852_v12  ;;  %v3943_v11 = vld [vmem:[%s5165_s0 + $0x1cc] ss:$28 sps:$4 sm:$0xff]  }
  0xdb   :  { %2451 = vmatprep.mubr.bf16.mxu0 %v3854_v13  ;;  %v3945_v12 = vld [vmem:[%s5165_s0 + $0x1c8] ss:$28 sps:$4 sm:$0xff]   ;;  %v3946_v13 = vld [vmem:[%s5165_s0 + $0x1d8] ss:$28 sps:$4 sm:$0xff]  }
  0xe1   :  { %1924 = vmatmul.mubr.bf16.gmra.mrb[80].mxu1 %v3856_v14  ;;  %v3947_v14 = vld [vmem:[%s5165_s0 + $0x204] ss:$28 sps:$4 sm:$0xff]  }
  0xe2   :  { %2452 = vmatmul.mubr.bf16.gmra.mrb[80].mxu0 %v3857_v15  ;;  %1931 = vmatprep.mubr.bf16.mxu1 %v3859_v16  ;;  %v3949_v15 = vld [vmem:[%s5165_s0 + $0x200] ss:$28 sps:$4 sm:$0xff]   ;;  %v3950_v16 = vld [vmem:[%s5165_s0 + $0x210] ss:$28 sps:$4 sm:$0xff]  }
  0xe3   :  { %2459 = vmatprep.mubr.bf16.mxu0 %v3861_v17  ;;  %v3951_v17 = vld [vmem:[%s5165_s0 + $0x23c] ss:$28 sps:$4 sm:$0xff]  }
  0xe9   :  { %1932 = vmatmul.mubr.bf16.gmra.mrb[84].mxu1 %v3863_v18  ;;  %v3953_v18 = vld [vmem:[%s5165_s0 + $0x238] ss:$28 sps:$4 sm:$0xff]  }
  0xea   :  { %2460 = vmatmul.mubr.bf16.gmra.mrb[84].mxu0 %v3864_v19  ;;  %1939 = vmatprep.mubr.bf16.mxu1 %v3865_v20  ;;  %v3954_v19 = vld [vmem:[%s5165_s0 + $0x248] ss:$28 sps:$4 sm:$0xff]   ;;  %v3955_v20 = vld [vmem:[%s5165_s0 + $0x274] ss:$28 sps:$4 sm:$0xff]  }
  0xeb   :  { %2467 = vmatprep.mubr.bf16.mxu0 %v3868_v21  ;;  %v3957_v21 = vld [vmem:[%s5165_s0 + $0x270] ss:$28 sps:$4 sm:$0xff]  }
  0xf1   :  { %1940 = vmatmul.mubr.bf16.gmra.mrb[88].mxu1 %v3870_v22  ;;  %v3958_v22 = vld [vmem:[%s5165_s0 + $0x280] ss:$28 sps:$4 sm:$0xff]  }
  0xf2   :  { %2468 = vmatmul.mubr.bf16.gmra.mrb[88].mxu0 %v3871_v23  ;;  %1947 = vmatprep.mubr.bf16.mxu1 %v3873_v24  ;;  %v3959_v23 = vld [vmem:[%s5165_s0 + $0x2ac] ss:$28 sps:$4 sm:$0xff]  }
  0xf3   :  { %2475 = vmatprep.mubr.bf16.mxu0 %v3875_v25  ;;  %v3961_v24 = vld [vmem:[%s5165_s0 + $0x2a8] ss:$28 sps:$4 sm:$0xff]   ;;  %v3962_v25 = vld [vmem:[%s5165_s0 + $0x2b8] ss:$28 sps:$4 sm:$0xff]  }
  0xf9   :  { %1948 = vmatmul.mubr.bf16.gmra.mrb[92].mxu1 %v3877_v26  ;;  %v3963_v26 = vld [vmem:[%s5165_s0 + $0x2e4] ss:$28 sps:$4 sm:$0xff]  }
  0xfa   :  { %2476 = vmatmul.mubr.bf16.gmra.mrb[92].mxu0 %v3878_v27  ;;  %1955 = vmatprep.mubr.bf16.mxu1 %v3880_v28  ;;  %v3965_v27 = vld [vmem:[%s5165_s0 + $0x2e0] ss:$28 sps:$4 sm:$0xff]   ;;  %v3966_v28 = vld [vmem:[%s5165_s0 + $0x2f0] ss:$28 sps:$4 sm:$0xff]  }
  0xfb   :  { %2483 = vmatprep.mubr.bf16.mxu0 %v3882_v29  ;;  %v3967_v29 = vld [vmem:[%s5165_s0 + $0x31c] ss:$28 sps:$4 sm:$0xff]  }
 0x101   :  { %1956 = vmatmul.mubr.bf16.gmra.mrb[96].mxu1 %v3884_v30  ;;  %v3969_v30 = vld [vmem:[%s5165_s0 + $0x318] ss:$28 sps:$4 sm:$0xff]  }
 0x102   :  { %2484 = vmatmul.mubr.bf16.gmra.mrb[96].mxu0 %v3885_v31  ;;  %1963 = vmatprep.mubr.bf16.mxu1 %v3886_v32  ;;  %v3970_v31 = vld [vmem:[%s5165_s0 + $0x328] ss:$28 sps:$4 sm:$0xff]   ;;  %v3971_v32 = vld [vmem:[%s5165_s0 + $0x354] ss:$28 sps:$4 sm:$0xff]  }
 0x103   :  { %2491 = vmatprep.mubr.bf16.mxu0 %v3888_v33  ;;  %v3973_v33 = vld [vmem:[%s5165_s0 + $0x350] ss:$28 sps:$4 sm:$0xff]  }
 0x109   :  { %1964 = vmatmul.mubr.bf16.gmra.mrb[100].mxu1 %v3890_v34  ;;  %v3974_v34 = vld [vmem:[%s5165_s0 + $0x360] ss:$28 sps:$4 sm:$0xff]  }
 0x10a   :  { %2492 = vmatmul.mubr.bf16.gmra.mrb[100].mxu0 %v3891_v35  ;;  %1971 = vmatprep.mubr.bf16.mxu1 %v3894_v36  ;;  %v3975_v35 = vld [vmem:[%s5165_s0 + $0x38c] ss:$28 sps:$4 sm:$0xff]  }
 0x10b   :  { %2499 = vmatprep.mubr.bf16.mxu0 %v3896_v37  ;;  %v3977_v36 = vld [vmem:[%s5165_s0 + $0x388] ss:$28 sps:$4 sm:$0xff]   ;;  %v3978_v37 = vld [vmem:[%s5165_s0 + $0x398] ss:$28 sps:$4 sm:$0xff]  }
 0x111   :  { %1972 = vmatmul.mubr.bf16.gmra.mrb[104].mxu1 %v3898_v38  ;;  %v3979_v38 = vld [vmem:[%s5165_s0 + $0x3c4] ss:$28 sps:$4 sm:$0xff]  }
 0x112   :  { %2500 = vmatmul.mubr.bf16.gmra.mrb[104].mxu0 %v3899_v39  ;;  %1979 = vmatprep.mubr.bf16.mxu1 %v3900_v41  ;;  %v3981_v39 = vld [vmem:[%s5165_s0 + $0x3c0] ss:$28 sps:$4 sm:$0xff]   ;;  %v3982_v41 = vld [vmem:[%s5165_s0 + $0x3d0] ss:$28 sps:$4 sm:$0xff]  }
 0x113   :  { %2507 = vmatprep.mubr.bf16.mxu0 %v3902_v42  ;;  %v3983_v42 = vld [vmem:[%s5165_s0 + $0x3fc] ss:$28 sps:$4 sm:$0xff]  }
 0x119   :  { %1980 = vmatmul.mubr.bf16.gmra.mrb[108].mxu1 %v3904_v44  ;;  %v3987_v44 = vld [vmem:[%s5165_s0 + $0x434] ss:$28 sps:$4 sm:$0xff]  }
 0x11a   :  { %2508 = vmatmul.mubr.bf16.gmra.mrb[108].mxu0 %v3905_v45  ;;  %1987 = vmatprep.mubr.bf16.mxu1 %v3103_v46  ;;  %v3989_v45 = vld [vmem:[%s5165_s0 + $0x430] ss:$28 sps:$4 sm:$0xff]   ;;  %v3990_v46 = vld [vmem:[%s5165_s0 + $0x440] ss:$28 sps:$4 sm:$0xff]  }
 0x11b   :  { %2515 = vmatprep.mubr.bf16.mxu0 %v3107_v47  ;;  %v3991_v47 = vld [vmem:[%s5165_s0 + $0x46c] ss:$28 sps:$4 sm:$0xff]  }
 0x121   :  { %1988 = vmatmul.mubr.bf16.gmra.mrb[112].mxu1 %v3102_v48  ;;  %v3993_v48 = vld [vmem:[%s5165_s0 + $0x468] ss:$28 sps:$4 sm:$0xff]  }
 0x122   :  { %2516 = vmatmul.mubr.bf16.gmra.mrb[112].mxu0 %v3106_v49  ;;  %2027 = vmatprep.mubr.bf16.mxu1 %v3913_v50  ;;  %v3994_v49 = vld [vmem:[%s5165_s0 + $0x478] ss:$28 sps:$4 sm:$0xff]   ;;  %v3995_v50 = vld [vmem:[%s5165_s0 + $0x4a4] ss:$28 sps:$4 sm:$0xff]  }
 0x123   :  { %3218 = vmatprep.mubr.msk.bf16.mxu0 %vm4028_vm0, %v4027_v40 }
 0x129   :  { %2028 = vmatmul.mubr.bf16.vlgmr.msra.gmra.mrb[0].mxu1 %v3911_v51  ;;  %v3997_v51 = vld [vmem:[%s5165_s0 + $0x4a0] ss:$28 sps:$4 sm:$0xff]  }
 0x12a   :  { %3219 = vmatmul.mubr.bf16.vlgmr.msra.gmra.mrb[0].mxu0 %v3914_v52  ;;  %2035 = vmatprep.mubr.bf16.mxu1 %v3915_v53  ;;  %v3998_v52 = vld [vmem:[%s5165_s0 + $0x4b0] ss:$28 sps:$4 sm:$0xff]   ;;  %v3999_v53 = vld [vmem:[%s5165_s0 + $0x4dc] ss:$28 sps:$4 sm:$0xff]  }
 0x12b   :  { %3222 = vmatprep.mubr.msk.bf16.mxu0 %vm4028_vm0, %v4027_v40 }
 0x131   :  { %2036 = vmatmul.mubr.bf16.gmra.mrb[4].mxu1 %v3917_v54  ;;  %v4001_v54 = vld [vmem:[%s5165_s0 + $0x4d8] ss:$28 sps:$4 sm:$0xff]  }
 0x132   :  { %3223 = vmatmul.mubr.bf16.gmra.mrb[4].mxu0 %v3918_v55  ;;  %2043 = vmatprep.mubr.bf16.mxu1 %v3919_v56  ;;  %v4002_v55 = vld [vmem:[%s5165_s0 + $0x4e8] ss:$28 sps:$4 sm:$0xff]   ;;  %v4003_v56 = vld [vmem:[%s5165_s0 + $0x514] ss:$28 sps:$4 sm:$0xff]  }
 0x133   :  { %3226 = vmatprep.mubr.msk.bf16.mxu0 %vm4028_vm0, %v4027_v40 }
 0x139   :  { %2044 = vmatmul.mubr.bf16.gmra.mrb[8].mxu1 %v3921_v57  ;;  %v4005_v57 = vld [vmem:[%s5165_s0 + $0x510] ss:$28 sps:$4 sm:$0xff]  }
 0x13a   :  { %3227 = vmatmul.mubr.bf16.gmra.mrb[8].mxu0 %v3922_v58  ;;  %2051 = vmatprep.mubr.bf16.mxu1 %v3923_v59  ;;  %v4006_v58 = vld [vmem:[%s5165_s0 + $0x520] ss:$28 sps:$4 sm:$0xff]   ;;  %v4007_v59 = vld [vmem:[%s5165_s0 + $0x54c] ss:$28 sps:$4 sm:$0xff]  }
 0x13b   :  { %3230 = vmatprep.mubr.msk.bf16.mxu0 %vm4028_vm0, %v4027_v40 }
 0x141   :  { %2052 = vmatmul.mubr.bf16.gmra.mrb[12].mxu1 %v3925_v60  ;;  %v4009_v60 = vld [vmem:[%s5165_s0 + $0x548] ss:$28 sps:$4 sm:$0xff]  }
 0x142   :  { %3231 = vmatmul.mubr.bf16.gmra.mrb[12].mxu0 %v3926_v61  ;;  %2059 = vmatprep.mubr.bf16.mxu1 %v3927_v62  ;;  %v4010_v61 = vld [vmem:[%s5165_s0 + $0x558] ss:$28 sps:$4 sm:$0xff]   ;;  %v4011_v62 = vld [vmem:[%s5165_s0 + $0x584] ss:$28 sps:$4 sm:$0xff]  }
 0x143   :  { %3234 = vmatprep.mubr.msk.bf16.mxu0 %vm4028_vm0, %v4027_v40 }
 0x149   :  { %2060 = vmatmul.mubr.bf16.gmra.mrb[16].mxu1 %v3929_v63  ;;  %v4013_v63 = vld [vmem:[%s5165_s0 + $0x580] ss:$28 sps:$4 sm:$0xff]  }
 0x14a   :  { %3235 = vmatmul.mubr.bf16.gmra.mrb[16].mxu0 %v3930_v1  ;;  %2067 = vmatprep.mubr.bf16.mxu1 %v3931_v2  ;;  %v4014_v1 = vld [vmem:[%s5165_s0 + $0x590] ss:$28 sps:$4 sm:$0xff]   ;;  %v4015_v2 = vld [vmem:[%s5165_s0 + $0x5bc] ss:$28 sps:$4 sm:$0xff]  }
 0x14b   :  { %3238 = vmatprep.mubr.msk.bf16.mxu0 %vm4028_vm0, %v4027_v40 }
 0x151   :  { %2068 = vmatmul.mubr.bf16.gmra.mrb[20].mxu1 %v3933_v3  ;;  %v4017_v3 = vld [vmem:[%s5165_s0 + $0x5b8] ss:$28 sps:$4 sm:$0xff]  }
 0x152   :  { %3239 = vmatmul.mubr.bf16.gmra.mrb[20].mxu0 %v3934_v4  ;;  %2075 = vmatprep.mubr.bf16.mxu1 %v3935_v5  ;;  %v4018_v4 = vld [vmem:[%s5165_s0 + $0x5c8] ss:$28 sps:$4 sm:$0xff]   ;;  %v4019_v5 = vld [vmem:[%s5165_s0 + $0x5f4] ss:$28 sps:$4 sm:$0xff]  }
 0x153   :  { %3242 = vmatprep.mubr.msk.bf16.mxu0 %vm4028_vm0, %v4027_v40 }
 0x159   :  { %2076 = vmatmul.mubr.bf16.gmra.mrb[24].mxu1 %v3937_v6  ;;  %v4918_v6 = vld [vmem:[%s5166_s2] ss:$0 sm:$0xff] }
 0x15a   :  { %3243 = vmatmul.mubr.bf16.gmra.mrb[24].mxu0 %v3938_v7  ;;  %2083 = vmatprep.mubr.bf16.mxu1 %v3939_v8  ;;  %v240_v7 = vld [vmem:[%s5165_s0 + $0x628] sm:$0xff] }
 0x15b   :  { %3246 = vmatprep.mubr.msk.bf16.mxu0 %vm4028_vm0, %v4027_v40 }
 0x161   :  { %2084 = vmatmul.mubr.bf16.gmra.mrb[28].mxu1 %v3941_v9 }
 0x162   :  { %3247 = vmatmul.mubr.bf16.gmra.mrb[28].mxu0 %v3942_v10  ;;  %2091 = vmatprep.mubr.bf16.mxu1 %v3943_v11 }
 0x163   :  { %3250 = vmatprep.mubr.msk.bf16.mxu0 %vm4028_vm0, %v4027_v40 }
 0x169   :  { %2092 = vmatmul.mubr.bf16.gmra.mrb[32].mxu1 %v3945_v12  ;;  %v4021_v12 = vld [vmem:[%s5165_s0 + $0x5f0] ss:$28 sps:$4 sm:$0xff]  }
 0x16a   :  { %3251 = vmatmul.mubr.bf16.gmra.mrb[32].mxu0 %v3946_v13  ;;  %2099 = vmatprep.mubr.bf16.mxu1 %v3947_v14 }
 0x16b   :  { %3254 = vmatprep.mubr.msk.bf16.mxu0 %vm4028_vm0, %v4027_v40 }
 0x171   :  { %2100 = vmatmul.mubr.bf16.gmra.mrb[36].mxu1 %v3949_v15  ;;  %v4022_v15 = vld [vmem:[%s5165_s0 + $0x600] ss:$28 sps:$4 sm:$0xff]  }
 0x172   :  { %3255 = vmatmul.mubr.bf16.gmra.mrb[36].mxu0 %v3950_v16  ;;  %2107 = vmatprep.mubr.bf16.mxu1 %v3951_v17  ;;  %v3105_v16 = vcombine.high %v240_v7, %v240_v7 }
 0x173   :  { %3258 = vmatprep.mubr.msk.bf16.mxu0 %vm4028_vm0, %v4027_v40 }
 0x179   :  { %2108 = vmatmul.mubr.bf16.gmra.mrb[40].mxu1 %v3953_v18 }
 0x17a   :  { %3259 = vmatmul.mubr.bf16.gmra.mrb[40].mxu0 %v3954_v19  ;;  %2115 = vmatprep.mubr.bf16.mxu1 %v3955_v20 }
 0x17b   :  { %3262 = vmatprep.mubr.msk.bf16.mxu0 %vm4028_vm0, %v4027_v40 }
 0x181   :  { %2116 = vmatmul.mubr.bf16.gmra.mrb[44].mxu1 %v3957_v21 }
 0x182   :  { %3263 = vmatmul.mubr.bf16.gmra.mrb[44].mxu0 %v3958_v22  ;;  %2123 = vmatprep.mubr.bf16.mxu1 %v3959_v23 }
 0x183   :  { %3266 = vmatprep.mubr.msk.bf16.mxu0 %vm4028_vm0, %v4027_v40 }
 0x189   :  { %2124 = vmatmul.mubr.bf16.gmra.mrb[48].mxu1 %v3961_v24 }
 0x18a   :  { %3267 = vmatmul.mubr.bf16.gmra.mrb[48].mxu0 %v3962_v25  ;;  %2131 = vmatprep.mubr.bf16.mxu1 %v3963_v26 }
 0x18b   :  { %3270 = vmatprep.mubr.msk.bf16.mxu0 %vm4028_vm0, %v4027_v40 }
 0x191   :  { %2132 = vmatmul.mubr.bf16.gmra.mrb[52].mxu1 %v3965_v27 }
 0x192   :  { %3271 = vmatmul.mubr.bf16.gmra.mrb[52].mxu0 %v3966_v28  ;;  %2139 = vmatprep.mubr.bf16.mxu1 %v3967_v29  ;;  %v3104_v29 = vcombine.low %v240_v7, %v240_v7 }
 0x193   :  { %3274 = vmatprep.mubr.msk.bf16.mxu0 %vm4028_vm0, %v4027_v40 }
 0x199   :  { %2140 = vmatmul.mubr.bf16.gmra.mrb[56].mxu1 %v3969_v30 }
 0x19a   :  { %3275 = vmatmul.mubr.bf16.gmra.mrb[56].mxu0 %v3970_v31  ;;  %2147 = vmatprep.mubr.bf16.mxu1 %v3971_v32  ;;  %v4025_v32 = vld [vmem:[%s5165_s0 + $0x638] ss:$0 sps:$4 sm:$0xff]  }
 0x19b   :  { %3278 = vmatprep.mubr.msk.bf16.mxu0 %vm4028_vm0, %v4027_v40 }
 0x1a1   :  { %2148 = vmatmul.mubr.bf16.gmra.mrb[60].mxu1 %v3973_v33 }
 0x1a2   :  { %3279 = vmatmul.mubr.bf16.gmra.mrb[60].mxu0 %v3974_v34  ;;  %2155 = vmatprep.mubr.bf16.mxu1 %v3975_v35 }
 0x1a3   :  { %3282 = vmatprep.mubr.msk.bf16.mxu0 %vm4028_vm0, %v4027_v40 }
 0x1a9   :  { %2156 = vmatmul.mubr.bf16.gmra.mrb[64].mxu1 %v3977_v36 }
 0x1aa   :  { %3283 = vmatmul.mubr.bf16.gmra.mrb[64].mxu0 %v3978_v37  ;;  %2163 = vmatprep.mubr.bf16.mxu1 %v3979_v38 }
 0x1ab   :  { %3286 = vmatprep.mubr.msk.bf16.mxu0 %vm4028_vm0, %v4027_v40 }
 0x1b1   :  { %2164 = vmatmul.mubr.bf16.gmra.mrb[68].mxu1 %v3981_v39 }
 0x1b2   :  { %3287 = vmatmul.mubr.bf16.gmra.mrb[68].mxu0 %v3982_v41  ;;  %2171 = vmatprep.mubr.bf16.mxu1 %v3983_v42 }
 0x1b3   :  { %3290 = vmatprep.mubr.msk.bf16.mxu0 %vm4028_vm0, %v4027_v40 }
 0x1b9   :  { %2172 = vmatmul.mubr.bf16.gmra.mrb[72].mxu1 %v3985_v43 }
 0x1ba   :  { %3291 = vmatmul.mubr.bf16.gmra.mrb[72].mxu0 %v3986_v0  ;;  %2179 = vmatprep.mubr.bf16.mxu1 %v3987_v44 }
 0x1bb   :  { %3294 = vmatprep.mubr.msk.bf16.mxu0 %vm4028_vm0, %v4027_v40 }
 0x1c1   :  { %2180 = vmatmul.mubr.bf16.gmra.mrb[76].mxu1 %v3989_v45 }
 0x1c2   :  { %3295 = vmatmul.mubr.bf16.gmra.mrb[76].mxu0 %v3990_v46  ;;  %2187 = vmatprep.mubr.bf16.mxu1 %v3991_v47 }
 0x1c3   :  { %3298 = vmatprep.mubr.msk.bf16.mxu0 %vm4028_vm0, %v4027_v40 }
 0x1c9   :  { %2188 = vmatmul.mubr.bf16.gmra.mrb[80].mxu1 %v3993_v48 }
 0x1ca   :  { %3299 = vmatmul.mubr.bf16.gmra.mrb[80].mxu0 %v3994_v49  ;;  %2195 = vmatprep.mubr.bf16.mxu1 %v3995_v50 }
 0x1cb   :  { %3302 = vmatprep.mubr.msk.bf16.mxu0 %vm4028_vm0, %v4027_v40 }
 0x1d1   :  { %2196 = vmatmul.mubr.bf16.gmra.mrb[84].mxu1 %v3997_v51 }
 0x1d2   :  { %3303 = vmatmul.mubr.bf16.gmra.mrb[84].mxu0 %v3998_v52  ;;  %2203 = vmatprep.mubr.bf16.mxu1 %v3999_v53 }
 0x1d3   :  { %3306 = vmatprep.mubr.msk.bf16.mxu0 %vm4028_vm0, %v4027_v40 }
 0x1d9   :  { %2204 = vmatmul.mubr.bf16.gmra.mrb[88].mxu1 %v4001_v54 }
 0x1da   :  { %3307 = vmatmul.mubr.bf16.gmra.mrb[88].mxu0 %v4002_v55  ;;  %2211 = vmatprep.mubr.bf16.mxu1 %v4003_v56 }
 0x1db   :  { %3310 = vmatprep.mubr.msk.bf16.mxu0 %vm4028_vm0, %v4027_v40 }
 0x1e1   :  { %2212 = vmatmul.mubr.bf16.gmra.mrb[92].mxu1 %v4005_v57 }
 0x1e2   :  { %3311 = vmatmul.mubr.bf16.gmra.mrb[92].mxu0 %v4006_v58  ;;  %2219 = vmatprep.mubr.bf16.mxu1 %v4007_v59 }
 0x1e3   :  { %3314 = vmatprep.mubr.msk.bf16.mxu0 %vm4028_vm0, %v4027_v40 }
 0x1e9   :  { %2220 = vmatmul.mubr.bf16.gmra.mrb[96].mxu1 %v4009_v60 }
 0x1ea   :  { %3315 = vmatmul.mubr.bf16.gmra.mrb[96].mxu0 %v4010_v61  ;;  %2227 = vmatprep.mubr.bf16.mxu1 %v4011_v62 }
 0x1eb   :  { %3318 = vmatprep.mubr.msk.bf16.mxu0 %vm4028_vm0, %v4027_v40 }
 0x1f1   :  { %2228 = vmatmul.mubr.bf16.gmra.mrb[100].mxu1 %v4013_v63 }
 0x1f2   :  { %3319 = vmatmul.mubr.bf16.gmra.mrb[100].mxu0 %v4014_v1  ;;  %2235 = vmatprep.mubr.bf16.mxu1 %v4015_v2 }
 0x1f3   :  { %3322 = vmatprep.mubr.msk.bf16.mxu0 %vm4028_vm0, %v4027_v40 }
 0x1f9   :  { %2236 = vmatmul.mubr.bf16.gmra.mrb[104].mxu1 %v4017_v3 }
 0x1fa   :  { %3323 = vmatmul.mubr.bf16.gmra.mrb[104].mxu0 %v4018_v4  ;;  %2243 = vmatprep.mubr.bf16.mxu1 %v4019_v5 }
 0x1fb   :  { %3326 = vmatprep.mubr.msk.bf16.mxu0 %vm4028_vm0, %v4027_v40 }
 0x1fc   :  { %v2029_v8 = vpop.f32.mrb[0].mxu1 }
 0x1fd   :  { %v3334_v9 = vadd.f32 %v4918_v6, %v2029_v8  ;;  %v2557_v10 = vpop.f32.mrb[0].mxu0  ;;  %v2031_v11 = vpop.f32.mrb[1].mxu1 }
 0x1fe   :  { %v3220_v13 = vpop.f32.mrb[1].mxu0  ;;  %v2032_v14 = vpop.f32.mrb[2].mxu1 }
 0x1ff   :  { %v3335_v17 = vadd.f32 %v3334_v9, %v2557_v10  ;;  %v3336_v18 = vadd.f32 %v4918_v6, %v2032_v14  ;;  %v2560_v19 = vpop.f32.mrb[2].mxu0  ;;  %v2034_v20 = vpop.f32.mrb[3].mxu1 }
 0x200   :  { %v3221_v21 = vpop.f32.mrb[3].mxu0 }
 0x201   :  { %v2787_v22 = vmax.f32 %v3335_v17, 0.0  ;;  %v3337_v23 = vadd.f32 %v3336_v18, %v2560_v19  ;;  %2244 = vmatmul.mubr.bf16.gmra.mrb[108].mxu1 %v4021_v12 }
 0x202   :  { %3327 = vmatmul.mubr.bf16.gmra.mrb[108].mxu0 %v4022_v15  ;;  %2251 = vmatprep.mubr.bf16.mxu1 %v3105_v16 }
 0x203   :  { %2844 = vst [vmem:[%s5167_s3] sm:$0xff] %v2787_v22  ;;  %v2788_v24 = vmax.f32 %v3337_v23, 0.0  ;;  %3330 = vmatprep.mubr.msk.bf16.mxu0 %vm4028_vm0, %v4027_v40 }
 0x204   :  { %v2037_v25 = vpop.f32.mrb[4].mxu1 }
 0x205   :  { %2845 = vst [vmem:[%s5167_s3 + $0x8] sm:$0xff] %v2788_v24  ;;  %v3338_v26 = vadd.f32 %v4918_v6, %v2037_v25  ;;  %v2565_v27 = vpop.f32.mrb[4].mxu0  ;;  %v2039_v28 = vpop.f32.mrb[5].mxu1 }
 0x206   :  { %v3224_v30 = vpop.f32.mrb[5].mxu0  ;;  %v2040_v31 = vpop.f32.mrb[6].mxu1 }
 0x207   :  { %v3339_v33 = vadd.f32 %v3338_v26, %v2565_v27  ;;  %v3340_v34 = vadd.f32 %v4918_v6, %v2040_v31  ;;  %v2568_v40 = vpop.f32.mrb[6].mxu0  ;;  %v2042_v35 = vpop.f32.mrb[7].mxu1 }
 0x208   :  { %v3225_v36 = vpop.f32.mrb[7].mxu0 }
 0x209   :  { %v2789_v37 = vmax.f32 %v3339_v33, 0.0  ;;  %v3341_v38 = vadd.f32 %v3340_v34, %v2568_v40  ;;  %2252 = vmatmul.mubr.bf16.gmra.mrb[112].mxu1 %v3104_v29 }
 0x20a   :  { %3331 = vmatmul.mubr.bf16.gmra.mrb[112].mxu0 %v4025_v32 }
 0x20b   :  { %2846 = vst [vmem:[%s5167_s3 + $0x10] sm:$0xff] %v2789_v37  ;;  %v2790_v39 = vmax.f32 %v3341_v38, 0.0 }
 0x20c   :  { %v2045_v41 = vpop.f32.mrb[8].mxu1 }
 0x20d   :  { %2847 = vst [vmem:[%s5167_s3 + $0x18] sm:$0xff] %v2790_v39  ;;  %v3342_v42 = vadd.f32 %v4918_v6, %v2045_v41  ;;  %v2573_v43 = vpop.f32.mrb[8].mxu0  ;;  %v2047_v0 = vpop.f32.mrb[9].mxu1 }
 0x20e   :  { %v3228_v44 = vpop.f32.mrb[9].mxu0  ;;  %v2048_v45 = vpop.f32.mrb[10].mxu1 }
 0x20f   :  { %v3343_v46 = vadd.f32 %v3342_v42, %v2573_v43  ;;  %v3344_v47 = vadd.f32 %v4918_v6, %v2048_v45  ;;  %v2576_v48 = vpop.f32.mrb[10].mxu0  ;;  %v2050_v49 = vpop.f32.mrb[11].mxu1 }
 0x210   :  { %v3229_v50 = vpop.f32.mrb[11].mxu0 }
 0x211   :  { %v2791_v51 = vmax.f32 %v3343_v46, 0.0  ;;  %v3345_v52 = vadd.f32 %v3344_v47, %v2576_v48 }
 0x213   :  { %2848 = vst [vmem:[%s5167_s3 + $0x20] sm:$0xff] %v2791_v51  ;;  %v2792_v53 = vmax.f32 %v3345_v52, 0.0 }
 0x214   :  { %v2053_v54 = vpop.f32.mrb[12].mxu1 }
 0x215   :  { %2849 = vst [vmem:[%s5167_s3 + $0x28] sm:$0xff] %v2792_v53  ;;  %v3346_v55 = vadd.f32 %v4918_v6, %v2053_v54  ;;  %v2581_v56 = vpop.f32.mrb[12].mxu0  ;;  %v2055_v57 = vpop.f32.mrb[13].mxu1 }
 0x216   :  { %v3232_v58 = vpop.f32.mrb[13].mxu0  ;;  %v2056_v59 = vpop.f32.mrb[14].mxu1 }
 0x217   :  { %v3347_v60 = vadd.f32 %v3346_v55, %v2581_v56  ;;  %v3348_v61 = vadd.f32 %v4918_v6, %v2056_v59  ;;  %v2584_v62 = vpop.f32.mrb[14].mxu0  ;;  %v2058_v63 = vpop.f32.mrb[15].mxu1 }
 0x218   :  { %v3233_v1 = vpop.f32.mrb[15].mxu0 }
 0x219   :  { %v2793_v2 = vmax.f32 %v3347_v60, 0.0  ;;  %v3349_v3 = vadd.f32 %v3348_v61, %v2584_v62 }
 0x21b   :  { %2850 = vst [vmem:[%s5167_s3 + $0x30] sm:$0xff] %v2793_v2  ;;  %v2794_v4 = vmax.f32 %v3349_v3, 0.0 }
 0x21c   :  { %v2061_v5 = vpop.f32.mrb[16].mxu1 }
 0x21d   :  { %2851 = vst [vmem:[%s5167_s3 + $0x38] sm:$0xff] %v2794_v4  ;;  %v3350_v7 = vadd.f32 %v4918_v6, %v2061_v5  ;;  %v2589_v8 = vpop.f32.mrb[16].mxu0  ;;  %v2063_v9 = vpop.f32.mrb[17].mxu1 }
 0x21e   :  { %v3236_v10 = vpop.f32.mrb[17].mxu0  ;;  %v2064_v11 = vpop.f32.mrb[18].mxu1 }
 0x21f   :  { %v3351_v12 = vadd.f32 %v3350_v7, %v2589_v8  ;;  %v3352_v13 = vadd.f32 %v4918_v6, %v2064_v11  ;;  %v2592_v14 = vpop.f32.mrb[18].mxu0  ;;  %v2066_v15 = vpop.f32.mrb[19].mxu1 }
 0x220   :  { %v3237_v16 = vpop.f32.mrb[19].mxu0 }
 0x221   :  { %v2795_v17 = vmax.f32 %v3351_v12, 0.0  ;;  %v3353_v18 = vadd.f32 %v3352_v13, %v2592_v14 }
 0x223   :  { %2852 = vst [vmem:[%s5167_s3 + $0x40] sm:$0xff] %v2795_v17  ;;  %v2796_v19 = vmax.f32 %v3353_v18, 0.0 }
 0x224   :  { %v2069_v20 = vpop.f32.mrb[20].mxu1 }
 0x225   :  { %2853 = vst [vmem:[%s5167_s3 + $0x48] sm:$0xff] %v2796_v19  ;;  %v3354_v21 = vadd.f32 %v4918_v6, %v2069_v20  ;;  %v2597_v22 = vpop.f32.mrb[20].mxu0  ;;  %v2071_v23 = vpop.f32.mrb[21].mxu1 }
 0x226   :  { %v3240_v24 = vpop.f32.mrb[21].mxu0  ;;  %v2072_v25 = vpop.f32.mrb[22].mxu1 }
 0x227   :  { %v3355_v26 = vadd.f32 %v3354_v21, %v2597_v22  ;;  %v3356_v27 = vadd.f32 %v4918_v6, %v2072_v25  ;;  %v2600_v28 = vpop.f32.mrb[22].mxu0  ;;  %v2074_v29 = vpop.f32.mrb[23].mxu1 }
 0x228   :  { %v3241_v30 = vpop.f32.mrb[23].mxu0 }
 0x229   :  { %v2797_v31 = vmax.f32 %v3355_v26, 0.0  ;;  %v3357_v32 = vadd.f32 %v3356_v27, %v2600_v28 }
 0x22b   :  { %2854 = vst [vmem:[%s5167_s3 + $0x50] sm:$0xff] %v2797_v31  ;;  %v2798_v33 = vmax.f32 %v3357_v32, 0.0 }
 0x22c   :  { %v2077_v34 = vpop.f32.mrb[24].mxu1 }
 0x22d   :  { %2855 = vst [vmem:[%s5167_s3 + $0x58] sm:$0xff] %v2798_v33  ;;  %v3358_v40 = vadd.f32 %v4918_v6, %v2077_v34  ;;  %v2605_v35 = vpop.f32.mrb[24].mxu0  ;;  %v2079_v36 = vpop.f32.mrb[25].mxu1 }
 0x22e   :  { %v3244_v37 = vpop.f32.mrb[25].mxu0  ;;  %v2080_v38 = vpop.f32.mrb[26].mxu1 }
 0x22f   :  { %v3359_v39 = vadd.f32 %v3358_v40, %v2605_v35  ;;  %v3360_v41 = vadd.f32 %v4918_v6, %v2080_v38  ;;  %v2608_v42 = vpop.f32.mrb[26].mxu0  ;;  %v2082_v43 = vpop.f32.mrb[27].mxu1 }
 0x230   :  { %v3245_v0 = vpop.f32.mrb[27].mxu0 }
 0x231   :  { %v2799_v44 = vmax.f32 %v3359_v39, 0.0  ;;  %v3361_v45 = vadd.f32 %v3360_v41, %v2608_v42 }
 0x233   :  { %2856 = vst [vmem:[%s5167_s3 + $0x60] sm:$0xff] %v2799_v44  ;;  %v2800_v46 = vmax.f32 %v3361_v45, 0.0 }
 0x234   :  { %v2085_v47 = vpop.f32.mrb[28].mxu1 }
 0x235   :  { %2857 = vst [vmem:[%s5167_s3 + $0x68] sm:$0xff] %v2800_v46  ;;  %v3362_v48 = vadd.f32 %v4918_v6, %v2085_v47  ;;  %v2613_v49 = vpop.f32.mrb[28].mxu0  ;;  %v2087_v50 = vpop.f32.mrb[29].mxu1 }
 0x236   :  { %v3248_v51 = vpop.f32.mrb[29].mxu0  ;;  %v2088_v52 = vpop.f32.mrb[30].mxu1 }
 0x237   :  { %v3363_v53 = vadd.f32 %v3362_v48, %v2613_v49  ;;  %v3364_v54 = vadd.f32 %v4918_v6, %v2088_v52  ;;  %v2616_v55 = vpop.f32.mrb[30].mxu0  ;;  %v2090_v56 = vpop.f32.mrb[31].mxu1 }
 0x238   :  { %v3249_v57 = vpop.f32.mrb[31].mxu0 }
 0x239   :  { %v2801_v58 = vmax.f32 %v3363_v53, 0.0  ;;  %v3365_v59 = vadd.f32 %v3364_v54, %v2616_v55 }
 0x23b   :  { %2858 = vst [vmem:[%s5167_s3 + $0x70] sm:$0xff] %v2801_v58  ;;  %v2802_v60 = vmax.f32 %v3365_v59, 0.0 }
 0x23c   :  { %v2093_v61 = vpop.f32.mrb[32].mxu1 }
 0x23d   :  { %2859 = vst [vmem:[%s5167_s3 + $0x78] sm:$0xff] %v2802_v60  ;;  %v3366_v62 = vadd.f32 %v4918_v6, %v2093_v61  ;;  %v2621_v63 = vpop.f32.mrb[32].mxu0  ;;  %v2095_v1 = vpop.f32.mrb[33].mxu1 }
 0x23e   :  { %v3252_v2 = vpop.f32.mrb[33].mxu0  ;;  %v2096_v3 = vpop.f32.mrb[34].mxu1 }
 0x23f   :  { %v3367_v4 = vadd.f32 %v3366_v62, %v2621_v63  ;;  %v3368_v5 = vadd.f32 %v4918_v6, %v2096_v3  ;;  %v2624_v7 = vpop.f32.mrb[34].mxu0  ;;  %v2098_v8 = vpop.f32.mrb[35].mxu1 }
 0x240   :  { %v3253_v9 = vpop.f32.mrb[35].mxu0 }
 0x241   :  { %v2803_v10 = vmax.f32 %v3367_v4, 0.0  ;;  %v3369_v11 = vadd.f32 %v3368_v5, %v2624_v7 }
 0x243   :  { %2860 = vst [vmem:[%s5167_s3 + $0x80] sm:$0xff] %v2803_v10  ;;  %v2804_v12 = vmax.f32 %v3369_v11, 0.0 }
 0x244   :  { %v2101_v13 = vpop.f32.mrb[36].mxu1 }
 0x245   :  { %2861 = vst [vmem:[%s5167_s3 + $0x88] sm:$0xff] %v2804_v12  ;;  %v3370_v14 = vadd.f32 %v4918_v6, %v2101_v13  ;;  %v2629_v15 = vpop.f32.mrb[36].mxu0  ;;  %v2103_v16 = vpop.f32.mrb[37].mxu1 }
 0x246   :  { %v3256_v17 = vpop.f32.mrb[37].mxu0  ;;  %v2104_v18 = vpop.f32.mrb[38].mxu1 }
 0x247   :  { %v3371_v19 = vadd.f32 %v3370_v14, %v2629_v15  ;;  %v3372_v20 = vadd.f32 %v4918_v6, %v2104_v18  ;;  %v2632_v21 = vpop.f32.mrb[38].mxu0  ;;  %v2106_v22 = vpop.f32.mrb[39].mxu1 }
 0x248   :  { %v3257_v23 = vpop.f32.mrb[39].mxu0 }
 0x249   :  { %v2805_v24 = vmax.f32 %v3371_v19, 0.0  ;;  %v3373_v25 = vadd.f32 %v3372_v20, %v2632_v21 }
 0x24b   :  { %2862 = vst [vmem:[%s5167_s3 + $0x90] sm:$0xff] %v2805_v24  ;;  %v2806_v26 = vmax.f32 %v3373_v25, 0.0 }
 0x24c   :  { %v2109_v27 = vpop.f32.mrb[40].mxu1 }
 0x24d   :  { %2863 = vst [vmem:[%s5167_s3 + $0x98] sm:$0xff] %v2806_v26  ;;  %v3374_v28 = vadd.f32 %v4918_v6, %v2109_v27  ;;  %v2637_v29 = vpop.f32.mrb[40].mxu0  ;;  %v2111_v30 = vpop.f32.mrb[41].mxu1 }
 0x24e   :  { %v3260_v31 = vpop.f32.mrb[41].mxu0  ;;  %v2112_v32 = vpop.f32.mrb[42].mxu1 }
 0x24f   :  { %v3375_v33 = vadd.f32 %v3374_v28, %v2637_v29  ;;  %v3376_v34 = vadd.f32 %v4918_v6, %v2112_v32  ;;  %v2640_v40 = vpop.f32.mrb[42].mxu0  ;;  %v2114_v35 = vpop.f32.mrb[43].mxu1 }
 0x250   :  { %v3261_v36 = vpop.f32.mrb[43].mxu0 }
 0x251   :  { %v2807_v37 = vmax.f32 %v3375_v33, 0.0  ;;  %v3377_v38 = vadd.f32 %v3376_v34, %v2640_v40 }
 0x253   :  { %2864 = vst [vmem:[%s5167_s3 + $0xa0] sm:$0xff] %v2807_v37  ;;  %v2808_v39 = vmax.f32 %v3377_v38, 0.0 }
 0x254   :  { %v2117_v41 = vpop.f32.mrb[44].mxu1 }
 0x255   :  { %2865 = vst [vmem:[%s5167_s3 + $0xa8] sm:$0xff] %v2808_v39  ;;  %v3378_v42 = vadd.f32 %v4918_v6, %v2117_v41  ;;  %v2645_v43 = vpop.f32.mrb[44].mxu0  ;;  %v2119_v0 = vpop.f32.mrb[45].mxu1 }
 0x256   :  { %v3264_v44 = vpop.f32.mrb[45].mxu0  ;;  %v2120_v45 = vpop.f32.mrb[46].mxu1 }
 0x257   :  { %v3379_v46 = vadd.f32 %v3378_v42, %v2645_v43  ;;  %v3380_v47 = vadd.f32 %v4918_v6, %v2120_v45  ;;  %v2648_v48 = vpop.f32.mrb[46].mxu0  ;;  %v2122_v49 = vpop.f32.mrb[47].mxu1 }
 0x258   :  { %v3265_v50 = vpop.f32.mrb[47].mxu0 }
 0x259   :  { %v2809_v51 = vmax.f32 %v3379_v46, 0.0  ;;  %v3381_v52 = vadd.f32 %v3380_v47, %v2648_v48 }
 0x25b   :  { %2866 = vst [vmem:[%s5167_s3 + $0xb0] sm:$0xff] %v2809_v51  ;;  %v2810_v53 = vmax.f32 %v3381_v52, 0.0 }
 0x25c   :  { %v2125_v54 = vpop.f32.mrb[48].mxu1 }
 0x25d   :  { %2867 = vst [vmem:[%s5167_s3 + $0xb8] sm:$0xff] %v2810_v53  ;;  %v3382_v55 = vadd.f32 %v4918_v6, %v2125_v54  ;;  %v2653_v56 = vpop.f32.mrb[48].mxu0  ;;  %v2127_v57 = vpop.f32.mrb[49].mxu1 }
 0x25e   :  { %v3268_v58 = vpop.f32.mrb[49].mxu0  ;;  %v2128_v59 = vpop.f32.mrb[50].mxu1 }
 0x25f   :  { %v3383_v60 = vadd.f32 %v3382_v55, %v2653_v56  ;;  %v3384_v61 = vadd.f32 %v4918_v6, %v2128_v59  ;;  %v2656_v62 = vpop.f32.mrb[50].mxu0  ;;  %v2130_v63 = vpop.f32.mrb[51].mxu1 }
 0x260   :  { %v3269_v1 = vpop.f32.mrb[51].mxu0 }
 0x261   :  { %v2811_v2 = vmax.f32 %v3383_v60, 0.0  ;;  %v3385_v3 = vadd.f32 %v3384_v61, %v2656_v62 }
 0x263   :  { %2868 = vst [vmem:[%s5167_s3 + $0xc0] sm:$0xff] %v2811_v2  ;;  %v2812_v4 = vmax.f32 %v3385_v3, 0.0 }
 0x264   :  { %v2133_v5 = vpop.f32.mrb[52].mxu1 }
 0x265   :  { %2869 = vst [vmem:[%s5167_s3 + $0xc8] sm:$0xff] %v2812_v4  ;;  %v3386_v7 = vadd.f32 %v4918_v6, %v2133_v5  ;;  %v2661_v8 = vpop.f32.mrb[52].mxu0  ;;  %v2135_v9 = vpop.f32.mrb[53].mxu1 }
 0x266   :  { %v3272_v10 = vpop.f32.mrb[53].mxu0  ;;  %v2136_v11 = vpop.f32.mrb[54].mxu1 }
 0x267   :  { %v3387_v12 = vadd.f32 %v3386_v7, %v2661_v8  ;;  %v3388_v13 = vadd.f32 %v4918_v6, %v2136_v11  ;;  %v2664_v14 = vpop.f32.mrb[54].mxu0  ;;  %v2138_v15 = vpop.f32.mrb[55].mxu1 }
 0x268   :  { %v3273_v16 = vpop.f32.mrb[55].mxu0 }
 0x269   :  { %v2813_v17 = vmax.f32 %v3387_v12, 0.0  ;;  %v3389_v18 = vadd.f32 %v3388_v13, %v2664_v14 }
 0x26b   :  { %2870 = vst [vmem:[%s5167_s3 + $0xd0] sm:$0xff] %v2813_v17  ;;  %v2814_v19 = vmax.f32 %v3389_v18, 0.0 }
 0x26c   :  { %v2141_v20 = vpop.f32.mrb[56].mxu1 }
 0x26d   :  { %2871 = vst [vmem:[%s5167_s3 + $0xd8] sm:$0xff] %v2814_v19  ;;  %v3390_v21 = vadd.f32 %v4918_v6, %v2141_v20  ;;  %v2669_v22 = vpop.f32.mrb[56].mxu0  ;;  %v2143_v23 = vpop.f32.mrb[57].mxu1 }
 0x26e   :  { %v3276_v24 = vpop.f32.mrb[57].mxu0  ;;  %v2144_v25 = vpop.f32.mrb[58].mxu1 }
 0x26f   :  { %v3391_v26 = vadd.f32 %v3390_v21, %v2669_v22  ;;  %v3392_v27 = vadd.f32 %v4918_v6, %v2144_v25  ;;  %v2672_v28 = vpop.f32.mrb[58].mxu0  ;;  %v2146_v29 = vpop.f32.mrb[59].mxu1 }
 0x270   :  { %v3277_v30 = vpop.f32.mrb[59].mxu0 }
 0x271   :  { %v2815_v31 = vmax.f32 %v3391_v26, 0.0  ;;  %v3393_v32 = vadd.f32 %v3392_v27, %v2672_v28 }
 0x273   :  { %2872 = vst [vmem:[%s5167_s3 + $0xe0] sm:$0xff] %v2815_v31  ;;  %v2816_v33 = vmax.f32 %v3393_v32, 0.0 }
 0x274   :  { %v2149_v34 = vpop.f32.mrb[60].mxu1 }
 0x275   :  { %2873 = vst [vmem:[%s5167_s3 + $0xe8] sm:$0xff] %v2816_v33  ;;  %v3394_v40 = vadd.f32 %v4918_v6, %v2149_v34  ;;  %v2677_v35 = vpop.f32.mrb[60].mxu0  ;;  %v2151_v36 = vpop.f32.mrb[61].mxu1 }
 0x276   :  { %v3280_v37 = vpop.f32.mrb[61].mxu0  ;;  %v2152_v38 = vpop.f32.mrb[62].mxu1 }
 0x277   :  { %v3395_v39 = vadd.f32 %v3394_v40, %v2677_v35  ;;  %v3396_v41 = vadd.f32 %v4918_v6, %v2152_v38  ;;  %v2680_v42 = vpop.f32.mrb[62].mxu0  ;;  %v2154_v43 = vpop.f32.mrb[63].mxu1 }
 0x278   :  { %v3281_v0 = vpop.f32.mrb[63].mxu0 }
 0x279   :  { %v2817_v44 = vmax.f32 %v3395_v39, 0.0  ;;  %v3397_v45 = vadd.f32 %v3396_v41, %v2680_v42 }
 0x27b   :  { %2874 = vst [vmem:[%s5167_s3 + $0xf0] sm:$0xff] %v2817_v44  ;;  %v2818_v46 = vmax.f32 %v3397_v45, 0.0 }
 0x27c   :  { %v2157_v47 = vpop.f32.mrb[64].mxu1 }
 0x27d   :  { %2875 = vst [vmem:[%s5167_s3 + $0xf8] sm:$0xff] %v2818_v46  ;;  %v3398_v48 = vadd.f32 %v4918_v6, %v2157_v47  ;;  %v2685_v49 = vpop.f32.mrb[64].mxu0  ;;  %v2159_v50 = vpop.f32.mrb[65].mxu1 }
 0x27e   :  { %v3284_v51 = vpop.f32.mrb[65].mxu0  ;;  %v2160_v52 = vpop.f32.mrb[66].mxu1 }
 0x27f   :  { %v3399_v53 = vadd.f32 %v3398_v48, %v2685_v49  ;;  %v3400_v54 = vadd.f32 %v4918_v6, %v2160_v52  ;;  %v2688_v55 = vpop.f32.mrb[66].mxu0  ;;  %v2162_v56 = vpop.f32.mrb[67].mxu1 }
 0x280   :  { %v3285_v57 = vpop.f32.mrb[67].mxu0 }
 0x281   :  { %v2819_v58 = vmax.f32 %v3399_v53, 0.0  ;;  %v3401_v59 = vadd.f32 %v3400_v54, %v2688_v55 }
 0x283   :  { %2876 = vst [vmem:[%s5167_s3 + $0x100] sm:$0xff] %v2819_v58  ;;  %v2820_v60 = vmax.f32 %v3401_v59, 0.0 }
 0x284   :  { %v2165_v61 = vpop.f32.mrb[68].mxu1 }
 0x285   :  { %2877 = vst [vmem:[%s5167_s3 + $0x108] sm:$0xff] %v2820_v60  ;;  %v3402_v62 = vadd.f32 %v4918_v6, %v2165_v61  ;;  %v2693_v63 = vpop.f32.mrb[68].mxu0  ;;  %v2167_v1 = vpop.f32.mrb[69].mxu1 }
 0x286   :  { %v3288_v2 = vpop.f32.mrb[69].mxu0  ;;  %v2168_v3 = vpop.f32.mrb[70].mxu1 }
 0x287   :  { %v3403_v4 = vadd.f32 %v3402_v62, %v2693_v63  ;;  %v3404_v5 = vadd.f32 %v4918_v6, %v2168_v3  ;;  %v2696_v7 = vpop.f32.mrb[70].mxu0  ;;  %v2170_v8 = vpop.f32.mrb[71].mxu1 }
 0x288   :  { %v3289_v9 = vpop.f32.mrb[71].mxu0 }
 0x289   :  { %v2821_v10 = vmax.f32 %v3403_v4, 0.0  ;;  %v3405_v11 = vadd.f32 %v3404_v5, %v2696_v7 }
 0x28b   :  { %2878 = vst [vmem:[%s5167_s3 + $0x110] sm:$0xff] %v2821_v10  ;;  %v2822_v12 = vmax.f32 %v3405_v11, 0.0 }
 0x28c   :  { %v2173_v13 = vpop.f32.mrb[72].mxu1 }
 0x28d   :  { %2879 = vst [vmem:[%s5167_s3 + $0x118] sm:$0xff] %v2822_v12  ;;  %v3406_v14 = vadd.f32 %v4918_v6, %v2173_v13  ;;  %v2701_v15 = vpop.f32.mrb[72].mxu0  ;;  %v2175_v16 = vpop.f32.mrb[73].mxu1 }
 0x28e   :  { %v3292_v17 = vpop.f32.mrb[73].mxu0  ;;  %v2176_v18 = vpop.f32.mrb[74].mxu1 }
 0x28f   :  { %v3407_v19 = vadd.f32 %v3406_v14, %v2701_v15  ;;  %v3408_v20 = vadd.f32 %v4918_v6, %v2176_v18  ;;  %v2704_v21 = vpop.f32.mrb[74].mxu0  ;;  %v2178_v22 = vpop.f32.mrb[75].mxu1 }
 0x290   :  { %v3293_v23 = vpop.f32.mrb[75].mxu0 }
 0x291   :  { %v2823_v24 = vmax.f32 %v3407_v19, 0.0  ;;  %v3409_v25 = vadd.f32 %v3408_v20, %v2704_v21 }
 0x293   :  { %2880 = vst [vmem:[%s5167_s3 + $0x120] sm:$0xff] %v2823_v24  ;;  %v2824_v26 = vmax.f32 %v3409_v25, 0.0 }
 0x294   :  { %v2181_v27 = vpop.f32.mrb[76].mxu1 }
 0x295   :  { %2881 = vst [vmem:[%s5167_s3 + $0x128] sm:$0xff] %v2824_v26  ;;  %v3410_v28 = vadd.f32 %v4918_v6, %v2181_v27  ;;  %v2709_v29 = vpop.f32.mrb[76].mxu0  ;;  %v2183_v30 = vpop.f32.mrb[77].mxu1 }
 0x296   :  { %v3296_v31 = vpop.f32.mrb[77].mxu0  ;;  %v2184_v32 = vpop.f32.mrb[78].mxu1 }
 0x297   :  { %v3411_v33 = vadd.f32 %v3410_v28, %v2709_v29  ;;  %v3412_v34 = vadd.f32 %v4918_v6, %v2184_v32  ;;  %v2712_v40 = vpop.f32.mrb[78].mxu0  ;;  %v2186_v35 = vpop.f32.mrb[79].mxu1 }
 0x298   :  { %v3297_v36 = vpop.f32.mrb[79].mxu0 }
 0x299   :  { %v2825_v37 = vmax.f32 %v3411_v33, 0.0  ;;  %v3413_v38 = vadd.f32 %v3412_v34, %v2712_v40 }
 0x29b   :  { %2882 = vst [vmem:[%s5167_s3 + $0x130] sm:$0xff] %v2825_v37  ;;  %v2826_v39 = vmax.f32 %v3413_v38, 0.0 }
 0x29c   :  { %v2189_v41 = vpop.f32.mrb[80].mxu1 }
 0x29d   :  { %2883 = vst [vmem:[%s5167_s3 + $0x138] sm:$0xff] %v2826_v39  ;;  %v3414_v42 = vadd.f32 %v4918_v6, %v2189_v41  ;;  %v2717_v43 = vpop.f32.mrb[80].mxu0  ;;  %v2191_v0 = vpop.f32.mrb[81].mxu1 }
 0x29e   :  { %v3300_v44 = vpop.f32.mrb[81].mxu0  ;;  %v2192_v45 = vpop.f32.mrb[82].mxu1 }
 0x29f   :  { %v3415_v46 = vadd.f32 %v3414_v42, %v2717_v43  ;;  %v3416_v47 = vadd.f32 %v4918_v6, %v2192_v45  ;;  %v2720_v48 = vpop.f32.mrb[82].mxu0  ;;  %v2194_v49 = vpop.f32.mrb[83].mxu1 }
 0x2a0   :  { %v3301_v50 = vpop.f32.mrb[83].mxu0 }
 0x2a1   :  { %v2827_v51 = vmax.f32 %v3415_v46, 0.0  ;;  %v3417_v52 = vadd.f32 %v3416_v47, %v2720_v48 }
 0x2a3   :  { %2884 = vst [vmem:[%s5167_s3 + $0x140] sm:$0xff] %v2827_v51  ;;  %v2828_v53 = vmax.f32 %v3417_v52, 0.0 }
 0x2a4   :  { %v2197_v54 = vpop.f32.mrb[84].mxu1 }
 0x2a5   :  { %2885 = vst [vmem:[%s5167_s3 + $0x148] sm:$0xff] %v2828_v53  ;;  %v3418_v55 = vadd.f32 %v4918_v6, %v2197_v54  ;;  %v2725_v56 = vpop.f32.mrb[84].mxu0  ;;  %v2199_v57 = vpop.f32.mrb[85].mxu1 }
 0x2a6   :  { %v3304_v58 = vpop.f32.mrb[85].mxu0  ;;  %v2200_v59 = vpop.f32.mrb[86].mxu1 }
 0x2a7   :  { %v3419_v60 = vadd.f32 %v3418_v55, %v2725_v56  ;;  %v3420_v61 = vadd.f32 %v4918_v6, %v2200_v59  ;;  %v2728_v62 = vpop.f32.mrb[86].mxu0  ;;  %v2202_v63 = vpop.f32.mrb[87].mxu1 }
 0x2a8   :  { %v3305_v1 = vpop.f32.mrb[87].mxu0 }
 0x2a9   :  { %v2829_v2 = vmax.f32 %v3419_v60, 0.0  ;;  %v3421_v3 = vadd.f32 %v3420_v61, %v2728_v62 }
 0x2ab   :  { %2886 = vst [vmem:[%s5167_s3 + $0x150] sm:$0xff] %v2829_v2  ;;  %v2830_v4 = vmax.f32 %v3421_v3, 0.0 }
 0x2ac   :  { %v2205_v5 = vpop.f32.mrb[88].mxu1 }
 0x2ad   :  { %2887 = vst [vmem:[%s5167_s3 + $0x158] sm:$0xff] %v2830_v4  ;;  %v3422_v7 = vadd.f32 %v4918_v6, %v2205_v5  ;;  %v2733_v8 = vpop.f32.mrb[88].mxu0  ;;  %v2207_v9 = vpop.f32.mrb[89].mxu1 }
 0x2ae   :  { %v3308_v10 = vpop.f32.mrb[89].mxu0  ;;  %v2208_v11 = vpop.f32.mrb[90].mxu1 }
 0x2af   :  { %v3423_v12 = vadd.f32 %v3422_v7, %v2733_v8  ;;  %v3424_v13 = vadd.f32 %v4918_v6, %v2208_v11  ;;  %v2736_v14 = vpop.f32.mrb[90].mxu0  ;;  %v2210_v15 = vpop.f32.mrb[91].mxu1 }
 0x2b0   :  { %v3309_v16 = vpop.f32.mrb[91].mxu0 }
 0x2b1   :  { %v2831_v17 = vmax.f32 %v3423_v12, 0.0  ;;  %v3425_v18 = vadd.f32 %v3424_v13, %v2736_v14 }
 0x2b3   :  { %2888 = vst [vmem:[%s5167_s3 + $0x160] sm:$0xff] %v2831_v17  ;;  %v2832_v19 = vmax.f32 %v3425_v18, 0.0 }
 0x2b4   :  { %v2213_v20 = vpop.f32.mrb[92].mxu1 }
 0x2b5   :  { %2889 = vst [vmem:[%s5167_s3 + $0x168] sm:$0xff] %v2832_v19  ;;  %v3426_v21 = vadd.f32 %v4918_v6, %v2213_v20  ;;  %v2741_v22 = vpop.f32.mrb[92].mxu0  ;;  %v2215_v23 = vpop.f32.mrb[93].mxu1 }
 0x2b6   :  { %v3312_v24 = vpop.f32.mrb[93].mxu0  ;;  %v2216_v25 = vpop.f32.mrb[94].mxu1 }
 0x2b7   :  { %v3427_v26 = vadd.f32 %v3426_v21, %v2741_v22  ;;  %v3428_v27 = vadd.f32 %v4918_v6, %v2216_v25  ;;  %v2744_v28 = vpop.f32.mrb[94].mxu0  ;;  %v2218_v29 = vpop.f32.mrb[95].mxu1 }
 0x2b8   :  { %v3313_v30 = vpop.f32.mrb[95].mxu0 }
 0x2b9   :  { %v2833_v31 = vmax.f32 %v3427_v26, 0.0  ;;  %v3429_v32 = vadd.f32 %v3428_v27, %v2744_v28 }
 0x2bb   :  { %2890 = vst [vmem:[%s5167_s3 + $0x170] sm:$0xff] %v2833_v31  ;;  %v2834_v33 = vmax.f32 %v3429_v32, 0.0 }
 0x2bc   :  { %v2221_v34 = vpop.f32.mrb[96].mxu1 }
 0x2bd   :  { %2891 = vst [vmem:[%s5167_s3 + $0x178] sm:$0xff] %v2834_v33  ;;  %v3430_v40 = vadd.f32 %v4918_v6, %v2221_v34  ;;  %v2749_v35 = vpop.f32.mrb[96].mxu0  ;;  %v2223_v36 = vpop.f32.mrb[97].mxu1 }
 0x2be   :  { %v3316_v37 = vpop.f32.mrb[97].mxu0  ;;  %v2224_v38 = vpop.f32.mrb[98].mxu1 }
 0x2bf   :  { %v3431_v39 = vadd.f32 %v3430_v40, %v2749_v35  ;;  %v3432_v41 = vadd.f32 %v4918_v6, %v2224_v38  ;;  %v2752_v42 = vpop.f32.mrb[98].mxu0  ;;  %v2226_v43 = vpop.f32.mrb[99].mxu1 }
 0x2c0   :  { %v3317_v0 = vpop.f32.mrb[99].mxu0 }
 0x2c1   :  { %v2835_v44 = vmax.f32 %v3431_v39, 0.0  ;;  %v3433_v45 = vadd.f32 %v3432_v41, %v2752_v42 }
 0x2c3   :  { %2892 = vst [vmem:[%s5167_s3 + $0x180] sm:$0xff] %v2835_v44  ;;  %v2836_v46 = vmax.f32 %v3433_v45, 0.0 }
 0x2c4   :  { %v2229_v47 = vpop.f32.mrb[100].mxu1 }
 0x2c5   :  { %2893 = vst [vmem:[%s5167_s3 + $0x188] sm:$0xff] %v2836_v46  ;;  %v3434_v48 = vadd.f32 %v4918_v6, %v2229_v47  ;;  %v2757_v49 = vpop.f32.mrb[100].mxu0  ;;  %v2231_v50 = vpop.f32.mrb[101].mxu1 }
 0x2c6   :  { %v3320_v51 = vpop.f32.mrb[101].mxu0  ;;  %v2232_v52 = vpop.f32.mrb[102].mxu1 }
 0x2c7   :  { %v3435_v53 = vadd.f32 %v3434_v48, %v2757_v49  ;;  %v3436_v54 = vadd.f32 %v4918_v6, %v2232_v52  ;;  %v2760_v55 = vpop.f32.mrb[102].mxu0  ;;  %v2234_v56 = vpop.f32.mrb[103].mxu1 }
 0x2c8   :  { %v3321_v57 = vpop.f32.mrb[103].mxu0 }
 0x2c9   :  { %v2837_v58 = vmax.f32 %v3435_v53, 0.0  ;;  %v3437_v59 = vadd.f32 %v3436_v54, %v2760_v55 }
 0x2cb   :  { %2894 = vst [vmem:[%s5167_s3 + $0x190] sm:$0xff] %v2837_v58  ;;  %v2838_v60 = vmax.f32 %v3437_v59, 0.0 }
 0x2cc   :  { %v2237_v61 = vpop.f32.mrb[104].mxu1 }
 0x2cd   :  { %2895 = vst [vmem:[%s5167_s3 + $0x198] sm:$0xff] %v2838_v60  ;;  %v3438_v62 = vadd.f32 %v4918_v6, %v2237_v61  ;;  %v2765_v63 = vpop.f32.mrb[104].mxu0  ;;  %v2239_v1 = vpop.f32.mrb[105].mxu1 }
 0x2ce   :  { %v3324_v2 = vpop.f32.mrb[105].mxu0  ;;  %v2240_v3 = vpop.f32.mrb[106].mxu1 }
 0x2cf   :  { %v3439_v4 = vadd.f32 %v3438_v62, %v2765_v63  ;;  %v3440_v5 = vadd.f32 %v4918_v6, %v2240_v3  ;;  %v2768_v7 = vpop.f32.mrb[106].mxu0  ;;  %v2242_v8 = vpop.f32.mrb[107].mxu1 }
 0x2d0   :  { %v3325_v9 = vpop.f32.mrb[107].mxu0 }
 0x2d1   :  { %v2839_v10 = vmax.f32 %v3439_v4, 0.0  ;;  %v3441_v11 = vadd.f32 %v3440_v5, %v2768_v7 }
 0x2d3   :  { %2896 = vst [vmem:[%s5167_s3 + $0x1a0] sm:$0xff] %v2839_v10  ;;  %v2840_v12 = vmax.f32 %v3441_v11, 0.0 }
 0x2d4   :  { %v2245_v13 = vpop.f32.mrb[108].mxu1 }
 0x2d5   :  { %2897 = vst [vmem:[%s5167_s3 + $0x1a8] sm:$0xff] %v2840_v12  ;;  %v3442_v14 = vadd.f32 %v4918_v6, %v2245_v13  ;;  %v2773_v15 = vpop.f32.mrb[108].mxu0  ;;  %v2247_v16 = vpop.f32.mrb[109].mxu1 }
 0x2d6   :  { %v3328_v17 = vpop.f32.mrb[109].mxu0  ;;  %v2248_v18 = vpop.f32.mrb[110].mxu1 }
 0x2d7   :  { %v3443_v19 = vadd.f32 %v3442_v14, %v2773_v15  ;;  %v3444_v20 = vadd.f32 %v4918_v6, %v2248_v18  ;;  %v2776_v21 = vpop.f32.mrb[110].mxu0  ;;  %v2250_v22 = vpop.f32.mrb[111].mxu1 }
 0x2d8   :  { %v3329_v23 = vpop.f32.mrb[111].mxu0 }
 0x2d9   :  { %v2841_v24 = vmax.f32 %v3443_v19, 0.0  ;;  %v3445_v25 = vadd.f32 %v3444_v20, %v2776_v21 }
 0x2db   :  { %2898 = vst [vmem:[%s5167_s3 + $0x1b0] sm:$0xff] %v2841_v24  ;;  %v2842_v26 = vmax.f32 %v3445_v25, 0.0 }
 0x2dc   :  { %v2253_v27 = vpop.f32.mrb[112].mxu1 }
 0x2dd   :  { %2899 = vst [vmem:[%s5167_s3 + $0x1b8] sm:$0xff] %v2842_v26  ;;  %v3446_v28 = vadd.f32 %v4918_v6, %v2253_v27  ;;  %v2781_v29 = vpop.f32.mrb[112].mxu0  ;;  %v2255_v30 = vpop.f32.mrb[113].mxu1 }
 0x2de   :  { %v3332_v31 = vpop.f32.mrb[113].mxu0  ;;  %v2256_v32 = vpop.f32.mrb[114].mxu1 }
 0x2df   :  { %v3447_v33 = vadd.f32 %v3446_v28, %v2781_v29  ;;  %v2784_v34 = vpop.f32.mrb[114].mxu0  ;;  %v2257_v40 = vpop.f32.mrb[115].mxu1 }
 0x2e0   :  { %v3333_v35 = vpop.f32.mrb[115].mxu0 }
 0x2e1   :  { %v2843_v36 = vmax.f32 %v3447_v33, 0.0 }
 0x2e3   :  { %2900 = vst [vmem:[%s5167_s3 + $0x1c0] sm:$0xff] %v2843_v36 }

// kernel: cnnh_forward.10
= control target key start
LH: loop header
LB: loop body
LE: loop exit
PB: predicated region body
PF: predicated region fallthrough
CT: control target
= control target key end

     0   :  { %s478_s0 = inlined_call_operand.vmem [shape: f32[9,64,128], index: 0, kind: input, shape index: {}]   ;;  %s479_s1 = inlined_call_operand.vmem [shape: f32[64,128], index: 1, kind: output, shape index: {}]  }
   0x1   :  { %v8_v0 = vld [vmem:[%s478_s0] sm:$0xff]  ;;  %v9_v6 = vld [vmem:[%s478_s0 + $0x8] sm:$0xff]  ;;  %v10_v15 = vld [vmem:[%s478_s0 + $0x10] sm:$0xff] }
   0x2   :  { %v164_v1 = vld [vmem:[%s478_s0 + $0x40] sm:$0xff]  ;;  %v165_v7 = vld [vmem:[%s478_s0 + $0x48] sm:$0xff]  ;;  %v166_v16 = vld [vmem:[%s478_s0 + $0x50] sm:$0xff] }
   0x3   :  { %v172_v2 = vld [vmem:[%s478_s0 + $0x80] sm:$0xff]  ;;  %v25_v3 = vmax.f32 %v8_v0, %v164_v1  ;;  %v173_v8 = vld [vmem:[%s478_s0 + $0x88] sm:$0xff]  ;;  %v26_v10 = vmax.f32 %v9_v6, %v165_v7  ;;  %v174_v17 = vld [vmem:[%s478_s0 + $0x90] sm:$0xff]  ;;  %v27_v20 = vmax.f32 %v10_v15, %v166_v16 }
   0x4   :  { %v180_v4 = vld [vmem:[%s478_s0 + $0xc0] sm:$0xff]  ;;  %v181_v13 = vld [vmem:[%s478_s0 + $0xc8] sm:$0xff]  ;;  %v182_v24 = vld [vmem:[%s478_s0 + $0xd0] sm:$0xff] }
   0x5   :  { %v42_v5 = vmax.f32 %v25_v3, %v172_v2  ;;  %v188_v9 = vld [vmem:[%s478_s0 + $0x100] sm:$0xff]  ;;  %v43_v14 = vmax.f32 %v26_v10, %v173_v8  ;;  %v189_v19 = vld [vmem:[%s478_s0 + $0x108] sm:$0xff]  ;;  %v44_v26 = vmax.f32 %v27_v20, %v174_v17  ;;  %v11_v27 = vld [vmem:[%s478_s0 + $0x18] sm:$0xff] }
   0x6   :  { %v196_v12 = vld [vmem:[%s478_s0 + $0x140] sm:$0xff]  ;;  %v197_v23 = vld [vmem:[%s478_s0 + $0x148] sm:$0xff]  ;;  %v167_v28 = vld [vmem:[%s478_s0 + $0x58] sm:$0xff] }
   0x7   :  { %v59_v11 = vmax.f32 %v42_v5, %v180_v4  ;;  %v204_v21 = vld [vmem:[%s478_s0 + $0x180] sm:$0xff]  ;;  %v60_v22 = vmax.f32 %v43_v14, %v181_v13  ;;  %v175_v29 = vld [vmem:[%s478_s0 + $0x98] sm:$0xff]  ;;  %v190_v33 = vld [vmem:[%s478_s0 + $0x110] sm:$0xff]  ;;  %v28_v34 = vmax.f32 %v11_v27, %v167_v28  ;;  %v61_v37 = vmax.f32 %v44_v26, %v182_v24 }
   0x8   :  { %v212_v30 = vld [vmem:[%s478_s0 + $0x1c0] sm:$0xff]  ;;  %v205_v36 = vld [vmem:[%s478_s0 + $0x188] sm:$0xff]  ;;  %v198_v38 = vld [vmem:[%s478_s0 + $0x150] sm:$0xff] }
   0x9   :  { %v76_v18 = vmax.f32 %v59_v11, %v188_v9  ;;  %v220_v31 = vld [vmem:[%s478_s0 + $0x200] sm:$0xff]  ;;  %v77_v32 = vmax.f32 %v60_v22, %v189_v19  ;;  %v183_v39 = vld [vmem:[%s478_s0 + $0xd8] sm:$0xff]  ;;  %v45_v41 = vmax.f32 %v28_v34, %v175_v29  ;;  %v213_v46 = vld [vmem:[%s478_s0 + $0x1c8] sm:$0xff]  ;;  %v78_v48 = vmax.f32 %v61_v37, %v190_v33 }
   0xa   :  { %v12_v42 = vld [vmem:[%s478_s0 + $0x20] sm:$0xff]  ;;  %v221_v47 = vld [vmem:[%s478_s0 + $0x208] sm:$0xff]  ;;  %v191_v49 = vld [vmem:[%s478_s0 + $0x118] sm:$0xff] }
   0xb   :  { %v93_v25 = vmax.f32 %v76_v18, %v196_v12  ;;  %v94_v40 = vmax.f32 %v77_v32, %v197_v23  ;;  %v168_v43 = vld [vmem:[%s478_s0 + $0x60] sm:$0xff]  ;;  %v206_v52 = vld [vmem:[%s478_s0 + $0x190] sm:$0xff]  ;;  %v62_v53 = vmax.f32 %v45_v41, %v183_v39  ;;  %v199_v54 = vld [vmem:[%s478_s0 + $0x158] sm:$0xff]  ;;  %v95_v57 = vmax.f32 %v78_v48, %v198_v38 }
   0xc   :  { %v176_v44 = vld [vmem:[%s478_s0 + $0xa0] sm:$0xff]  ;;  %v29_v50 = vmax.f32 %v12_v42, %v168_v43  ;;  %v13_v59 = vld [vmem:[%s478_s0 + $0x28] sm:$0xff]  ;;  %v214_v63 = vld [vmem:[%s478_s0 + $0x1d0] sm:$0xff] }
   0xd   :  { %v110_v35 = vmax.f32 %v93_v25, %v204_v21  ;;  %v111_v51 = vmax.f32 %v94_v40, %v205_v36  ;;  %v184_v55 = vld [vmem:[%s478_s0 + $0xe0] sm:$0xff]  ;;  %v169_v60 = vld [vmem:[%s478_s0 + $0x68] sm:$0xff]  ;;  %v222_v0 = vld [vmem:[%s478_s0 + $0x210] sm:$0xff]  ;;  %v79_v1 = vmax.f32 %v62_v53, %v191_v49  ;;  %v112_v4 = vmax.f32 %v95_v57, %v206_v52 }
   0xe   :  { %v46_v58 = vmax.f32 %v29_v50, %v176_v44  ;;  %v177_v61 = vld [vmem:[%s478_s0 + $0xa8] sm:$0xff]  ;;  %v192_v2 = vld [vmem:[%s478_s0 + $0x120] sm:$0xff]  ;;  %v30_v3 = vmax.f32 %v13_v59, %v169_v60  ;;  %v207_v5 = vld [vmem:[%s478_s0 + $0x198] sm:$0xff] }
   0xf   :  { %v127_v45 = vmax.f32 %v110_v35, %v212_v30  ;;  %v128_v62 = vmax.f32 %v111_v51, %v213_v46  ;;  %v200_v7 = vld [vmem:[%s478_s0 + $0x160] sm:$0xff]  ;;  %v185_v8 = vld [vmem:[%s478_s0 + $0xe8] sm:$0xff]  ;;  %v96_v10 = vmax.f32 %v79_v1, %v199_v54  ;;  %v14_v12 = vld [vmem:[%s478_s0 + $0x30] sm:$0xff]  ;;  %v129_v15 = vmax.f32 %v112_v4, %v214_v63 }
  0x10   :  { %v63_v6 = vmax.f32 %v46_v58, %v184_v55  ;;  %v47_v11 = vmax.f32 %v30_v3, %v177_v61  ;;  %v170_v13 = vld [vmem:[%s478_s0 + $0x70] sm:$0xff]  ;;  %v215_v16 = vld [vmem:[%s478_s0 + $0x1d8] sm:$0xff]  ;;  %v193_v19 = vld [vmem:[%s478_s0 + $0x128] sm:$0xff] }
  0x11   :  { %v144_v56 = vmax.f32 %v127_v45, %v220_v31  ;;  %v145_v9 = vmax.f32 %v128_v62, %v221_v47  ;;  %v178_v14 = vld [vmem:[%s478_s0 + $0xb0] sm:$0xff]  ;;  %v223_v17 = vld [vmem:[%s478_s0 + $0x218] sm:$0xff]  ;;  %v31_v20 = vmax.f32 %v14_v12, %v170_v13  ;;  %v113_v21 = vmax.f32 %v96_v10, %v207_v5  ;;  %v208_v22 = vld [vmem:[%s478_s0 + $0x1a0] sm:$0xff] }
  0x12   :  { %v80_v18 = vmax.f32 %v63_v6, %v192_v2  ;;  %v64_v23 = vmax.f32 %v47_v11, %v185_v8  ;;  %v201_v24 = vld [vmem:[%s478_s0 + $0x168] sm:$0xff]  ;;  %v186_v25 = vld [vmem:[%s478_s0 + $0xf0] sm:$0xff]  ;;  %v146_v26 = vmax.f32 %v129_v15, %v222_v0  ;;  %v15_v29 = vld [vmem:[%s478_s0 + $0x38] sm:$0xff] }
  0x13   :  { %152 = vst [vmem:[%s479_s1] sm:$0xff] %v144_v56  ;;  %153 = vst [vmem:[%s479_s1 + $0x8] sm:$0xff] %v145_v9  ;;  %v48_v28 = vmax.f32 %v31_v20, %v178_v14  ;;  %v171_v30 = vld [vmem:[%s478_s0 + $0x78] sm:$0xff]  ;;  %v130_v32 = vmax.f32 %v113_v21, %v215_v16  ;;  %v216_v33 = vld [vmem:[%s478_s0 + $0x1e0] sm:$0xff] }
  0x14   :  { %v97_v27 = vmax.f32 %v80_v18, %v200_v7  ;;  %v179_v31 = vld [vmem:[%s478_s0 + $0xb8] sm:$0xff]  ;;  %v81_v34 = vmax.f32 %v64_v23, %v193_v19  ;;  %v194_v35 = vld [vmem:[%s478_s0 + $0x130] sm:$0xff]  ;;  %v32_v36 = vmax.f32 %v15_v29, %v171_v30  ;;  %154 = vst [vmem:[%s479_s1 + $0x10] sm:$0xff] %v146_v26  ;;  %v209_v38 = vld [vmem:[%s478_s0 + $0x1a8] sm:$0xff] }
  0x15   :  { %v65_v39 = vmax.f32 %v48_v28, %v186_v25  ;;  %v187_v40 = vld [vmem:[%s478_s0 + $0xf8] sm:$0xff]  ;;  %v147_v41 = vmax.f32 %v130_v32, %v223_v17  ;;  %v224_v42 = vld [vmem:[%s478_s0 + $0x220] sm:$0xff]  ;;  %v202_v44 = vld [vmem:[%s478_s0 + $0x170] sm:$0xff] }
  0x16   :  { %v114_v37 = vmax.f32 %v97_v27, %v208_v22  ;;  %v98_v43 = vmax.f32 %v81_v34, %v201_v24  ;;  %v49_v45 = vmax.f32 %v32_v36, %v179_v31  ;;  %v217_v47 = vld [vmem:[%s478_s0 + $0x1e8] sm:$0xff]  ;;  %v195_v49 = vld [vmem:[%s478_s0 + $0x138] sm:$0xff]  ;;  %v210_v51 = vld [vmem:[%s478_s0 + $0x1b0] sm:$0xff] }
  0x17   :  { %v82_v48 = vmax.f32 %v65_v39, %v194_v35  ;;  %155 = vst [vmem:[%s479_s1 + $0x18] sm:$0xff] %v147_v41  ;;  %v225_v54 = vld [vmem:[%s478_s0 + $0x228] sm:$0xff]  ;;  %v203_v56 = vld [vmem:[%s478_s0 + $0x178] sm:$0xff]  ;;  %v218_v58 = vld [vmem:[%s478_s0 + $0x1f0] sm:$0xff] }
  0x18   :  { %v131_v46 = vmax.f32 %v114_v37, %v216_v33  ;;  %v115_v50 = vmax.f32 %v98_v43, %v209_v38  ;;  %v66_v52 = vmax.f32 %v49_v45, %v187_v40  ;;  %v211_v61 = vld [vmem:[%s478_s0 + $0x1b8] sm:$0xff]  ;;  %v226_v63 = vld [vmem:[%s478_s0 + $0x230] sm:$0xff] }
  0x19   :  { %v99_v55 = vmax.f32 %v82_v48, %v202_v44  ;;  %v219_v2 = vld [vmem:[%s478_s0 + $0x1f8] sm:$0xff] }
  0x1a   :  { %v148_v53 = vmax.f32 %v131_v46, %v224_v42  ;;  %v132_v57 = vmax.f32 %v115_v50, %v217_v47  ;;  %v83_v59 = vmax.f32 %v66_v52, %v195_v49  ;;  %v227_v5 = vld [vmem:[%s478_s0 + $0x238] sm:$0xff] }
  0x1b   :  { %v116_v60 = vmax.f32 %v99_v55, %v210_v51 }
  0x1c   :  { %156 = vst [vmem:[%s479_s1 + $0x20] sm:$0xff] %v148_v53  ;;  %v149_v62 = vmax.f32 %v132_v57, %v225_v54  ;;  %v100_v0 = vmax.f32 %v83_v59, %v203_v56 }
  0x1d   :  { %v133_v1 = vmax.f32 %v116_v60, %v218_v58 }
  0x1e   :  { %157 = vst [vmem:[%s479_s1 + $0x28] sm:$0xff] %v149_v62  ;;  %v117_v3 = vmax.f32 %v100_v0, %v211_v61 }
  0x1f   :  { %v150_v4 = vmax.f32 %v133_v1, %v226_v63 }
  0x20   :  { %v134_v6 = vmax.f32 %v117_v3, %v219_v2 }
  0x21   :  { %158 = vst [vmem:[%s479_s1 + $0x30] sm:$0xff] %v150_v4 }
  0x22   :  { %v151_v7 = vmax.f32 %v134_v6, %v227_v5 }
  0x24   :  { %159 = vst [vmem:[%s479_s1 + $0x38] sm:$0xff] %v151_v7 }

// kernel: cnnh_forward.11
= control target key start
LH: loop header
LB: loop body
LE: loop exit
PB: predicated region body
PF: predicated region fallthrough
CT: control target
= control target key end

     0   :  { %vm2886_vm0 = vmmov 0   ;;  %s3652_s1 = inlined_call_operand.vmem [shape: bf16[1664,128], index: 1, kind: input, shape index: {}]   ;;  %s3653_s0 = inlined_call_operand.vmem [shape: bf16[104,1664], index: 0, kind: input, shape index: {}]   ;;  %s3654_s2 = inlined_call_operand.vmem [shape: f32[1,128], index: 2, kind: input, shape index: {}]   ;;  %s3655_s3 = inlined_call_operand.vmem [shape: f32[104,128], index: 3, kind: output, shape index: {}]  }
   0x1   :  { %v2654_v0 = vld [vmem:[%s3652_s1 + $0x40] sm:$0xff]   ;;  %v2656_v2 = vld [vmem:[%s3652_s1 + $0x48] sm:$0xff]   ;;  %v2658_v4 = vld [vmem:[%s3652_s1 + $0x50] sm:$0xff]  }
   0x2   :  { %v2655_v1 = vld [vmem:[%s3652_s1] sm:$0xff]   ;;  %2636 = vmatprep.subr.bf16.mxu1 %v2654_v0  ;;  %2229 = vmatprep.subr.bf16.mxu0 %v2654_v0  ;;  %v2657_v3 = vld [vmem:[%s3652_s1 + $0x8] sm:$0xff]   ;;  %v2659_v5 = vld [vmem:[%s3652_s1 + $0x10] sm:$0xff]  }
   0x3   :  { %2644 = vmatpush3.bf16.msra.mxu1 %v2655_v1  ;;  %2230 = vmatpush3.bf16.msra.mxu0 %v2655_v1  ;;  %v2660_v6 = vld [vmem:[%s3652_s1 + $0x58] sm:$0xff]   ;;  %v2662_v8 = vld [vmem:[%s3652_s1 + $0x60] sm:$0xff]   ;;  %v2664_v10 = vld [vmem:[%s3652_s1 + $0x68] sm:$0xff]  }
   0x4   :  { %2637 = vmatprep.subr.bf16.mxu1 %v2656_v2  ;;  %2231 = vmatprep.subr.bf16.mxu0 %v2656_v2  ;;  %v2661_v7 = vld [vmem:[%s3652_s1 + $0x18] sm:$0xff]   ;;  %v2663_v9 = vld [vmem:[%s3652_s1 + $0x20] sm:$0xff]   ;;  %v2665_v12 = vld [vmem:[%s3652_s1 + $0x28] sm:$0xff]  }
   0x5   :  { %v2672_v11 = vld [vmem:[%s3653_s0 + $0x1a4] ss:$52 sps:$4 sm:$0xff]   ;;  %v2666_v14 = vld [vmem:[%s3652_s1 + $0x70] sm:$0xff]   ;;  %v2680_v24 = vld [vmem:[%s3652_s1 + $0xc8] sm:$0xff]  }
   0x6   :  { %v2676_v13 = vld [vmem:[%s3653_s0 + $0x4] ss:$52 sps:$4 sm:$0xff]   ;;  %1451 = vmatprep.mubr.bf16.mxu1 %v2672_v11  ;;  %v2667_v15 = vld [vmem:[%s3652_s1 + $0x30] sm:$0xff]   ;;  %v2682_v25 = vld [vmem:[%s3652_s1 + $0x148] sm:$0xff]  }
   0x7   :  { %2645 = vmatpush3.bf16.msra.mxu1 %v2657_v3  ;;  %2232 = vmatpush3.bf16.msra.mxu0 %v2657_v3  ;;  %v2668_v16 = vld [vmem:[%s3652_s1 + $0x78] sm:$0xff]   ;;  %v2673_v18 = vld [vmem:[%s3652_s1 + $0xc0] sm:$0xff]   ;;  %v2681_v27 = vld [vmem:[%s3652_s1 + $0x88] sm:$0xff]  }
   0x8   :  { %2638 = vmatprep.subr.bf16.mxu1 %v2658_v4  ;;  %2233 = vmatprep.subr.bf16.mxu0 %v2658_v4  ;;  %v2669_v17 = vld [vmem:[%s3652_s1 + $0x38] sm:$0xff]   ;;  %v2670_v19 = vld [vmem:[%s3653_s0 + $0x1a0] ss:$52 sps:$4 sm:$0xff]   ;;  %v2683_v29 = vld [vmem:[%s3652_s1 + $0x108] sm:$0xff]  }
   0x9   :  { %1419 = vmatprep.mubr.bf16.mxu0 %v2676_v13  ;;  %v2674_v20 = vld [vmem:[%s3653_s0] ss:$52 sps:$4 sm:$0xff]   ;;  %v2688_v33 = vld [vmem:[%s3653_s0 + $0x68] ss:$52 sps:$4 sm:$0xff]   ;;  %v2702_v46 = vld [vmem:[%s3653_s0 + $0xd0] ss:$52 sps:$4 sm:$0xff]  }
   0xa   :  { %v2678_v21 = vld [vmem:[%s3652_s1 + $0x140] sm:$0xff]   ;;  %v2684_v30 = vld [vmem:[%s3652_s1 + $0xd0] sm:$0xff]   ;;  %v2695_v34 = vld [vmem:[%s3653_s0 + $0x208] ss:$52 sps:$4 sm:$0xff]  }
   0xb   :  { %2646 = vmatpush3.bf16.msra.mxu1 %v2659_v5  ;;  %2234 = vmatpush3.bf16.msra.mxu0 %v2659_v5  ;;  %v2677_v22 = vld [vmem:[%s3652_s1 + $0x80] sm:$0xff]   ;;  %v2689_v31 = vld [vmem:[%s3652_s1 + $0x150] sm:$0xff]   ;;  %v2691_v36 = vld [vmem:[%s3652_s1 + $0xd8] sm:$0xff]  }
   0xc   :  { %2639 = vmatprep.subr.bf16.mxu1 %v2660_v6  ;;  %2235 = vmatprep.subr.bf16.mxu0 %v2660_v6  ;;  %v2679_v23 = vld [vmem:[%s3652_s1 + $0x100] sm:$0xff]   ;;  %v2687_v32 = vld [vmem:[%s3652_s1 + $0x90] sm:$0xff]   ;;  %v2696_v37 = vld [vmem:[%s3652_s1 + $0x158] sm:$0xff]  }
   0xd   :  { %v2685_v26 = vld [vmem:[%s3653_s0 + $0x6c] ss:$52 sps:$4 sm:$0xff]   ;;  %v2690_v35 = vld [vmem:[%s3652_s1 + $0x110] sm:$0xff]   ;;  %v2694_v38 = vld [vmem:[%s3652_s1 + $0x98] sm:$0xff]  }
   0xe   :  { %v2692_v28 = vld [vmem:[%s3653_s0 + $0x20c] ss:$52 sps:$4 sm:$0xff]   ;;  %v2699_v39 = vld [vmem:[%s3653_s0 + $0xd4] ss:$52 sps:$4 sm:$0xff]   ;;  %v2697_v40 = vld [vmem:[%s3652_s1 + $0x118] sm:$0xff]  }
   0xf   :  { %2647 = vmatpush3.bf16.msra.mxu1 %v2661_v7  ;;  %2236 = vmatpush3.bf16.msra.mxu0 %v2661_v7  ;;  %v2698_v41 = vld [vmem:[%s3652_s1 + $0xe0] sm:$0xff]   ;;  %v99_v42 = vld [vmem:[%s3653_s0 + $0x270] sm:$0xff]  ;;  %v2705_v49 = vld [vmem:[%s3652_s1 + $0xe8] sm:$0xff]  }
  0x10   :  { %2640 = vmatprep.subr.bf16.mxu1 %v2662_v8  ;;  %2237 = vmatprep.subr.bf16.mxu0 %v2662_v8  ;;  %v2703_v43 = vld [vmem:[%s3652_s1 + $0x160] sm:$0xff]   ;;  %v2113_v44 = vcombine.high %v99_v42, %v99_v42  ;;  %v2112_v48 = vcombine.low %v99_v42, %v99_v42  ;;  %v2709_v50 = vld [vmem:[%s3652_s1 + $0x168] sm:$0xff]   ;;  %v2712_v52 = vld [vmem:[%s3653_s0 + $0x13c] ss:$52 sps:$4 sm:$0xff]  }
  0x11   :  { %v2701_v45 = vld [vmem:[%s3652_s1 + $0xa0] sm:$0xff]   ;;  %v2707_v51 = vld [vmem:[%s3652_s1 + $0xa8] sm:$0xff]   ;;  %v2711_v54 = vld [vmem:[%s3652_s1 + $0xf0] sm:$0xff]  }
  0x12   :  { %v2704_v47 = vld [vmem:[%s3652_s1 + $0x120] sm:$0xff]   ;;  %v2710_v53 = vld [vmem:[%s3652_s1 + $0x128] sm:$0xff]   ;;  %v2716_v55 = vld [vmem:[%s3652_s1 + $0x170] sm:$0xff]  }
  0x13   :  { %2648 = vmatpush3.bf16.msra.mxu1 %v2663_v9  ;;  %2238 = vmatpush3.bf16.msra.mxu0 %v2663_v9  ;;  %v2714_v56 = vld [vmem:[%s3652_s1 + $0xb0] sm:$0xff]   ;;  %v2715_v57 = vld [vmem:[%s3653_s0 + $0x138] ss:$52 sps:$4 sm:$0xff]   ;;  %v2725_v0 = vld [vmem:[%s3652_s1 + $0x1c0] sm:$0xff]  }
  0x14   :  { %2641 = vmatprep.subr.bf16.mxu1 %v2664_v10  ;;  %2239 = vmatprep.subr.bf16.mxu0 %v2664_v10  ;;  %v2717_v58 = vld [vmem:[%s3652_s1 + $0x130] sm:$0xff]   ;;  %v2718_v59 = vld [vmem:[%s3652_s1 + $0xf8] sm:$0xff]   ;;  %v2723_v61 = vld [vmem:[%s3653_s0 + $0xc] ss:$52 sps:$4 sm:$0xff]  }
  0x15   :  { %v2720_v60 = vld [vmem:[%s3652_s1 + $0x178] sm:$0xff]   ;;  %v2728_v1 = vld [vmem:[%s3653_s0 + $0x14] ss:$52 sps:$4 sm:$0xff]   ;;  %v2726_v3 = vld [vmem:[%s3653_s0 + $0x10] ss:$52 sps:$4 sm:$0xff]  }
  0x16   :  { %v2719_v62 = vld [vmem:[%s3652_s1 + $0xb8] sm:$0xff]   ;;  %v2729_v4 = vld [vmem:[%s3652_s1 + $0x180] sm:$0xff]   ;;  %v2732_v7 = vld [vmem:[%s3653_s0 + $0x74] ss:$52 sps:$4 sm:$0xff]  }
  0x17   :  { %2649 = vmatpush3.bf16.msra.mxu1 %v2665_v12  ;;  %2240 = vmatpush3.bf16.msra.mxu0 %v2665_v12  ;;  %v2724_v63 = vld [vmem:[%s3652_s1 + $0x138] sm:$0xff]   ;;  %v2730_v5 = vld [vmem:[%s3652_s1 + $0x240] sm:$0xff]   ;;  %v2734_v8 = vld [vmem:[%s3652_s1 + $0x1c8] sm:$0xff]  }
  0x18   :  { %2642 = vmatprep.subr.bf16.mxu1 %v2666_v14  ;;  %2241 = vmatprep.subr.bf16.mxu0 %v2666_v14  ;;  %v2721_v2 = vld [vmem:[%s3653_s0 + $0x8] ss:$52 sps:$4 sm:$0xff]   ;;  %v2731_v6 = vld [vmem:[%s3652_s1 + $0x200] sm:$0xff]   ;;  %v2739_v12 = vld [vmem:[%s3653_s0 + $0x78] ss:$52 sps:$4 sm:$0xff]  }
  0x19   :  { %v2736_v9 = vld [vmem:[%s3652_s1 + $0x188] sm:$0xff]   ;;  %v2737_v10 = vld [vmem:[%s3653_s0 + $0x7c] ss:$52 sps:$4 sm:$0xff]  }
  0x1a   :  { %v2735_v11 = vld [vmem:[%s3653_s0 + $0x70] ss:$52 sps:$4 sm:$0xff]   ;;  %v2740_v13 = vld [vmem:[%s3652_s1 + $0x248] sm:$0xff]  }
  0x1b   :  { %2650 = vmatpush3.bf16.msra.mxu1 %v2667_v15  ;;  %2242 = vmatpush3.bf16.msra.mxu0 %v2667_v15  ;;  %v2741_v14 = vld [vmem:[%s3652_s1 + $0x208] sm:$0xff]   ;;  %v2742_v15 = vld [vmem:[%s3652_s1 + $0x1d0] sm:$0xff]  }
  0x1c   :  { %2643 = vmatprep.subr.bf16.mxu1 %v2668_v16  ;;  %2243 = vmatprep.subr.bf16.mxu0 %v2668_v16  ;;  %v2743_v16 = vld [vmem:[%s3653_s0 + $0xdc] ss:$52 sps:$4 sm:$0xff]   ;;  %v2777_v42 = vld [vmem:[%s3652_s1 + $0x268] sm:$0xff]  }
  0x1f   :  { %2651 = vmatpush3.bf16.msra.mxu1 %v2669_v17  ;;  %2244 = vmatpush3.bf16.msra.mxu0 %v2669_v17  ;;  %v2745_v17 = vld [vmem:[%s3652_s1 + $0x190] sm:$0xff]  }
  0x20   :  { %2287 = vmatprep.subr.bf16.mxu1 %v2673_v18  ;;  %2345 = vmatprep.subr.bf16.mxu0 %v2678_v21  ;;  %v2747_v18 = vld [vmem:[%s3653_s0 + $0xe4] ss:$52 sps:$4 sm:$0xff]   ;;  %v2749_v21 = vld [vmem:[%s3653_s0 + $0xe0] ss:$52 sps:$4 sm:$0xff]  }
  0x22   :  { %1452 = vmatmul.mubr.bf16.vlgmr.msra.gmra.mrb[0].mxu1 %v2670_v19  ;;  %1420 = vmatmul.mubr.bf16.vlgmr.msra.gmra.mrb[0].mxu0 %v2674_v20  ;;  %v2750_v19 = vld [vmem:[%s3652_s1 + $0x250] sm:$0xff]   ;;  %v2746_v20 = vld [vmem:[%s3653_s0 + $0xd8] ss:$52 sps:$4 sm:$0xff]  }
  0x23   :  { %2288 = vmatpush3.bf16.msra.mxu1 %v2677_v22  ;;  %2346 = vmatpush3.bf16.msra.mxu0 %v2679_v23  ;;  %v2751_v22 = vld [vmem:[%s3652_s1 + $0x210] sm:$0xff]   ;;  %v2752_v23 = vld [vmem:[%s3652_s1 + $0x1d8] sm:$0xff]  }
  0x24   :  { %2289 = vmatprep.subr.bf16.mxu1 %v2680_v24  ;;  %2347 = vmatprep.subr.bf16.mxu0 %v2682_v25  ;;  %v2753_v24 = vld [vmem:[%s3652_s1 + $0x198] sm:$0xff]  }
  0x25   :  { %1427 = vmatprep.mubr.bf16.mxu0 %v2685_v26  ;;  %1459 = vmatprep.mubr.bf16.mxu1 %v2692_v28  ;;  %v2754_v25 = vld [vmem:[%s3653_s0 + $0x144] ss:$52 sps:$4 sm:$0xff]   ;;  %v2757_v26 = vld [vmem:[%s3653_s0 + $0x14c] ss:$52 sps:$4 sm:$0xff]  }
  0x26   :  { %v2761_v28 = vld [vmem:[%s3652_s1 + $0x218] sm:$0xff]  }
  0x27   :  { %2290 = vmatpush3.bf16.msra.mxu1 %v2681_v27  ;;  %2348 = vmatpush3.bf16.msra.mxu0 %v2683_v29  ;;  %v2760_v27 = vld [vmem:[%s3652_s1 + $0x258] sm:$0xff]   ;;  %v2762_v29 = vld [vmem:[%s3652_s1 + $0x1e0] sm:$0xff]  }
  0x28   :  { %2291 = vmatprep.subr.bf16.mxu1 %v2684_v30  ;;  %2349 = vmatprep.subr.bf16.mxu0 %v2689_v31  ;;  %v2756_v30 = vld [vmem:[%s3653_s0 + $0x140] ss:$52 sps:$4 sm:$0xff]  }
  0x29   :  { %v2763_v31 = vld [vmem:[%s3652_s1 + $0x1a0] sm:$0xff]  }
  0x2a   :  { %1428 = vmatmul.mubr.bf16.gmra.mrb[4].mxu0 %v2688_v33  ;;  %1460 = vmatmul.mubr.bf16.gmra.mrb[4].mxu1 %v2695_v34  ;;  %v2764_v33 = vld [vmem:[%s3653_s0 + $0x1ac] ss:$52 sps:$4 sm:$0xff]   ;;  %v2767_v34 = vld [vmem:[%s3653_s0 + $0x1b4] ss:$52 sps:$4 sm:$0xff]  }
  0x2b   :  { %2292 = vmatpush3.bf16.msra.mxu1 %v2687_v32  ;;  %2350 = vmatpush3.bf16.msra.mxu0 %v2690_v35  ;;  %v2759_v32 = vld [vmem:[%s3653_s0 + $0x148] ss:$52 sps:$4 sm:$0xff]   ;;  %v2769_v35 = vld [vmem:[%s3652_s1 + $0x260] sm:$0xff]  }
  0x2c   :  { %2293 = vmatprep.subr.bf16.mxu1 %v2691_v36  ;;  %2351 = vmatprep.subr.bf16.mxu0 %v2696_v37  ;;  %v2771_v36 = vld [vmem:[%s3652_s1 + $0x220] sm:$0xff]   ;;  %v2772_v37 = vld [vmem:[%s3652_s1 + $0x1e8] sm:$0xff]  }
  0x2d   :  { %1435 = vmatprep.mubr.bf16.mxu0 %v2699_v39  ;;  %1467 = vmatprep.mubr.bf16.mxu1 %v2113_v44  ;;  %v2766_v39 = vld [vmem:[%s3653_s0 + $0x1a8] ss:$52 sps:$4 sm:$0xff]  }
  0x2e   :  { %v2780_v44 = vld [vmem:[%s3652_s1 + $0x228] sm:$0xff]  }
  0x2f   :  { %2294 = vmatpush3.bf16.msra.mxu1 %v2694_v38  ;;  %2352 = vmatpush3.bf16.msra.mxu0 %v2697_v40  ;;  %v2773_v38 = vld [vmem:[%s3652_s1 + $0x1a8] sm:$0xff]   ;;  %v2770_v40 = vld [vmem:[%s3653_s0 + $0x1b0] ss:$52 sps:$4 sm:$0xff]  }
  0x30   :  { %2295 = vmatprep.subr.bf16.mxu1 %v2698_v41  ;;  %2353 = vmatprep.subr.bf16.mxu0 %v2703_v43  ;;  %v2774_v41 = vld [vmem:[%s3653_s0 + $0x214] ss:$52 sps:$4 sm:$0xff]   ;;  %v2778_v43 = vld [vmem:[%s3653_s0 + $0x21c] ss:$52 sps:$4 sm:$0xff]  }
  0x32   :  { %1436 = vmatmul.mubr.bf16.gmra.mrb[8].mxu0 %v2702_v46  ;;  %1468 = vmatmul.mubr.bf16.gmra.mrb[8].mxu1 %v2112_v48  ;;  %v2783_v46 = vld [vmem:[%s3652_s1 + $0x1b0] sm:$0xff]  }
  0x33   :  { %2296 = vmatpush3.bf16.msra.mxu1 %v2701_v45  ;;  %2354 = vmatpush3.bf16.msra.mxu0 %v2704_v47  ;;  %v2782_v45 = vld [vmem:[%s3652_s1 + $0x1f0] sm:$0xff]   ;;  %v100_v47 = vld [vmem:[%s3653_s0 + $0x278] sm:$0xff] }
  0x34   :  { %2297 = vmatprep.subr.bf16.mxu1 %v2705_v49  ;;  %2355 = vmatprep.subr.bf16.mxu0 %v2709_v50  ;;  %v2785_v48 = vld [vmem:[%s3652_s1 + $0x270] sm:$0xff]   ;;  %v2781_v50 = vld [vmem:[%s3653_s0 + $0x218] ss:$52 sps:$4 sm:$0xff]  }
  0x35   :  { %1443 = vmatprep.mubr.bf16.mxu0 %v2712_v52  ;;  %1507 = vmatprep.mubr.bf16.mxu1 %v2723_v61  ;;  %v2776_v49 = vld [vmem:[%s3653_s0 + $0x210] ss:$52 sps:$4 sm:$0xff]   ;;  %v2114_v61 = vcombine.low %v100_v47, %v100_v47 }
  0x36   :  { %v101_v52 = vld [vmem:[%s3653_s0 + $0x280] sm:$0xff] }
  0x37   :  { %2298 = vmatpush3.bf16.msra.mxu1 %v2707_v51  ;;  %2356 = vmatpush3.bf16.msra.mxu0 %v2710_v53  ;;  %v2787_v51 = vld [vmem:[%s3652_s1 + $0x230] sm:$0xff]   ;;  %v2789_v53 = vld [vmem:[%s3652_s1 + $0x1f8] sm:$0xff]  }
  0x38   :  { %2299 = vmatprep.subr.bf16.mxu1 %v2711_v54  ;;  %2357 = vmatprep.subr.bf16.mxu0 %v2716_v55  ;;  %v2791_v54 = vld [vmem:[%s3652_s1 + $0x1b8] sm:$0xff]   ;;  %v2115_v55 = vcombine.high %v100_v47, %v100_v47 }
  0x39   :  { %v2847_v47 = vld [vmem:[%s3653_s0 + $0x228] ss:$52 sps:$4 sm:$0xff]  }
  0x3a   :  { %1444 = vmatmul.mubr.bf16.gmra.mrb[12].mxu0 %v2715_v57  ;;  %v2792_v57 = vld [vmem:[%s3652_s1 + $0x278] sm:$0xff]  }
  0x3b   :  { %2300 = vmatpush3.bf16.msra.mxu1 %v2714_v56  ;;  %2358 = vmatpush3.bf16.msra.mxu0 %v2717_v58  ;;  %v2117_v56 = vcombine.high %v101_v52, %v101_v52  ;;  %v2796_v58 = vld [vmem:[%s3652_s1 + $0x238] sm:$0xff]  }
  0x3c   :  { %2301 = vmatprep.subr.bf16.mxu1 %v2718_v59  ;;  %2359 = vmatprep.subr.bf16.mxu0 %v2720_v60  ;;  %v2797_v59 = vld [vmem:[%s3652_s1 + $0x2c0] sm:$0xff]   ;;  %v2885_v60 = vmov 0.0  }
  0x3d   :  { %1595 = vmatprep.mubr.bf16.mxu0 %v2728_v1  ;;  %v2793_v1 = vld [vmem:[%s3653_s0 + $0x18] ss:$52 sps:$4 sm:$0xff]  }
  0x3f   :  { %2302 = vmatpush3.bf16.msra.mxu1 %v2719_v62  ;;  %2360 = vmatpush3.bf16.msra.mxu0 %v2724_v63  ;;  %v2116_v62 = vcombine.low %v101_v52, %v101_v52  ;;  %v2795_v63 = vld [vmem:[%s3653_s0 + $0x1c] ss:$52 sps:$4 sm:$0xff]   ;;  %v2859_v52 = vld [vmem:[%s3653_s0 + $0x2c] ss:$52 sps:$4 sm:$0xff]  }
  0x40   :  { %2403 = vmatprep.subr.bf16.mxu1 %v2725_v0  ;;  %2461 = vmatprep.subr.bf16.mxu0 %v2730_v5  ;;  %v2800_v0 = vld [vmem:[%s3653_s0 + $0x24] ss:$52 sps:$4 sm:$0xff]  }
  0x41   :  { %v2803_v5 = vld [vmem:[%s3653_s0 + $0x84] ss:$52 sps:$4 sm:$0xff]  }
  0x42   :  { %1508 = vmatmul.mubr.bf16.vlgmr.msra.gmra.mrb[12].mxu1 %v2721_v2  ;;  %1596 = vmatmul.mubr.bf16.vlgmr.msra.gmra.mrb[16].mxu0 %v2726_v3  ;;  %v2798_v2 = vld [vmem:[%s3653_s0 + $0x20] ss:$52 sps:$4 sm:$0xff]  }
  0x43   :  { %2404 = vmatpush3.bf16.msra.mxu1 %v2729_v4  ;;  %2462 = vmatpush3.bf16.msra.mxu0 %v2731_v6  ;;  %v2801_v3 = vld [vmem:[%s3652_s1 + $0x280] sm:$0xff]   ;;  %v2805_v6 = vld [vmem:[%s3652_s1 + $0x2c8] sm:$0xff]  }
  0x44   :  { %1515 = vmatprep.mubr.bf16.mxu1 %v2732_v7  ;;  %2405 = vmatprep.subr.bf16.mxu1 %v2734_v8  ;;  %v2802_v4 = vld [vmem:[%s3652_s1 + $0x300] sm:$0xff]   ;;  %v2807_v8 = vld [vmem:[%s3652_s1 + $0x288] sm:$0xff]  }
  0x45   :  { %1603 = vmatprep.mubr.bf16.mxu0 %v2737_v10  ;;  %2463 = vmatprep.subr.bf16.mxu0 %v2740_v13  ;;  %v2808_v7 = vld [vmem:[%s3653_s0 + $0x8c] ss:$52 sps:$4 sm:$0xff]  }
  0x46   :  { %v2806_v10 = vld [vmem:[%s3653_s0 + $0x80] ss:$52 sps:$4 sm:$0xff]  }
  0x47   :  { %2406 = vmatpush3.bf16.msra.mxu1 %v2736_v9  ;;  %2464 = vmatpush3.bf16.msra.mxu0 %v2741_v14  ;;  %v2811_v9 = vld [vmem:[%s3652_s1 + $0x308] sm:$0xff]   ;;  %v2815_v14 = vld [vmem:[%s3652_s1 + $0x290] sm:$0xff]  }
  0x48   :  { %2407 = vmatprep.subr.bf16.mxu1 %v2742_v15  ;;  %2465 = vmatprep.subr.bf16.mxu0 %v2750_v19  ;;  %v2813_v13 = vld [vmem:[%s3653_s0 + $0xec] ss:$52 sps:$4 sm:$0xff]   ;;  %v2817_v15 = vld [vmem:[%s3653_s0 + $0xf4] ss:$52 sps:$4 sm:$0xff]   ;;  %v2829_v19 = vld [vmem:[%s3652_s1 + $0x318] sm:$0xff]  }
  0x4a   :  { %1516 = vmatmul.mubr.bf16.gmra.mrb[16].mxu1 %v2735_v11  ;;  %1604 = vmatmul.mubr.bf16.gmra.mrb[20].mxu0 %v2739_v12  ;;  %v2812_v11 = vld [vmem:[%s3652_s1 + $0x2d0] sm:$0xff]   ;;  %v2810_v12 = vld [vmem:[%s3653_s0 + $0x88] ss:$52 sps:$4 sm:$0xff]  }
  0x4b   :  { %1523 = vmatprep.mubr.bf16.mxu1 %v2743_v16  ;;  %2408 = vmatpush3.bf16.msra.mxu1 %v2745_v17  ;;  %v2820_v16 = vld [vmem:[%s3652_s1 + $0x310] sm:$0xff]   ;;  %v2821_v17 = vld [vmem:[%s3652_s1 + $0x2d8] sm:$0xff]  }
  0x4c   :  { %1611 = vmatprep.mubr.bf16.mxu0 %v2747_v18  ;;  %2466 = vmatpush3.bf16.msra.mxu0 %v2751_v22  ;;  %v2822_v18 = vld [vmem:[%s3652_s1 + $0x298] sm:$0xff]   ;;  %v2819_v22 = vld [vmem:[%s3653_s0 + $0xf0] ss:$52 sps:$4 sm:$0xff]  }
  0x4d   :  { %2409 = vmatprep.subr.bf16.mxu1 %v2752_v23  ;;  %2467 = vmatprep.subr.bf16.mxu0 %v2760_v27  ;;  %v2823_v23 = vld [vmem:[%s3653_s0 + $0x154] ss:$52 sps:$4 sm:$0xff]  }
  0x4e   :  { %v2839_v27 = vld [vmem:[%s3652_s1 + $0x2e8] sm:$0xff]  }
  0x4f   :  { %2410 = vmatpush3.bf16.msra.mxu1 %v2753_v24  ;;  %v2826_v24 = vld [vmem:[%s3653_s0 + $0x15c] ss:$52 sps:$4 sm:$0xff]  }
  0x50   :  { %2468 = vmatpush3.bf16.msra.mxu0 %v2761_v28  ;;  %2411 = vmatprep.subr.bf16.mxu1 %v2762_v29  ;;  %v2840_v28 = vld [vmem:[%s3652_s1 + $0x2a8] sm:$0xff]   ;;  %v2825_v29 = vld [vmem:[%s3653_s0 + $0x150] ss:$52 sps:$4 sm:$0xff]  }
  0x51   :  { %2469 = vmatprep.subr.bf16.mxu0 %v2769_v35  ;;  %v2849_v35 = vld [vmem:[%s3652_s1 + $0x2b0] sm:$0xff]  }
  0x52   :  { %1524 = vmatmul.mubr.bf16.gmra.mrb[20].mxu1 %v2746_v20  ;;  %1612 = vmatmul.mubr.bf16.gmra.mrb[24].mxu0 %v2749_v21  ;;  %v2816_v20 = vld [vmem:[%s3653_s0 + $0xe8] ss:$52 sps:$4 sm:$0xff]   ;;  %v2830_v21 = vld [vmem:[%s3652_s1 + $0x2e0] sm:$0xff]  }
  0x53   :  { %1531 = vmatprep.mubr.bf16.mxu1 %v2754_v25  ;;  %1619 = vmatprep.mubr.bf16.mxu0 %v2757_v26  ;;  %v2831_v25 = vld [vmem:[%s3652_s1 + $0x2a0] sm:$0xff]  }
  0x54   :  { %2412 = vmatpush3.bf16.msra.mxu1 %v2763_v31  ;;  %2470 = vmatpush3.bf16.msra.mxu0 %v2771_v36  ;;  %v2838_v26 = vld [vmem:[%s3652_s1 + $0x320] sm:$0xff]   ;;  %v2846_v31 = vld [vmem:[%s3652_s1 + $0x328] sm:$0xff]   ;;  %v2852_v36 = vld [vmem:[%s3652_s1 + $0x330] sm:$0xff]  }
  0x55   :  { %2413 = vmatprep.subr.bf16.mxu1 %v2772_v37  ;;  %2471 = vmatprep.subr.bf16.mxu0 %v2777_v42  ;;  %v2854_v37 = vld [vmem:[%s3652_s1 + $0x2f8] sm:$0xff]  }
  0x56   :  { %v2841_v42 = vld [vmem:[%s3653_s0 + $0x224] ss:$52 sps:$4 sm:$0xff]  }
  0x58   :  { %2414 = vmatpush3.bf16.msra.mxu1 %v2773_v38  ;;  %2472 = vmatpush3.bf16.msra.mxu0 %v2780_v44  ;;  %v2856_v38 = vld [vmem:[%s3652_s1 + $0x2b8] sm:$0xff]   ;;  %v102_v44 = vld [vmem:[%s3653_s0 + $0x288] sm:$0xff] }
  0x59   :  { %2415 = vmatprep.subr.bf16.mxu1 %v2782_v45  ;;  %2473 = vmatprep.subr.bf16.mxu0 %v2785_v48  ;;  %v103_v45 = vld [vmem:[%s3653_s0 + $0x290] sm:$0xff]  ;;  %v2119_v48 = vcombine.high %v102_v44, %v102_v44 }
  0x5a   :  { %1532 = vmatmul.mubr.bf16.gmra.mrb[24].mxu1 %v2756_v30  ;;  %1620 = vmatmul.mubr.bf16.gmra.mrb[28].mxu0 %v2759_v32  ;;  %v2828_v30 = vld [vmem:[%s3653_s0 + $0x158] ss:$52 sps:$4 sm:$0xff]   ;;  %v2848_v32 = vld [vmem:[%s3652_s1 + $0x2f0] sm:$0xff]  }
  0x5b   :  { %1539 = vmatprep.mubr.bf16.mxu1 %v2764_v33  ;;  %1627 = vmatprep.mubr.bf16.mxu0 %v2767_v34  ;;  %v2832_v33 = vld [vmem:[%s3653_s0 + $0x1bc] ss:$52 sps:$4 sm:$0xff]   ;;  %v2835_v34 = vld [vmem:[%s3653_s0 + $0x1c4] ss:$52 sps:$4 sm:$0xff]  }
  0x5c   :  { %2416 = vmatpush3.bf16.msra.mxu1 %v2783_v46  ;;  %2474 = vmatpush3.bf16.msra.mxu0 %v2787_v51  ;;  %v2843_v46 = vld [vmem:[%s3653_s0 + $0x220] ss:$52 sps:$4 sm:$0xff]   ;;  %v2120_v51 = vcombine.low %v103_v45, %v103_v45 }
  0x5d   :  { %2417 = vmatprep.subr.bf16.mxu1 %v2789_v53  ;;  %2475 = vmatprep.subr.bf16.mxu0 %v2792_v57  ;;  %v2857_v53 = vld [vmem:[%s3653_s0 + $0x28] ss:$52 sps:$4 sm:$0xff]   ;;  %v2865_v57 = vld [vmem:[%s3653_s0 + $0x98] ss:$52 sps:$4 sm:$0xff]  }
  0x60   :  { %2418 = vmatpush3.bf16.msra.mxu1 %v2791_v54  ;;  %2476 = vmatpush3.bf16.msra.mxu0 %v2796_v58  ;;  %v2861_v54 = vld [vmem:[%s3653_s0 + $0x30] ss:$52 sps:$4 sm:$0xff]  }
  0x61   :  { %2519 = vmatprep.subr.bf16.mxu1 %v2797_v59  ;;  %2592 = vmatprep.subr.bf16.mxu0 %v2885_v60  ;;  %v2866_v58 = vld [vmem:[%s3653_s0 + $0xfc] ss:$52 sps:$4 sm:$0xff]   ;;  %v2868_v59 = vld [vmem:[%s3653_s0 + $0xf8] ss:$52 sps:$4 sm:$0xff]  }
  0x62   :  { %1540 = vmatmul.mubr.bf16.gmra.mrb[28].mxu1 %v2766_v39  ;;  %1628 = vmatmul.mubr.bf16.gmra.mrb[32].mxu0 %v2770_v40  ;;  %v2860_v39 = vld [vmem:[%s3652_s1 + $0x338] sm:$0xff]  }
  0x63   :  { %1547 = vmatprep.mubr.bf16.mxu1 %v2774_v41  ;;  %1635 = vmatprep.mubr.bf16.mxu0 %v2778_v43  ;;  %v2834_v40 = vld [vmem:[%s3653_s0 + $0x1b8] ss:$52 sps:$4 sm:$0xff]   ;;  %v2837_v41 = vld [vmem:[%s3653_s0 + $0x1c0] ss:$52 sps:$4 sm:$0xff]  }
  0x64   :  { %v2844_v43 = vld [vmem:[%s3653_s0 + $0x22c] ss:$52 sps:$4 sm:$0xff]  }
  0x6a   :  { %1548 = vmatmul.mubr.bf16.gmra.mrb[32].mxu1 %v2776_v49  ;;  %1636 = vmatmul.mubr.bf16.gmra.mrb[36].mxu0 %v2781_v50  ;;  %v2121_v49 = vcombine.high %v103_v45, %v103_v45  ;;  %v2118_v50 = vcombine.low %v102_v44, %v102_v44 }
  0x6b   :  { %1555 = vmatprep.mubr.bf16.mxu1 %v2115_v55  ;;  %1643 = vmatprep.mubr.bf16.mxu0 %v2117_v56  ;;  %v2862_v55 = vld [vmem:[%s3653_s0 + $0x94] ss:$52 sps:$4 sm:$0xff]   ;;  %v2864_v56 = vld [vmem:[%s3653_s0 + $0x90] ss:$52 sps:$4 sm:$0xff]  }
  0x72   :  { %1556 = vmatmul.mubr.bf16.gmra.mrb[36].mxu1 %v2114_v61  ;;  %1644 = vmatmul.mubr.bf16.gmra.mrb[40].mxu0 %v2116_v62  ;;  %v2869_v61 = vld [vmem:[%s3653_s0 + $0x100] ss:$52 sps:$4 sm:$0xff]   ;;  %v2870_v62 = vld [vmem:[%s3653_s0 + $0x164] ss:$52 sps:$4 sm:$0xff]  }
  0x73   :  { %1683 = vmatprep.mubr.bf16.mxu1 %v2795_v63  ;;  %1771 = vmatprep.mubr.bf16.mxu0 %v2800_v0  ;;  %v2872_v63 = vld [vmem:[%s3653_s0 + $0x160] ss:$52 sps:$4 sm:$0xff]   ;;  %v2873_v0 = vld [vmem:[%s3653_s0 + $0x168] ss:$52 sps:$4 sm:$0xff]  }
  0x7a   :  { %1684 = vmatmul.mubr.bf16.vlgmr.msra.gmra.mrb[40].mxu1 %v2793_v1  ;;  %1772 = vmatmul.mubr.bf16.vlgmr.msra.gmra.mrb[44].mxu0 %v2798_v2  ;;  %v2874_v1 = vld [vmem:[%s3653_s0 + $0x1cc] ss:$52 sps:$4 sm:$0xff]   ;;  %v2876_v2 = vld [vmem:[%s3653_s0 + $0x1c8] ss:$52 sps:$4 sm:$0xff]  }
  0x7b   :  { %2520 = vmatpush3.bf16.msra.mxu1 %v2801_v3  ;;  %2593 = vmatpush3.bf16.msra.mxu0 %v2802_v4  ;;  %v2877_v3 = vld [vmem:[%s3653_s0 + $0x1d0] ss:$52 sps:$4 sm:$0xff]   ;;  %v2878_v4 = vld [vmem:[%s3653_s0 + $0x234] ss:$52 sps:$4 sm:$0xff]  }
  0x7c   :  { %1691 = vmatprep.mubr.bf16.mxu1 %v2803_v5  ;;  %2521 = vmatprep.subr.bf16.mxu1 %v2805_v6  ;;  %v104_v5 = vld [vmem:[%s3653_s0 + $0x298] sm:$0xff]  ;;  %v2880_v6 = vld [vmem:[%s3653_s0 + $0x230] ss:$52 sps:$4 sm:$0xff]  }
  0x7d   :  { %1779 = vmatprep.mubr.bf16.mxu0 %v2808_v7  ;;  %2594 = vmatprep.subr.bf16.mxu0 %v2885_v60  ;;  %v2881_v7 = vld [vmem:[%s3653_s0 + $0x238] ss:$52 sps:$4 sm:$0xff]  }
  0x7f   :  { %2522 = vmatpush3.bf16.msra.mxu1 %v2807_v8  ;;  %2595 = vmatpush3.bf16.msra.mxu0 %v2811_v9  ;;  %v2123_v8 = vcombine.high %v104_v5, %v104_v5  ;;  %v2122_v9 = vcombine.low %v104_v5, %v104_v5 }
  0x80   :  { %2523 = vmatprep.subr.bf16.mxu1 %v2812_v11  ;;  %2596 = vmatprep.subr.bf16.mxu0 %v2885_v60 }
  0x82   :  { %1692 = vmatmul.mubr.bf16.gmra.mrb[44].mxu1 %v2806_v10  ;;  %1780 = vmatmul.mubr.bf16.gmra.mrb[48].mxu0 %v2810_v12  ;;  %v2884_v10 = vld [vmem:[%s3653_s0 + $0x2a0] ss:$0 sps:$4 sm:$0xff]  }
  0x83   :  { %1699 = vmatprep.mubr.bf16.mxu1 %v2813_v13  ;;  %2524 = vmatpush3.bf16.msra.mxu1 %v2815_v14 }
  0x84   :  { %1787 = vmatprep.mubr.bf16.mxu0 %v2817_v15  ;;  %2597 = vmatpush3.bf16.msra.mxu0 %v2820_v16 }
  0x85   :  { %2525 = vmatprep.subr.bf16.mxu1 %v2821_v17  ;;  %2598 = vmatprep.subr.bf16.mxu0 %v2885_v60 }
  0x87   :  { %2526 = vmatpush3.bf16.msra.mxu1 %v2822_v18 }
  0x88   :  { %2599 = vmatpush3.bf16.msra.mxu0 %v2829_v19  ;;  %2527 = vmatprep.subr.bf16.mxu1 %v2830_v21 }
  0x89   :  { %2600 = vmatprep.subr.bf16.mxu0 %v2885_v60 }
  0x8a   :  { %1700 = vmatmul.mubr.bf16.gmra.mrb[48].mxu1 %v2816_v20  ;;  %1788 = vmatmul.mubr.bf16.gmra.mrb[52].mxu0 %v2819_v22 }
  0x8b   :  { %1707 = vmatprep.mubr.bf16.mxu1 %v2823_v23  ;;  %1795 = vmatprep.mubr.bf16.mxu0 %v2826_v24 }
  0x8c   :  { %2528 = vmatpush3.bf16.msra.mxu1 %v2831_v25  ;;  %2601 = vmatpush3.bf16.msra.mxu0 %v2838_v26 }
  0x8d   :  { %2529 = vmatprep.subr.bf16.mxu1 %v2839_v27  ;;  %2602 = vmatprep.subr.bf16.mxu0 %v2885_v60 }
  0x90   :  { %2530 = vmatpush3.bf16.msra.mxu1 %v2840_v28  ;;  %2603 = vmatpush3.bf16.msra.mxu0 %v2846_v31 }
  0x91   :  { %2531 = vmatprep.subr.bf16.mxu1 %v2848_v32  ;;  %2604 = vmatprep.subr.bf16.mxu0 %v2885_v60 }
  0x92   :  { %1708 = vmatmul.mubr.bf16.gmra.mrb[52].mxu1 %v2825_v29  ;;  %1796 = vmatmul.mubr.bf16.gmra.mrb[56].mxu0 %v2828_v30 }
  0x93   :  { %1715 = vmatprep.mubr.bf16.mxu1 %v2832_v33  ;;  %1803 = vmatprep.mubr.bf16.mxu0 %v2835_v34 }
  0x94   :  { %2532 = vmatpush3.bf16.msra.mxu1 %v2849_v35  ;;  %2605 = vmatpush3.bf16.msra.mxu0 %v2852_v36 }
  0x95   :  { %2533 = vmatprep.subr.bf16.mxu1 %v2854_v37  ;;  %2606 = vmatprep.subr.bf16.mxu0 %v2885_v60 }
  0x98   :  { %2534 = vmatpush3.bf16.msra.mxu1 %v2856_v38  ;;  %2607 = vmatpush3.bf16.msra.mxu0 %v2860_v39 }
  0x9a   :  { %1716 = vmatmul.mubr.bf16.gmra.mrb[56].mxu1 %v2834_v40  ;;  %1804 = vmatmul.mubr.bf16.gmra.mrb[60].mxu0 %v2837_v41 }
  0x9b   :  { %1723 = vmatprep.mubr.bf16.mxu1 %v2841_v42  ;;  %1811 = vmatprep.mubr.bf16.mxu0 %v2844_v43 }
  0xa2   :  { %1724 = vmatmul.mubr.bf16.gmra.mrb[60].mxu1 %v2843_v46  ;;  %1812 = vmatmul.mubr.bf16.gmra.mrb[64].mxu0 %v2847_v47 }
  0xa3   :  { %1731 = vmatprep.mubr.bf16.mxu1 %v2119_v48  ;;  %1819 = vmatprep.mubr.bf16.mxu0 %v2121_v49 }
  0xaa   :  { %1732 = vmatmul.mubr.bf16.gmra.mrb[64].mxu1 %v2118_v50  ;;  %1820 = vmatmul.mubr.bf16.gmra.mrb[68].mxu0 %v2120_v51 }
  0xab   :  { %1859 = vmatprep.mubr.bf16.mxu1 %v2859_v52  ;;  %2608 = vmatprep.mubr.msk.bf16.mxu0 %vm2886_vm0, %v2885_v60 }
  0xb2   :  { %1860 = vmatmul.mubr.bf16.vlgmr.msra.gmra.mrb[68].mxu1 %v2857_v53  ;;  %2609 = vmatmul.mubr.bf16.vlgmr.msra.gmra.mrb[72].mxu0 %v2861_v54  ;;  %v3513_v53 = vld [vmem:[%s3654_s2] ss:$0 sm:$0xff] }
  0xb3   :  { %1867 = vmatprep.mubr.bf16.mxu1 %v2862_v55  ;;  %2612 = vmatprep.mubr.msk.bf16.mxu0 %vm2886_vm0, %v2885_v60 }
  0xba   :  { %1868 = vmatmul.mubr.bf16.gmra.mrb[72].mxu1 %v2864_v56  ;;  %2613 = vmatmul.mubr.bf16.gmra.mrb[76].mxu0 %v2865_v57 }
  0xbb   :  { %1875 = vmatprep.mubr.bf16.mxu1 %v2866_v58  ;;  %2616 = vmatprep.mubr.msk.bf16.mxu0 %vm2886_vm0, %v2885_v60 }
  0xc2   :  { %1876 = vmatmul.mubr.bf16.gmra.mrb[76].mxu1 %v2868_v59  ;;  %2617 = vmatmul.mubr.bf16.gmra.mrb[80].mxu0 %v2869_v61 }
  0xc3   :  { %1883 = vmatprep.mubr.bf16.mxu1 %v2870_v62  ;;  %2620 = vmatprep.mubr.msk.bf16.mxu0 %vm2886_vm0, %v2885_v60 }
  0xca   :  { %1884 = vmatmul.mubr.bf16.gmra.mrb[80].mxu1 %v2872_v63  ;;  %2621 = vmatmul.mubr.bf16.gmra.mrb[84].mxu0 %v2873_v0 }
  0xcb   :  { %1891 = vmatprep.mubr.bf16.mxu1 %v2874_v1  ;;  %2624 = vmatprep.mubr.msk.bf16.mxu0 %vm2886_vm0, %v2885_v60 }
  0xd2   :  { %1892 = vmatmul.mubr.bf16.gmra.mrb[84].mxu1 %v2876_v2  ;;  %2625 = vmatmul.mubr.bf16.gmra.mrb[88].mxu0 %v2877_v3 }
  0xd3   :  { %1899 = vmatprep.mubr.bf16.mxu1 %v2878_v4  ;;  %2628 = vmatprep.mubr.msk.bf16.mxu0 %vm2886_vm0, %v2885_v60 }
  0xda   :  { %1900 = vmatmul.mubr.bf16.gmra.mrb[88].mxu1 %v2880_v6  ;;  %2629 = vmatmul.mubr.bf16.gmra.mrb[92].mxu0 %v2881_v7 }
  0xdb   :  { %1907 = vmatprep.mubr.bf16.mxu1 %v2123_v8  ;;  %2632 = vmatprep.mubr.msk.bf16.mxu0 %vm2886_vm0, %v2885_v60 }
  0xe2   :  { %1908 = vmatmul.mubr.bf16.gmra.mrb[92].mxu1 %v2122_v9  ;;  %2633 = vmatmul.mubr.bf16.gmra.mrb[96].mxu0 %v2884_v10 }
  0xf5   :  { %v2269_v11 = vpop.f32.mrb[0].mxu1  ;;  %v2245_v12 = vpop.f32.mrb[0].mxu0 }
  0xf6   :  { %v2270_v13 = vpop.f32.mrb[1].mxu1  ;;  %v2246_v14 = vpop.f32.mrb[1].mxu0 }
  0xf7   :  { %v3496_v15 = vadd.f32 %v2270_v13, %v2269_v11  ;;  %v2272_v16 = vpop.f32.mrb[2].mxu1  ;;  %v2247_v17 = vadd.f32 %v2246_v14, %v2245_v12  ;;  %v2248_v18 = vpop.f32.mrb[2].mxu0 }
  0xf8   :  { %v2273_v19 = vpop.f32.mrb[3].mxu1  ;;  %v2249_v20 = vpop.f32.mrb[3].mxu0 }
  0xf9   :  { %v3498_v21 = vadd.f32 %v2273_v19, %v2272_v16  ;;  %v2250_v60 = vadd.f32 %v2249_v20, %v2248_v18  ;;  %v1422_v56 = vadd.f32 %v2247_v17, %v3513_v53 }
  0xfb   :  { %v1425_v0 = vadd.f32 %v2250_v60, %v3513_v53 }
  0xfd   :  { %v2251_v22 = vpop.f32.mrb[4].mxu0  ;;  %v2275_v23 = vpop.f32.mrb[4].mxu1 }
  0xfe   :  { %v2252_v24 = vpop.f32.mrb[5].mxu0  ;;  %v2276_v25 = vpop.f32.mrb[5].mxu1 }
  0xff   :  { %v2253_v26 = vadd.f32 %v2252_v24, %v2251_v22  ;;  %v2254_v27 = vpop.f32.mrb[6].mxu0  ;;  %v3500_v28 = vadd.f32 %v2276_v25, %v2275_v23  ;;  %v2278_v29 = vpop.f32.mrb[6].mxu1 }
 0x100   :  { %v2255_v30 = vpop.f32.mrb[7].mxu0  ;;  %v2279_v31 = vpop.f32.mrb[7].mxu1 }
 0x101   :  { %v2256_v32 = vadd.f32 %v2255_v30, %v2254_v27  ;;  %v3502_v33 = vadd.f32 %v2279_v31, %v2278_v29  ;;  %v1430_v11 = vadd.f32 %v2253_v26, %v3513_v53 }
 0x103   :  { %v1433_v19 = vadd.f32 %v2256_v32, %v3513_v53 }
 0x105   :  { %v2257_v34 = vpop.f32.mrb[8].mxu0  ;;  %v2281_v35 = vpop.f32.mrb[8].mxu1 }
 0x106   :  { %v2258_v36 = vpop.f32.mrb[9].mxu0  ;;  %v2282_v37 = vpop.f32.mrb[9].mxu1 }
 0x107   :  { %v2259_v38 = vadd.f32 %v2258_v36, %v2257_v34  ;;  %v2260_v39 = vpop.f32.mrb[10].mxu0  ;;  %v3504_v40 = vadd.f32 %v2282_v37, %v2281_v35  ;;  %v2284_v41 = vpop.f32.mrb[10].mxu1 }
 0x108   :  { %v2261_v42 = vpop.f32.mrb[11].mxu0  ;;  %v2285_v43 = vpop.f32.mrb[11].mxu1 }
 0x109   :  { %v2262_v44 = vadd.f32 %v2261_v42, %v2260_v39  ;;  %v1438_v31 = vadd.f32 %v2259_v38, %v3513_v53 }
 0x10b   :  { %v1441_v41 = vadd.f32 %v2262_v44, %v3513_v53 }
 0x10d   :  { %v2263_v45 = vpop.f32.mrb[12].mxu0 }
 0x10e   :  { %v2264_v46 = vpop.f32.mrb[13].mxu0 }
 0x10f   :  { %v3506_v47 = vadd.f32 %v2264_v46, %v2263_v45  ;;  %v2266_v48 = vpop.f32.mrb[14].mxu0 }
 0x110   :  { %v2267_v49 = vpop.f32.mrb[15].mxu0 }
 0x111   :  { %v3508_v50 = vadd.f32 %v2267_v49, %v2266_v48 }
 0x115   :  { %v2303_v51 = vpop.f32.mrb[12].mxu1  ;;  %v2361_v52 = vpop.f32.mrb[16].mxu0 }
 0x116   :  { %v2304_v54 = vpop.f32.mrb[13].mxu1  ;;  %v2362_v55 = vpop.f32.mrb[17].mxu0 }
 0x117   :  { %v2305_v57 = vadd.f32 %v2304_v54, %v2303_v51  ;;  %v2306_v58 = vpop.f32.mrb[14].mxu1  ;;  %v2363_v59 = vadd.f32 %v2362_v55, %v2361_v52  ;;  %v2364_v61 = vpop.f32.mrb[18].mxu0  ;;  %v1446_v55 = vadd.f32 %v3506_v47, %v3513_v53 }
 0x118   :  { %v2307_v62 = vpop.f32.mrb[15].mxu1  ;;  %v2365_v63 = vpop.f32.mrb[19].mxu0 }
 0x119   :  { %v1510_v1 = vadd.f32 %v2305_v57, %v1422_v56  ;;  %v2308_v2 = vadd.f32 %v2307_v62, %v2306_v58  ;;  %v2366_v3 = vadd.f32 %v2365_v63, %v2364_v61  ;;  %v1449_v62 = vadd.f32 %v3508_v50, %v3513_v53 }
 0x11b   :  { %v1513_v4 = vadd.f32 %v2308_v2, %v1425_v0  ;;  %v3517_v5 = vadd.f32 %v2363_v59, %v1510_v1 }
 0x11d   :  { %v3519_v6 = vadd.f32 %v2366_v3, %v1513_v4  ;;  %v2309_v7 = vpop.f32.mrb[16].mxu1  ;;  %v2367_v8 = vpop.f32.mrb[20].mxu0 }
 0x11e   :  { %v2310_v9 = vpop.f32.mrb[17].mxu1  ;;  %v2368_v10 = vpop.f32.mrb[21].mxu0 }
 0x11f   :  { %v2311_v12 = vadd.f32 %v2310_v9, %v2309_v7  ;;  %v2312_v13 = vpop.f32.mrb[18].mxu1  ;;  %v2369_v14 = vadd.f32 %v2368_v10, %v2367_v8  ;;  %v2370_v16 = vpop.f32.mrb[22].mxu0  ;;  %v1454_v10 = vadd.f32 %v3496_v15, %v3513_v53 }
 0x120   :  { %v2313_v17 = vpop.f32.mrb[19].mxu1  ;;  %v2371_v18 = vpop.f32.mrb[23].mxu0 }
 0x121   :  { %v1518_v20 = vadd.f32 %v2311_v12, %v1430_v11  ;;  %v2314_v60 = vadd.f32 %v2313_v17, %v2312_v13  ;;  %v2372_v22 = vadd.f32 %v2371_v18, %v2370_v16  ;;  %v1457_v17 = vadd.f32 %v3498_v21, %v3513_v53 }
 0x123   :  { %v1521_v23 = vadd.f32 %v2314_v60, %v1433_v19  ;;  %v3523_v24 = vadd.f32 %v2369_v14, %v1518_v20 }
 0x125   :  { %v3525_v25 = vadd.f32 %v2372_v22, %v1521_v23  ;;  %v2315_v27 = vpop.f32.mrb[20].mxu1  ;;  %v2373_v29 = vpop.f32.mrb[24].mxu0 }
 0x126   :  { %v2316_v30 = vpop.f32.mrb[21].mxu1  ;;  %v2374_v26 = vpop.f32.mrb[25].mxu0 }
 0x127   :  { %v2317_v34 = vadd.f32 %v2316_v30, %v2315_v27  ;;  %v2318_v35 = vpop.f32.mrb[22].mxu1  ;;  %v2375_v36 = vadd.f32 %v2374_v26, %v2373_v29  ;;  %v2376_v37 = vpop.f32.mrb[26].mxu0  ;;  %v1462_v26 = vadd.f32 %v3500_v28, %v3513_v53 }
 0x128   :  { %v2319_v39 = vpop.f32.mrb[23].mxu1  ;;  %v2377_v32 = vpop.f32.mrb[27].mxu0 }
 0x129   :  { %v1526_v42 = vadd.f32 %v2317_v34, %v1438_v31  ;;  %v2320_v43 = vadd.f32 %v2319_v39, %v2318_v35  ;;  %v2378_v45 = vadd.f32 %v2377_v32, %v2376_v37  ;;  %v1465_v39 = vadd.f32 %v3502_v33, %v3513_v53 }
 0x12b   :  { %v1529_v46 = vadd.f32 %v2320_v43, %v1441_v41  ;;  %v3529_v48 = vadd.f32 %v2375_v36, %v1526_v42 }
 0x12d   :  { %v3531_v49 = vadd.f32 %v2378_v45, %v1529_v46  ;;  %v2321_v51 = vpop.f32.mrb[24].mxu1  ;;  %v2379_v52 = vpop.f32.mrb[28].mxu0 }
 0x12e   :  { %v2322_v54 = vpop.f32.mrb[25].mxu1  ;;  %v2380_v38 = vpop.f32.mrb[29].mxu0 }
 0x12f   :  { %v2323_v56 = vadd.f32 %v2322_v54, %v2321_v51  ;;  %v2324_v57 = vpop.f32.mrb[26].mxu1  ;;  %v2381_v58 = vadd.f32 %v2380_v38, %v2379_v52  ;;  %v2382_v59 = vpop.f32.mrb[30].mxu0  ;;  %v1470_v38 = vadd.f32 %v3504_v40, %v3513_v53 }
 0x130   :  { %v2325_v44 = vpop.f32.mrb[27].mxu1  ;;  %v2383_v61 = vpop.f32.mrb[31].mxu0 }
 0x131   :  { %v1534_v63 = vadd.f32 %v2323_v56, %v1446_v55  ;;  %v2326_v0 = vadd.f32 %v2325_v44, %v2324_v57  ;;  %v2384_v1 = vadd.f32 %v2383_v61, %v2382_v59 }
 0x133   :  { %v1537_v2 = vadd.f32 %v2326_v0, %v1449_v62  ;;  %v3537_v3 = vadd.f32 %v2381_v58, %v1534_v63 }
 0x135   :  { %v3539_v4 = vadd.f32 %v2384_v1, %v1537_v2  ;;  %v2327_v7 = vpop.f32.mrb[28].mxu1  ;;  %v2385_v8 = vpop.f32.mrb[32].mxu0 }
 0x136   :  { %v2328_v47 = vpop.f32.mrb[29].mxu1  ;;  %v2386_v9 = vpop.f32.mrb[33].mxu0 }
 0x137   :  { %v2329_v11 = vadd.f32 %v2328_v47, %v2327_v7  ;;  %v2330_v12 = vpop.f32.mrb[30].mxu1  ;;  %v2387_v13 = vadd.f32 %v2386_v9, %v2385_v8  ;;  %v2388_v14 = vpop.f32.mrb[34].mxu0 }
 0x138   :  { %v2331_v50 = vpop.f32.mrb[31].mxu1  ;;  %v2389_v16 = vpop.f32.mrb[35].mxu0 }
 0x139   :  { %v1542_v18 = vadd.f32 %v2329_v11, %v1454_v10  ;;  %v2332_v19 = vadd.f32 %v2331_v50, %v2330_v12  ;;  %v2390_v20 = vadd.f32 %v2389_v16, %v2388_v14 }
 0x13b   :  { %v1545_v60 = vadd.f32 %v2332_v19, %v1457_v17  ;;  %v3545_v22 = vadd.f32 %v2387_v13, %v1542_v18 }
 0x13d   :  { %v3547_v23 = vadd.f32 %v2390_v20, %v1545_v60  ;;  %v2333_v27 = vpop.f32.mrb[32].mxu1  ;;  %v2391_v29 = vpop.f32.mrb[36].mxu0 }
 0x13e   :  { %v2334_v15 = vpop.f32.mrb[33].mxu1  ;;  %v2392_v30 = vpop.f32.mrb[37].mxu0 }
 0x13f   :  { %v2335_v31 = vadd.f32 %v2334_v15, %v2333_v27  ;;  %v2336_v34 = vpop.f32.mrb[34].mxu1  ;;  %v2393_v35 = vadd.f32 %v2392_v30, %v2391_v29  ;;  %v2394_v36 = vpop.f32.mrb[38].mxu0 }
 0x140   :  { %v2337_v21 = vpop.f32.mrb[35].mxu1  ;;  %v2395_v37 = vpop.f32.mrb[39].mxu0 }
 0x141   :  { %v1550_v32 = vadd.f32 %v2335_v31, %v1462_v26  ;;  %v2338_v41 = vadd.f32 %v2337_v21, %v2336_v34  ;;  %v2396_v42 = vadd.f32 %v2395_v37, %v2394_v36 }
 0x143   :  { %v1553_v43 = vadd.f32 %v2338_v41, %v1465_v39  ;;  %v3553_v45 = vadd.f32 %v2393_v35, %v1550_v32 }
 0x145   :  { %v3555_v46 = vadd.f32 %v2396_v42, %v1553_v43  ;;  %v2339_v51 = vpop.f32.mrb[36].mxu1  ;;  %v2397_v52 = vpop.f32.mrb[40].mxu0 }
 0x146   :  { %v2340_v28 = vpop.f32.mrb[37].mxu1  ;;  %v2398_v54 = vpop.f32.mrb[41].mxu0 }
 0x147   :  { %v2341_v55 = vadd.f32 %v2340_v28, %v2339_v51  ;;  %v2342_v56 = vpop.f32.mrb[38].mxu1  ;;  %v2399_v57 = vadd.f32 %v2398_v54, %v2397_v52  ;;  %v2400_v58 = vpop.f32.mrb[42].mxu0 }
 0x148   :  { %v2343_v33 = vpop.f32.mrb[39].mxu1  ;;  %v2401_v59 = vpop.f32.mrb[43].mxu0 }
 0x149   :  { %v1558_v44 = vadd.f32 %v2341_v55, %v1470_v38 }
 0x14b   :  { %v3559_v61 = vadd.f32 %v2399_v57, %v1558_v44 }
 0x14d   :  { %v2419_v62 = vpop.f32.mrb[40].mxu1  ;;  %v2477_v63 = vpop.f32.mrb[44].mxu0 }
 0x14e   :  { %v2420_v0 = vpop.f32.mrb[41].mxu1  ;;  %v2478_v1 = vpop.f32.mrb[45].mxu0 }
 0x14f   :  { %v2421_v2 = vadd.f32 %v2420_v0, %v2419_v62  ;;  %v2422_v7 = vpop.f32.mrb[42].mxu1  ;;  %v2479_v8 = vadd.f32 %v2478_v1, %v2477_v63  ;;  %v2480_v47 = vpop.f32.mrb[46].mxu0 }
 0x150   :  { %v2423_v9 = vpop.f32.mrb[43].mxu1  ;;  %v2481_v10 = vpop.f32.mrb[47].mxu0 }
 0x151   :  { %v1686_v40 = vadd.f32 %v2421_v2, %v3517_v5  ;;  %v2424_v53 = vadd.f32 %v2423_v9, %v2422_v7  ;;  %v2482_v11 = vadd.f32 %v2481_v10, %v2480_v47 }
 0x153   :  { %v1689_v12 = vadd.f32 %v2424_v53, %v3519_v6  ;;  %v3563_v13 = vadd.f32 %v2479_v8, %v1686_v40 }
 0x155   :  { %v3565_v14 = vadd.f32 %v2482_v11, %v1689_v12  ;;  %v2425_v50 = vpop.f32.mrb[44].mxu1  ;;  %v2483_v16 = vpop.f32.mrb[48].mxu0 }
 0x156   :  { %v2426_v17 = vpop.f32.mrb[45].mxu1  ;;  %v2484_v18 = vpop.f32.mrb[49].mxu0 }
 0x157   :  { %v2427_v19 = vadd.f32 %v2426_v17, %v2425_v50  ;;  %v2428_v20 = vpop.f32.mrb[46].mxu1  ;;  %v2485_v60 = vadd.f32 %v2484_v18, %v2483_v16  ;;  %v2486_v27 = vpop.f32.mrb[50].mxu0 }
 0x158   :  { %v2429_v29 = vpop.f32.mrb[47].mxu1  ;;  %v2487_v15 = vpop.f32.mrb[51].mxu0 }
 0x159   :  { %v1694_v5 = vadd.f32 %v2427_v19, %v3523_v24  ;;  %v2430_v30 = vadd.f32 %v2429_v29, %v2428_v20  ;;  %v2488_v26 = vadd.f32 %v2487_v15, %v2486_v27 }
 0x15b   :  { %v1697_v6 = vadd.f32 %v2430_v30, %v3525_v25  ;;  %v3569_v31 = vadd.f32 %v2485_v60, %v1694_v5 }
 0x15d   :  { %v3571_v34 = vadd.f32 %v2488_v26, %v1697_v6  ;;  %v2431_v35 = vpop.f32.mrb[48].mxu1  ;;  %v2489_v36 = vpop.f32.mrb[52].mxu0 }
 0x15e   :  { %v2432_v21 = vpop.f32.mrb[49].mxu1  ;;  %v2490_v37 = vpop.f32.mrb[53].mxu0 }
 0x15f   :  { %v2433_v39 = vadd.f32 %v2432_v21, %v2431_v35  ;;  %v2434_v32 = vpop.f32.mrb[50].mxu1  ;;  %v2491_v41 = vadd.f32 %v2490_v37, %v2489_v36  ;;  %v2492_v42 = vpop.f32.mrb[54].mxu0 }
 0x160   :  { %v2435_v43 = vpop.f32.mrb[51].mxu1  ;;  %v2493_v51 = vpop.f32.mrb[55].mxu0 }
 0x161   :  { %v1702_v24 = vadd.f32 %v2433_v39, %v3529_v48  ;;  %v2436_v52 = vadd.f32 %v2435_v43, %v2434_v32  ;;  %v2494_v28 = vadd.f32 %v2493_v51, %v2492_v42 }
 0x163   :  { %v1705_v25 = vadd.f32 %v2436_v52, %v3531_v49  ;;  %v3575_v54 = vadd.f32 %v2491_v41, %v1702_v24 }
 0x165   :  { %v3577_v38 = vadd.f32 %v2494_v28, %v1705_v25  ;;  %v2437_v55 = vpop.f32.mrb[52].mxu1  ;;  %v2495_v56 = vpop.f32.mrb[56].mxu0 }
 0x166   :  { %v2438_v57 = vpop.f32.mrb[53].mxu1  ;;  %v2496_v58 = vpop.f32.mrb[57].mxu0 }
 0x167   :  { %v2439_v33 = vadd.f32 %v2438_v57, %v2437_v55  ;;  %v2440_v59 = vpop.f32.mrb[54].mxu1  ;;  %v2497_v44 = vadd.f32 %v2496_v58, %v2495_v56  ;;  %v2498_v62 = vpop.f32.mrb[58].mxu0 }
 0x168   :  { %v2441_v63 = vpop.f32.mrb[55].mxu1  ;;  %v2499_v0 = vpop.f32.mrb[59].mxu0 }
 0x169   :  { %v1710_v48 = vadd.f32 %v2439_v33, %v3537_v3  ;;  %v2442_v1 = vadd.f32 %v2441_v63, %v2440_v59  ;;  %v2500_v2 = vadd.f32 %v2499_v0, %v2498_v62 }
 0x16b   :  { %v1713_v49 = vadd.f32 %v2442_v1, %v3539_v4  ;;  %v3581_v7 = vadd.f32 %v2497_v44, %v1710_v48 }
 0x16d   :  { %v3583_v8 = vadd.f32 %v2500_v2, %v1713_v49  ;;  %v2443_v47 = vpop.f32.mrb[56].mxu1  ;;  %v2501_v9 = vpop.f32.mrb[60].mxu0 }
 0x16e   :  { %v2444_v10 = vpop.f32.mrb[57].mxu1  ;;  %v2502_v40 = vpop.f32.mrb[61].mxu0 }
 0x16f   :  { %v2445_v53 = vadd.f32 %v2444_v10, %v2443_v47  ;;  %v2446_v11 = vpop.f32.mrb[58].mxu1  ;;  %v2503_v12 = vadd.f32 %v2502_v40, %v2501_v9  ;;  %v2504_v50 = vpop.f32.mrb[62].mxu0 }
 0x170   :  { %v2447_v16 = vpop.f32.mrb[59].mxu1  ;;  %v2505_v17 = vpop.f32.mrb[63].mxu0 }
 0x171   :  { %v1718_v3 = vadd.f32 %v2445_v53, %v3545_v22  ;;  %v2448_v18 = vadd.f32 %v2447_v16, %v2446_v11  ;;  %v2506_v19 = vadd.f32 %v2505_v17, %v2504_v50 }
 0x173   :  { %v1721_v4 = vadd.f32 %v2448_v18, %v3547_v23  ;;  %v3587_v20 = vadd.f32 %v2503_v12, %v1718_v3 }
 0x175   :  { %v3589_v60 = vadd.f32 %v2506_v19, %v1721_v4  ;;  %v2449_v27 = vpop.f32.mrb[60].mxu1  ;;  %v2507_v29 = vpop.f32.mrb[64].mxu0 }
 0x176   :  { %v2450_v15 = vpop.f32.mrb[61].mxu1  ;;  %v2508_v5 = vpop.f32.mrb[65].mxu0 }
 0x177   :  { %v2451_v30 = vadd.f32 %v2450_v15, %v2449_v27  ;;  %v2452_v26 = vpop.f32.mrb[62].mxu1  ;;  %v2509_v6 = vadd.f32 %v2508_v5, %v2507_v29  ;;  %v2510_v35 = vpop.f32.mrb[66].mxu0 }
 0x178   :  { %v2453_v36 = vpop.f32.mrb[63].mxu1  ;;  %v2511_v21 = vpop.f32.mrb[67].mxu0 }
 0x179   :  { %v1726_v22 = vadd.f32 %v2451_v30, %v3553_v45  ;;  %v2454_v37 = vadd.f32 %v2453_v36, %v2452_v26  ;;  %v2512_v39 = vadd.f32 %v2511_v21, %v2510_v35 }
 0x17b   :  { %v1729_v23 = vadd.f32 %v2454_v37, %v3555_v46  ;;  %v3593_v32 = vadd.f32 %v2509_v6, %v1726_v22 }
 0x17d   :  { %v3595_v41 = vadd.f32 %v2512_v39, %v1729_v23  ;;  %v2455_v42 = vpop.f32.mrb[64].mxu1  ;;  %v2513_v43 = vpop.f32.mrb[68].mxu0 }
 0x17e   :  { %v2456_v51 = vpop.f32.mrb[65].mxu1  ;;  %v2514_v24 = vpop.f32.mrb[69].mxu0 }
 0x17f   :  { %v2457_v52 = vadd.f32 %v2456_v51, %v2455_v42  ;;  %v2458_v28 = vpop.f32.mrb[66].mxu1  ;;  %v2515_v25 = vadd.f32 %v2514_v24, %v2513_v43  ;;  %v2516_v55 = vpop.f32.mrb[70].mxu0 }
 0x180   :  { %v2459_v56 = vpop.f32.mrb[67].mxu1  ;;  %v2517_v57 = vpop.f32.mrb[71].mxu0 }
 0x181   :  { %v1734_v45 = vadd.f32 %v2457_v52, %v3559_v61 }
 0x183   :  { %v3598_v58 = vadd.f32 %v2515_v25, %v1734_v45 }
 0x185   :  { %v2535_v33 = vpop.f32.mrb[68].mxu1  ;;  %v1949_v46 = vpop.f32.mrb[72].mxu0 }
 0x186   :  { %v2536_v59 = vpop.f32.mrb[69].mxu1  ;;  %v2610_v44 = vpop.f32.mrb[73].mxu0 }
 0x187   :  { %v2537_v62 = vadd.f32 %v2536_v59, %v2535_v33  ;;  %v2538_v63 = vpop.f32.mrb[70].mxu1  ;;  %v1952_v0 = vpop.f32.mrb[74].mxu0 }
 0x188   :  { %v2539_v48 = vpop.f32.mrb[71].mxu1  ;;  %v2611_v1 = vpop.f32.mrb[75].mxu0 }
 0x189   :  { %v2540_v2 = vadd.f32 %v2539_v48, %v2538_v63  ;;  %v1862_v49 = vadd.f32 %v2537_v62, %v3563_v13 }
 0x18b   :  { %v1950_v47 = vadd.f32 %v1949_v46, %v1862_v49  ;;  %v1865_v9 = vadd.f32 %v2540_v2, %v3565_v14 }
 0x18d   :  { %v2003_v10 = vmax.f32 %v1950_v47, 0.0  ;;  %v1953_v40 = vadd.f32 %v1952_v0, %v1865_v9  ;;  %v2541_v61 = vpop.f32.mrb[72].mxu1  ;;  %v1957_v53 = vpop.f32.mrb[76].mxu0 }
 0x18e   :  { %v2542_v11 = vpop.f32.mrb[73].mxu1  ;;  %v2614_v12 = vpop.f32.mrb[77].mxu0 }
 0x18f   :  { %2016 = vst [vmem:[%s3655_s3] sm:$0xff] %v2003_v10  ;;  %v2004_v50 = vmax.f32 %v1953_v40, 0.0  ;;  %v2543_v16 = vadd.f32 %v2542_v11, %v2541_v61  ;;  %v2544_v17 = vpop.f32.mrb[74].mxu1  ;;  %v1960_v3 = vpop.f32.mrb[78].mxu0 }
 0x190   :  { %v2545_v18 = vpop.f32.mrb[75].mxu1  ;;  %v2615_v19 = vpop.f32.mrb[79].mxu0 }
 0x191   :  { %2017 = vst [vmem:[%s3655_s3 + $0x8] sm:$0xff] %v2004_v50  ;;  %v2546_v13 = vadd.f32 %v2545_v18, %v2544_v17  ;;  %v1870_v14 = vadd.f32 %v2543_v16, %v3569_v31 }
 0x193   :  { %v1958_v4 = vadd.f32 %v1957_v53, %v1870_v14  ;;  %v1873_v27 = vadd.f32 %v2546_v13, %v3571_v34 }
 0x195   :  { %v2005_v29 = vmax.f32 %v1958_v4, 0.0  ;;  %v1961_v15 = vadd.f32 %v1960_v3, %v1873_v27  ;;  %v2547_v5 = vpop.f32.mrb[76].mxu1  ;;  %v1965_v30 = vpop.f32.mrb[80].mxu0 }
 0x196   :  { %v2548_v26 = vpop.f32.mrb[77].mxu1  ;;  %v2618_v6 = vpop.f32.mrb[81].mxu0 }
 0x197   :  { %2018 = vst [vmem:[%s3655_s3 + $0x10] sm:$0xff] %v2005_v29  ;;  %v2006_v35 = vmax.f32 %v1961_v15, 0.0  ;;  %v2549_v36 = vadd.f32 %v2548_v26, %v2547_v5  ;;  %v2550_v21 = vpop.f32.mrb[78].mxu1  ;;  %v1968_v22 = vpop.f32.mrb[82].mxu0 }
 0x198   :  { %v2551_v37 = vpop.f32.mrb[79].mxu1  ;;  %v2619_v39 = vpop.f32.mrb[83].mxu0 }
 0x199   :  { %2019 = vst [vmem:[%s3655_s3 + $0x18] sm:$0xff] %v2006_v35  ;;  %v2552_v31 = vadd.f32 %v2551_v37, %v2550_v21  ;;  %v1878_v34 = vadd.f32 %v2549_v36, %v3575_v54 }
 0x19b   :  { %v1966_v23 = vadd.f32 %v1965_v30, %v1878_v34  ;;  %v1881_v42 = vadd.f32 %v2552_v31, %v3577_v38 }
 0x19d   :  { %v2007_v43 = vmax.f32 %v1966_v23, 0.0  ;;  %v1969_v51 = vadd.f32 %v1968_v22, %v1881_v42  ;;  %v2553_v24 = vpop.f32.mrb[80].mxu1  ;;  %v1973_v52 = vpop.f32.mrb[84].mxu0 }
 0x19e   :  { %v2554_v28 = vpop.f32.mrb[81].mxu1  ;;  %v2622_v25 = vpop.f32.mrb[85].mxu0 }
 0x19f   :  { %2020 = vst [vmem:[%s3655_s3 + $0x20] sm:$0xff] %v2007_v43  ;;  %v2008_v55 = vmax.f32 %v1969_v51, 0.0  ;;  %v2555_v56 = vadd.f32 %v2554_v28, %v2553_v24  ;;  %v2556_v57 = vpop.f32.mrb[82].mxu1  ;;  %v1976_v45 = vpop.f32.mrb[86].mxu0 }
 0x1a0   :  { %v2557_v33 = vpop.f32.mrb[83].mxu1  ;;  %v2623_v46 = vpop.f32.mrb[87].mxu0 }
 0x1a1   :  { %2021 = vst [vmem:[%s3655_s3 + $0x28] sm:$0xff] %v2008_v55  ;;  %v2558_v54 = vadd.f32 %v2557_v33, %v2556_v57  ;;  %v1886_v38 = vadd.f32 %v2555_v56, %v3581_v7 }
 0x1a3   :  { %v1974_v59 = vadd.f32 %v1973_v52, %v1886_v38  ;;  %v1889_v44 = vadd.f32 %v2558_v54, %v3583_v8 }
 0x1a5   :  { %v2009_v62 = vmax.f32 %v1974_v59, 0.0  ;;  %v1977_v63 = vadd.f32 %v1976_v45, %v1889_v44  ;;  %v2559_v0 = vpop.f32.mrb[84].mxu1  ;;  %v1981_v48 = vpop.f32.mrb[88].mxu0 }
 0x1a6   :  { %v2560_v1 = vpop.f32.mrb[85].mxu1  ;;  %v2626_v2 = vpop.f32.mrb[89].mxu0 }
 0x1a7   :  { %2022 = vst [vmem:[%s3655_s3 + $0x30] sm:$0xff] %v2009_v62  ;;  %v2010_v49 = vmax.f32 %v1977_v63, 0.0  ;;  %v2561_v47 = vadd.f32 %v2560_v1, %v2559_v0  ;;  %v2562_v9 = vpop.f32.mrb[86].mxu1  ;;  %v1984_v10 = vpop.f32.mrb[90].mxu0 }
 0x1a8   :  { %v2563_v40 = vpop.f32.mrb[87].mxu1  ;;  %v2627_v61 = vpop.f32.mrb[91].mxu0 }
 0x1a9   :  { %2023 = vst [vmem:[%s3655_s3 + $0x38] sm:$0xff] %v2010_v49  ;;  %v2564_v7 = vadd.f32 %v2563_v40, %v2562_v9  ;;  %v1894_v8 = vadd.f32 %v2561_v47, %v3587_v20 }
 0x1ab   :  { %v1982_v53 = vadd.f32 %v1981_v48, %v1894_v8  ;;  %v1897_v11 = vadd.f32 %v2564_v7, %v3589_v60 }
 0x1ad   :  { %v2011_v12 = vmax.f32 %v1982_v53, 0.0  ;;  %v1985_v50 = vadd.f32 %v1984_v10, %v1897_v11  ;;  %v2565_v16 = vpop.f32.mrb[88].mxu1  ;;  %v1989_v17 = vpop.f32.mrb[92].mxu0 }
 0x1ae   :  { %v2566_v3 = vpop.f32.mrb[89].mxu1  ;;  %v2630_v18 = vpop.f32.mrb[93].mxu0 }
 0x1af   :  { %2024 = vst [vmem:[%s3655_s3 + $0x40] sm:$0xff] %v2011_v12  ;;  %v2012_v19 = vmax.f32 %v1985_v50, 0.0  ;;  %v2567_v13 = vadd.f32 %v2566_v3, %v2565_v16  ;;  %v2568_v14 = vpop.f32.mrb[90].mxu1  ;;  %v1992_v4 = vpop.f32.mrb[94].mxu0 }
 0x1b0   :  { %v2569_v27 = vpop.f32.mrb[91].mxu1  ;;  %v2631_v29 = vpop.f32.mrb[95].mxu0 }
 0x1b1   :  { %2025 = vst [vmem:[%s3655_s3 + $0x48] sm:$0xff] %v2012_v19  ;;  %v2570_v20 = vadd.f32 %v2569_v27, %v2568_v14  ;;  %v1902_v60 = vadd.f32 %v2567_v13, %v3593_v32 }
 0x1b3   :  { %v1990_v15 = vadd.f32 %v1989_v17, %v1902_v60  ;;  %v1905_v5 = vadd.f32 %v2570_v20, %v3595_v41 }
 0x1b5   :  { %v2013_v30 = vmax.f32 %v1990_v15, 0.0  ;;  %v1993_v26 = vadd.f32 %v1992_v4, %v1905_v5  ;;  %v2571_v6 = vpop.f32.mrb[92].mxu1  ;;  %v1997_v35 = vpop.f32.mrb[96].mxu0 }
 0x1b6   :  { %v2572_v36 = vpop.f32.mrb[93].mxu1  ;;  %v2634_v21 = vpop.f32.mrb[97].mxu0 }
 0x1b7   :  { %2026 = vst [vmem:[%s3655_s3 + $0x50] sm:$0xff] %v2013_v30  ;;  %v2014_v22 = vmax.f32 %v1993_v26, 0.0  ;;  %v2573_v37 = vadd.f32 %v2572_v36, %v2571_v6  ;;  %v2574_v39 = vpop.f32.mrb[94].mxu1  ;;  %v2000_v31 = vpop.f32.mrb[98].mxu0 }
 0x1b8   :  { %v2575_v34 = vpop.f32.mrb[95].mxu1  ;;  %v2635_v23 = vpop.f32.mrb[99].mxu0 }
 0x1b9   :  { %2027 = vst [vmem:[%s3655_s3 + $0x58] sm:$0xff] %v2014_v22  ;;  %v1910_v32 = vadd.f32 %v2573_v37, %v3598_v58 }
 0x1bb   :  { %v1998_v41 = vadd.f32 %v1997_v35, %v1910_v32 }
 0x1bd   :  { %v2015_v42 = vmax.f32 %v1998_v41, 0.0 }
 0x1bf   :  { %2028 = vst [vmem:[%s3655_s3 + $0x60] sm:$0xff] %v2015_v42 }

// kernel: cnnh_forward.13
= control target key start
LH: loop header
LB: loop body
LE: loop exit
PB: predicated region body
PF: predicated region fallthrough
CT: control target
= control target key end

     0   :  { %s4491_s1 = inlined_call_operand.vmem [shape: bf16[1152,512], index: 1, kind: input, shape index: {}]   ;;  %s4492_s0 = inlined_call_operand.vmem [shape: bf16[8,1152], index: 0, kind: input, shape index: {}]   ;;  %s4493_s3 = inlined_call_operand.vmem [shape: bf16[512,128], index: 3, kind: input, shape index: {}]   ;;  %s4494_s2 = inlined_call_operand.vmem [shape: f32[1,512], index: 2, kind: input, shape index: {}]   ;;  %s4495_s4 = inlined_call_operand.vmem [shape: f32[1,128], index: 4, kind: input, shape index: {}]   ;;  %s4496_s5 = inlined_call_operand.vmem [shape: f32[8,128], index: 5, kind: output, shape index: {}]  }
   0x1   :  { %v2985_v0 = vld [vmem:[%s4491_s1 + $0x4] ss:$16 sps:$4 sm:$0xff]   ;;  %v2987_v1 = vld [vmem:[%s4491_s1 + $0xc] ss:$16 sps:$4 sm:$0xff]   ;;  %v2989_v2 = vld [vmem:[%s4491_s1] ss:$16 sps:$4 sm:$0xff]  }
   0x2   :  { %1808 = vmatprep.subr.bf16.mxu0 %v2985_v0  ;;  %v2990_v3 = vld [vmem:[%s4491_s1 + $0x8] ss:$16 sps:$4 sm:$0xff]   ;;  %2013 = vmatprep.subr.bf16.mxu1 %v2987_v1  ;;  %v2991_v4 = vld [vmem:[%s4491_s1 + $0x24] ss:$16 sps:$4 sm:$0xff]   ;;  %v2993_v5 = vld [vmem:[%s4491_s1 + $0x2c] ss:$16 sps:$4 sm:$0xff]  }
   0x3   :  { %1809 = vmatpush1.bf16.msra.mxu0 %v2989_v2  ;;  %2014 = vmatpush1.bf16.msra.mxu1 %v2990_v3  ;;  %v2995_v6 = vld [vmem:[%s4491_s1 + $0x20] ss:$16 sps:$4 sm:$0xff]   ;;  %v2996_v7 = vld [vmem:[%s4491_s1 + $0x28] ss:$16 sps:$4 sm:$0xff]   ;;  %v2997_v8 = vld [vmem:[%s4491_s1 + $0x44] ss:$16 sps:$4 sm:$0xff]  }
   0x4   :  { %1810 = vmatprep.subr.bf16.mxu0 %v2991_v4  ;;  %2015 = vmatprep.subr.bf16.mxu1 %v2993_v5  ;;  %v2999_v9 = vld [vmem:[%s4491_s1 + $0x4c] ss:$16 sps:$4 sm:$0xff]   ;;  %v3001_v10 = vld [vmem:[%s4491_s1 + $0x40] ss:$16 sps:$4 sm:$0xff]   ;;  %v3002_v11 = vld [vmem:[%s4491_s1 + $0x48] ss:$16 sps:$4 sm:$0xff]  }
   0x5   :  { %v3003_v12 = vld [vmem:[%s4491_s1 + $0x64] ss:$16 sps:$4 sm:$0xff]   ;;  %v3005_v13 = vld [vmem:[%s4491_s1 + $0x6c] ss:$16 sps:$4 sm:$0xff]   ;;  %v3007_v14 = vld [vmem:[%s4491_s1 + $0x60] ss:$16 sps:$4 sm:$0xff]  }
   0x6   :  { %v3008_v15 = vld [vmem:[%s4491_s1 + $0x68] ss:$16 sps:$4 sm:$0xff]   ;;  %v3009_v16 = vld [vmem:[%s4491_s1 + $0x84] ss:$16 sps:$4 sm:$0xff]   ;;  %v3011_v17 = vld [vmem:[%s4491_s1 + $0x8c] ss:$16 sps:$4 sm:$0xff]  }
   0x7   :  { %1811 = vmatpush1.bf16.msra.mxu0 %v2995_v6  ;;  %2016 = vmatpush1.bf16.msra.mxu1 %v2996_v7  ;;  %v3013_v18 = vld [vmem:[%s4491_s1 + $0x80] ss:$16 sps:$4 sm:$0xff]   ;;  %v3014_v19 = vld [vmem:[%s4491_s1 + $0x88] ss:$16 sps:$4 sm:$0xff]   ;;  %v3015_v20 = vld [vmem:[%s4491_s1 + $0xa4] ss:$16 sps:$4 sm:$0xff]  }
   0x8   :  { %1812 = vmatprep.subr.bf16.mxu0 %v2997_v8  ;;  %2017 = vmatprep.subr.bf16.mxu1 %v2999_v9  ;;  %v3017_v21 = vld [vmem:[%s4491_s1 + $0xac] ss:$16 sps:$4 sm:$0xff]   ;;  %v3019_v22 = vld [vmem:[%s4491_s1 + $0xa0] ss:$16 sps:$4 sm:$0xff]   ;;  %v3020_v23 = vld [vmem:[%s4491_s1 + $0xa8] ss:$16 sps:$4 sm:$0xff]  }
   0x9   :  { %v3021_v24 = vld [vmem:[%s4491_s1 + $0xc4] ss:$16 sps:$4 sm:$0xff]   ;;  %v3023_v25 = vld [vmem:[%s4491_s1 + $0xcc] ss:$16 sps:$4 sm:$0xff]   ;;  %v3025_v26 = vld [vmem:[%s4491_s1 + $0xc0] ss:$16 sps:$4 sm:$0xff]  }
   0xa   :  { %v3026_v27 = vld [vmem:[%s4491_s1 + $0xc8] ss:$16 sps:$4 sm:$0xff]   ;;  %v3027_v28 = vld [vmem:[%s4491_s1 + $0xe4] ss:$16 sps:$4 sm:$0xff]   ;;  %v3029_v29 = vld [vmem:[%s4491_s1 + $0xec] ss:$16 sps:$4 sm:$0xff]  }
   0xb   :  { %1813 = vmatpush1.bf16.msra.mxu0 %v3001_v10  ;;  %2018 = vmatpush1.bf16.msra.mxu1 %v3002_v11  ;;  %v3031_v30 = vld [vmem:[%s4491_s1 + $0xe0] ss:$16 sps:$4 sm:$0xff]   ;;  %v3032_v31 = vld [vmem:[%s4491_s1 + $0xe8] ss:$16 sps:$4 sm:$0xff]   ;;  %v3033_v32 = vld [vmem:[%s4491_s1 + $0x104] ss:$16 sps:$4 sm:$0xff]  }
   0xc   :  { %1814 = vmatprep.subr.bf16.mxu0 %v3003_v12  ;;  %2019 = vmatprep.subr.bf16.mxu1 %v3005_v13  ;;  %v3035_v33 = vld [vmem:[%s4491_s1 + $0x10c] ss:$16 sps:$4 sm:$0xff]   ;;  %v3037_v34 = vld [vmem:[%s4491_s1 + $0x100] ss:$16 sps:$4 sm:$0xff]   ;;  %v3038_v35 = vld [vmem:[%s4491_s1 + $0x108] ss:$16 sps:$4 sm:$0xff]  }
   0xd   :  { %v3039_v36 = vld [vmem:[%s4491_s1 + $0x124] ss:$16 sps:$4 sm:$0xff]   ;;  %v3041_v37 = vld [vmem:[%s4491_s1 + $0x12c] ss:$16 sps:$4 sm:$0xff]   ;;  %v3043_v38 = vld [vmem:[%s4491_s1 + $0x120] ss:$16 sps:$4 sm:$0xff]  }
   0xe   :  { %v3044_v39 = vld [vmem:[%s4491_s1 + $0x128] ss:$16 sps:$4 sm:$0xff]   ;;  %v3045_v40 = vld [vmem:[%s4491_s1 + $0x144] ss:$16 sps:$4 sm:$0xff]   ;;  %v3047_v41 = vld [vmem:[%s4491_s1 + $0x14c] ss:$16 sps:$4 sm:$0xff]  }
   0xf   :  { %1815 = vmatpush1.bf16.msra.mxu0 %v3007_v14  ;;  %2020 = vmatpush1.bf16.msra.mxu1 %v3008_v15  ;;  %v3049_v42 = vld [vmem:[%s4491_s1 + $0x140] ss:$16 sps:$4 sm:$0xff]   ;;  %v3050_v43 = vld [vmem:[%s4491_s1 + $0x148] ss:$16 sps:$4 sm:$0xff]   ;;  %v3051_v44 = vld [vmem:[%s4491_s1 + $0x164] ss:$16 sps:$4 sm:$0xff]  }
  0x10   :  { %1816 = vmatprep.subr.bf16.mxu0 %v3009_v16  ;;  %2021 = vmatprep.subr.bf16.mxu1 %v3011_v17  ;;  %v3053_v45 = vld [vmem:[%s4491_s1 + $0x16c] ss:$16 sps:$4 sm:$0xff]   ;;  %v21_v46 = vld [vmem:[%s4492_s0] sm:$0xff]  ;;  %v3056_v49 = vld [vmem:[%s4491_s1 + $0x168] ss:$16 sps:$4 sm:$0xff]  }
  0x11   :  { %v3055_v47 = vld [vmem:[%s4491_s1 + $0x160] ss:$16 sps:$4 sm:$0xff]   ;;  %v2575_v48 = vcombine.high %v21_v46, %v21_v46  ;;  %v3057_v50 = vld [vmem:[%s4491_s1 + $0x184] ss:$16 sps:$4 sm:$0xff]   ;;  %v3059_v51 = vld [vmem:[%s4491_s1 + $0x18c] ss:$16 sps:$4 sm:$0xff]   ;;  %v2574_v4 = vcombine.low %v21_v46, %v21_v46 }
  0x12   :  { %v3061_v52 = vld [vmem:[%s4491_s1 + $0x180] ss:$16 sps:$4 sm:$0xff]   ;;  %v3062_v53 = vld [vmem:[%s4491_s1 + $0x188] ss:$16 sps:$4 sm:$0xff]   ;;  %v3063_v54 = vld [vmem:[%s4491_s1 + $0x1a4] ss:$16 sps:$4 sm:$0xff]  }
  0x13   :  { %1817 = vmatpush1.bf16.msra.mxu0 %v3013_v18  ;;  %2022 = vmatpush1.bf16.msra.mxu1 %v3014_v19  ;;  %v3065_v55 = vld [vmem:[%s4491_s1 + $0x1ac] ss:$16 sps:$4 sm:$0xff]   ;;  %v3067_v56 = vld [vmem:[%s4491_s1 + $0x1a0] ss:$16 sps:$4 sm:$0xff]   ;;  %v3068_v57 = vld [vmem:[%s4491_s1 + $0x1a8] ss:$16 sps:$4 sm:$0xff]  }
  0x14   :  { %1818 = vmatprep.subr.bf16.mxu0 %v3015_v20  ;;  %2023 = vmatprep.subr.bf16.mxu1 %v3017_v21  ;;  %v3069_v58 = vld [vmem:[%s4491_s1 + $0x1c4] ss:$16 sps:$4 sm:$0xff]   ;;  %v3071_v59 = vld [vmem:[%s4491_s1 + $0x1cc] ss:$16 sps:$4 sm:$0xff]   ;;  %v3073_v60 = vld [vmem:[%s4491_s1 + $0x1c0] ss:$16 sps:$4 sm:$0xff]  }
  0x15   :  { %1840 = vmatprep.mubr.bf16.mxu0 %v2575_v48  ;;  %2045 = vmatprep.mubr.bf16.mxu1 %v2575_v48  ;;  %v3074_v61 = vld [vmem:[%s4491_s1 + $0x1c8] ss:$16 sps:$4 sm:$0xff]   ;;  %v3075_v62 = vld [vmem:[%s4491_s1 + $0x1e4] ss:$16 sps:$4 sm:$0xff]   ;;  %v3077_v63 = vld [vmem:[%s4491_s1 + $0x1ec] ss:$16 sps:$4 sm:$0xff]  }
  0x16   :  { %v3079_v0 = vld [vmem:[%s4491_s1 + $0x1e0] ss:$16 sps:$4 sm:$0xff]   ;;  %v3080_v1 = vld [vmem:[%s4491_s1 + $0x1e8] ss:$16 sps:$4 sm:$0xff]   ;;  %v3085_v2 = vld [vmem:[%s4491_s1 + $0x204] ss:$16 sps:$4 sm:$0xff]  }
  0x17   :  { %1819 = vmatpush1.bf16.msra.mxu0 %v3019_v22  ;;  %2024 = vmatpush1.bf16.msra.mxu1 %v3020_v23  ;;  %v3088_v3 = vld [vmem:[%s4491_s1 + $0x20c] ss:$16 sps:$4 sm:$0xff]   ;;  %v3083_v5 = vld [vmem:[%s4491_s1 + $0x200] ss:$16 sps:$4 sm:$0xff]   ;;  %v3086_v6 = vld [vmem:[%s4491_s1 + $0x208] ss:$16 sps:$4 sm:$0xff]  }
  0x18   :  { %1820 = vmatprep.subr.bf16.mxu0 %v3021_v24  ;;  %2025 = vmatprep.subr.bf16.mxu1 %v3023_v25  ;;  %v3091_v7 = vld [vmem:[%s4491_s1 + $0x224] ss:$16 sps:$4 sm:$0xff]   ;;  %v3094_v8 = vld [vmem:[%s4491_s1 + $0x22c] ss:$16 sps:$4 sm:$0xff]   ;;  %v3089_v9 = vld [vmem:[%s4491_s1 + $0x220] ss:$16 sps:$4 sm:$0xff]  }
  0x19   :  { %v3092_v10 = vld [vmem:[%s4491_s1 + $0x228] ss:$16 sps:$4 sm:$0xff]   ;;  %v3097_v11 = vld [vmem:[%s4491_s1 + $0x244] ss:$16 sps:$4 sm:$0xff]   ;;  %v3100_v12 = vld [vmem:[%s4491_s1 + $0x24c] ss:$16 sps:$4 sm:$0xff]  }
  0x1a   :  { %v3095_v13 = vld [vmem:[%s4491_s1 + $0x240] ss:$16 sps:$4 sm:$0xff]   ;;  %v3098_v14 = vld [vmem:[%s4491_s1 + $0x248] ss:$16 sps:$4 sm:$0xff]   ;;  %v3103_v15 = vld [vmem:[%s4491_s1 + $0x264] ss:$16 sps:$4 sm:$0xff]  }
  0x1b   :  { %1821 = vmatpush1.bf16.msra.mxu0 %v3025_v26  ;;  %2026 = vmatpush1.bf16.msra.mxu1 %v3026_v27  ;;  %v3106_v16 = vld [vmem:[%s4491_s1 + $0x26c] ss:$16 sps:$4 sm:$0xff]   ;;  %v3101_v17 = vld [vmem:[%s4491_s1 + $0x260] ss:$16 sps:$4 sm:$0xff]   ;;  %v3104_v18 = vld [vmem:[%s4491_s1 + $0x268] ss:$16 sps:$4 sm:$0xff]  }
  0x1c   :  { %1822 = vmatprep.subr.bf16.mxu0 %v3027_v28  ;;  %2027 = vmatprep.subr.bf16.mxu1 %v3029_v29  ;;  %v3109_v19 = vld [vmem:[%s4491_s1 + $0x284] ss:$16 sps:$4 sm:$0xff]   ;;  %v3112_v20 = vld [vmem:[%s4491_s1 + $0x28c] ss:$16 sps:$4 sm:$0xff]   ;;  %v3107_v21 = vld [vmem:[%s4491_s1 + $0x280] ss:$16 sps:$4 sm:$0xff]  }
  0x1d   :  { %v3110_v22 = vld [vmem:[%s4491_s1 + $0x288] ss:$16 sps:$4 sm:$0xff]   ;;  %v3115_v23 = vld [vmem:[%s4491_s1 + $0x2a4] ss:$16 sps:$4 sm:$0xff]   ;;  %v3118_v24 = vld [vmem:[%s4491_s1 + $0x2ac] ss:$16 sps:$4 sm:$0xff]  }
  0x1e   :  { %v3113_v25 = vld [vmem:[%s4491_s1 + $0x2a0] ss:$16 sps:$4 sm:$0xff]   ;;  %v3116_v26 = vld [vmem:[%s4491_s1 + $0x2a8] ss:$16 sps:$4 sm:$0xff]   ;;  %v3121_v27 = vld [vmem:[%s4491_s1 + $0x2c4] ss:$16 sps:$4 sm:$0xff]  }
  0x1f   :  { %1823 = vmatpush1.bf16.msra.mxu0 %v3031_v30  ;;  %2028 = vmatpush1.bf16.msra.mxu1 %v3032_v31  ;;  %v3124_v28 = vld [vmem:[%s4491_s1 + $0x2cc] ss:$16 sps:$4 sm:$0xff]   ;;  %v3119_v31 = vld [vmem:[%s4491_s1 + $0x2c0] ss:$16 sps:$4 sm:$0xff]   ;;  %v3146_v48 = vld [vmem:[%s4491_s1 + $0x348] ss:$16 sps:$4 sm:$0xff]  }
  0x20   :  { %1824 = vmatprep.subr.bf16.mxu0 %v3033_v32  ;;  %2029 = vmatprep.subr.bf16.mxu1 %v3035_v33  ;;  %v3765_v29 = vld [vmem:[%s4492_s0 + $0x8] sm:$0xff]  ;;  %v3127_v33 = vld [vmem:[%s4491_s1 + $0x2e4] ss:$16 sps:$4 sm:$0xff]  }
  0x21   :  { %v2577_v30 = vcombine.high %v3765_v29, %v3765_v29  ;;  %v3122_v32 = vld [vmem:[%s4491_s1 + $0x2c8] ss:$16 sps:$4 sm:$0xff]   ;;  %v3148_v46 = vld [vmem:[%s4491_s1 + $0x34c] ss:$16 sps:$4 sm:$0xff]  }
  0x23   :  { %1825 = vmatpush1.bf16.msra.mxu0 %v3037_v34  ;;  %2030 = vmatpush1.bf16.msra.mxu1 %v3038_v35  ;;  %v3130_v34 = vld [vmem:[%s4491_s1 + $0x2ec] ss:$16 sps:$4 sm:$0xff]   ;;  %v3125_v35 = vld [vmem:[%s4491_s1 + $0x2e0] ss:$16 sps:$4 sm:$0xff]  }
  0x24   :  { %1826 = vmatprep.subr.bf16.mxu0 %v3039_v36  ;;  %2031 = vmatprep.subr.bf16.mxu1 %v3041_v37  ;;  %v3128_v36 = vld [vmem:[%s4491_s1 + $0x2e8] ss:$16 sps:$4 sm:$0xff]   ;;  %v3133_v37 = vld [vmem:[%s4491_s1 + $0x304] ss:$16 sps:$4 sm:$0xff]  }
  0x27   :  { %1827 = vmatpush1.bf16.msra.mxu0 %v3043_v38  ;;  %2032 = vmatpush1.bf16.msra.mxu1 %v3044_v39  ;;  %v3136_v38 = vld [vmem:[%s4491_s1 + $0x30c] ss:$16 sps:$4 sm:$0xff]   ;;  %v3131_v39 = vld [vmem:[%s4491_s1 + $0x300] ss:$16 sps:$4 sm:$0xff]  }
  0x28   :  { %1828 = vmatprep.subr.bf16.mxu0 %v3045_v40  ;;  %2033 = vmatprep.subr.bf16.mxu1 %v3047_v41  ;;  %v3134_v40 = vld [vmem:[%s4491_s1 + $0x308] ss:$16 sps:$4 sm:$0xff]   ;;  %v3139_v41 = vld [vmem:[%s4491_s1 + $0x324] ss:$16 sps:$4 sm:$0xff]  }
  0x2b   :  { %1829 = vmatpush1.bf16.msra.mxu0 %v3049_v42  ;;  %2034 = vmatpush1.bf16.msra.mxu1 %v3050_v43  ;;  %v3142_v42 = vld [vmem:[%s4491_s1 + $0x32c] ss:$16 sps:$4 sm:$0xff]   ;;  %v3137_v43 = vld [vmem:[%s4491_s1 + $0x320] ss:$16 sps:$4 sm:$0xff]  }
  0x2c   :  { %1830 = vmatprep.subr.bf16.mxu0 %v3051_v44  ;;  %2035 = vmatprep.subr.bf16.mxu1 %v3053_v45  ;;  %v3140_v44 = vld [vmem:[%s4491_s1 + $0x328] ss:$16 sps:$4 sm:$0xff]   ;;  %v3145_v45 = vld [vmem:[%s4491_s1 + $0x344] ss:$16 sps:$4 sm:$0xff]  }
  0x2f   :  { %1831 = vmatpush1.bf16.msra.mxu0 %v3055_v47  ;;  %2036 = vmatpush1.bf16.msra.mxu1 %v3056_v49  ;;  %v3143_v47 = vld [vmem:[%s4491_s1 + $0x340] ss:$16 sps:$4 sm:$0xff]   ;;  %v3151_v49 = vld [vmem:[%s4491_s1 + $0x364] ss:$16 sps:$4 sm:$0xff]  }
  0x30   :  { %1832 = vmatprep.subr.bf16.mxu0 %v3057_v50  ;;  %2037 = vmatprep.subr.bf16.mxu1 %v3059_v51  ;;  %v3154_v50 = vld [vmem:[%s4491_s1 + $0x36c] ss:$16 sps:$4 sm:$0xff]   ;;  %v3149_v51 = vld [vmem:[%s4491_s1 + $0x360] ss:$16 sps:$4 sm:$0xff]  }
  0x33   :  { %1833 = vmatpush1.bf16.msra.mxu0 %v3061_v52  ;;  %2038 = vmatpush1.bf16.msra.mxu1 %v3062_v53  ;;  %v3152_v52 = vld [vmem:[%s4491_s1 + $0x368] ss:$16 sps:$4 sm:$0xff]   ;;  %v3157_v53 = vld [vmem:[%s4491_s1 + $0x384] ss:$16 sps:$4 sm:$0xff]  }
  0x34   :  { %1834 = vmatprep.subr.bf16.mxu0 %v3063_v54  ;;  %2039 = vmatprep.subr.bf16.mxu1 %v3065_v55  ;;  %v3160_v54 = vld [vmem:[%s4491_s1 + $0x38c] ss:$16 sps:$4 sm:$0xff]   ;;  %v3155_v55 = vld [vmem:[%s4491_s1 + $0x380] ss:$16 sps:$4 sm:$0xff]  }
  0x37   :  { %1835 = vmatpush1.bf16.msra.mxu0 %v3067_v56  ;;  %2040 = vmatpush1.bf16.msra.mxu1 %v3068_v57  ;;  %v3158_v56 = vld [vmem:[%s4491_s1 + $0x388] ss:$16 sps:$4 sm:$0xff]   ;;  %v3163_v57 = vld [vmem:[%s4491_s1 + $0x3a4] ss:$16 sps:$4 sm:$0xff]  }
  0x38   :  { %1836 = vmatprep.subr.bf16.mxu0 %v3069_v58  ;;  %2041 = vmatprep.subr.bf16.mxu1 %v3071_v59  ;;  %v3166_v58 = vld [vmem:[%s4491_s1 + $0x3ac] ss:$16 sps:$4 sm:$0xff]   ;;  %v3161_v59 = vld [vmem:[%s4491_s1 + $0x3a0] ss:$16 sps:$4 sm:$0xff]  }
  0x3b   :  { %1837 = vmatpush1.bf16.msra.mxu0 %v3073_v60  ;;  %2042 = vmatpush1.bf16.msra.mxu1 %v3074_v61  ;;  %v3164_v60 = vld [vmem:[%s4491_s1 + $0x3a8] ss:$16 sps:$4 sm:$0xff]   ;;  %v3169_v61 = vld [vmem:[%s4491_s1 + $0x3c4] ss:$16 sps:$4 sm:$0xff]  }
  0x3c   :  { %1838 = vmatprep.subr.bf16.mxu0 %v3075_v62  ;;  %2043 = vmatprep.subr.bf16.mxu1 %v3077_v63  ;;  %v3172_v62 = vld [vmem:[%s4491_s1 + $0x3cc] ss:$16 sps:$4 sm:$0xff]   ;;  %v3167_v63 = vld [vmem:[%s4491_s1 + $0x3c0] ss:$16 sps:$4 sm:$0xff]  }
  0x3f   :  { %1839 = vmatpush1.bf16.msra.mxu0 %v3079_v0  ;;  %2044 = vmatpush1.bf16.msra.mxu1 %v3080_v1  ;;  %v3170_v0 = vld [vmem:[%s4491_s1 + $0x3c8] ss:$16 sps:$4 sm:$0xff]   ;;  %v3175_v1 = vld [vmem:[%s4491_s1 + $0x3e4] ss:$16 sps:$4 sm:$0xff]  }
  0x40   :  { %1849 = vmatprep.subr.bf16.mxu0 %v3085_v2  ;;  %2054 = vmatprep.subr.bf16.mxu1 %v3088_v3  ;;  %v3178_v2 = vld [vmem:[%s4491_s1 + $0x3ec] ss:$16 sps:$4 sm:$0xff]   ;;  %v3173_v3 = vld [vmem:[%s4491_s1 + $0x3e0] ss:$16 sps:$4 sm:$0xff]  }
  0x42   :  { %1841 = vmatmul.mubr.bf16.vlgmr.msra.gmra.mrb[0].mxu0 %v2574_v4  ;;  %2046 = vmatmul.mubr.bf16.vlgmr.msra.gmra.mrb[0].mxu1 %v2574_v4  ;;  %v3176_v4 = vld [vmem:[%s4491_s1 + $0x3e8] ss:$16 sps:$4 sm:$0xff]  }
  0x43   :  { %1850 = vmatpush1.bf16.msra.mxu0 %v3083_v5  ;;  %2055 = vmatpush1.bf16.msra.mxu1 %v3086_v6  ;;  %v3183_v5 = vld [vmem:[%s4491_s1 + $0x404] ss:$16 sps:$4 sm:$0xff]   ;;  %v3186_v6 = vld [vmem:[%s4491_s1 + $0x40c] ss:$16 sps:$4 sm:$0xff]  }
  0x44   :  { %1851 = vmatprep.subr.bf16.mxu0 %v3091_v7  ;;  %2056 = vmatprep.subr.bf16.mxu1 %v3094_v8  ;;  %v2576_v7 = vcombine.low %v3765_v29, %v3765_v29  ;;  %v3181_v8 = vld [vmem:[%s4491_s1 + $0x400] ss:$16 sps:$4 sm:$0xff]   ;;  %v3216_v29 = vld [vmem:[%s4491_s1 + $0x4ac] ss:$16 sps:$4 sm:$0xff]  }
  0x45   :  { %1881 = vmatprep.mubr.bf16.mxu0 %v2577_v30  ;;  %2086 = vmatprep.mubr.bf16.mxu1 %v2577_v30  ;;  %v3211_v30 = vld [vmem:[%s4491_s1 + $0x4a0] ss:$16 sps:$4 sm:$0xff]  }
  0x47   :  { %1852 = vmatpush1.bf16.msra.mxu0 %v3089_v9  ;;  %2057 = vmatpush1.bf16.msra.mxu1 %v3092_v10  ;;  %v3184_v9 = vld [vmem:[%s4491_s1 + $0x408] ss:$16 sps:$4 sm:$0xff]   ;;  %v3189_v10 = vld [vmem:[%s4491_s1 + $0x424] ss:$16 sps:$4 sm:$0xff]  }
  0x48   :  { %1853 = vmatprep.subr.bf16.mxu0 %v3097_v11  ;;  %2058 = vmatprep.subr.bf16.mxu1 %v3100_v12  ;;  %v3903_v11 = vld [vmem:[%s4492_s0 + $0x10] sm:$0xff]  ;;  %v3192_v12 = vld [vmem:[%s4491_s1 + $0x42c] ss:$16 sps:$4 sm:$0xff]  }
  0x4b   :  { %1854 = vmatpush1.bf16.msra.mxu0 %v3095_v13  ;;  %2059 = vmatpush1.bf16.msra.mxu1 %v3098_v14  ;;  %v2579_v13 = vcombine.high %v3903_v11, %v3903_v11  ;;  %v3187_v14 = vld [vmem:[%s4491_s1 + $0x420] ss:$16 sps:$4 sm:$0xff]  }
  0x4c   :  { %1855 = vmatprep.subr.bf16.mxu0 %v3103_v15  ;;  %2060 = vmatprep.subr.bf16.mxu1 %v3106_v16  ;;  %v3190_v15 = vld [vmem:[%s4491_s1 + $0x428] ss:$16 sps:$4 sm:$0xff]   ;;  %v3195_v16 = vld [vmem:[%s4491_s1 + $0x444] ss:$16 sps:$4 sm:$0xff]  }
  0x4f   :  { %1856 = vmatpush1.bf16.msra.mxu0 %v3101_v17  ;;  %2061 = vmatpush1.bf16.msra.mxu1 %v3104_v18  ;;  %v3198_v17 = vld [vmem:[%s4491_s1 + $0x44c] ss:$16 sps:$4 sm:$0xff]   ;;  %v3193_v18 = vld [vmem:[%s4491_s1 + $0x440] ss:$16 sps:$4 sm:$0xff]  }
  0x50   :  { %1857 = vmatprep.subr.bf16.mxu0 %v3109_v19  ;;  %2062 = vmatprep.subr.bf16.mxu1 %v3112_v20  ;;  %v3196_v19 = vld [vmem:[%s4491_s1 + $0x448] ss:$16 sps:$4 sm:$0xff]   ;;  %v3201_v20 = vld [vmem:[%s4491_s1 + $0x464] ss:$16 sps:$4 sm:$0xff]  }
  0x53   :  { %1858 = vmatpush1.bf16.msra.mxu0 %v3107_v21  ;;  %2063 = vmatpush1.bf16.msra.mxu1 %v3110_v22  ;;  %v3204_v21 = vld [vmem:[%s4491_s1 + $0x46c] ss:$16 sps:$4 sm:$0xff]   ;;  %v3199_v22 = vld [vmem:[%s4491_s1 + $0x460] ss:$16 sps:$4 sm:$0xff]  }
  0x54   :  { %1859 = vmatprep.subr.bf16.mxu0 %v3115_v23  ;;  %2064 = vmatprep.subr.bf16.mxu1 %v3118_v24  ;;  %v3202_v23 = vld [vmem:[%s4491_s1 + $0x468] ss:$16 sps:$4 sm:$0xff]   ;;  %v3207_v24 = vld [vmem:[%s4491_s1 + $0x484] ss:$16 sps:$4 sm:$0xff]  }
  0x57   :  { %1860 = vmatpush1.bf16.msra.mxu0 %v3113_v25  ;;  %2065 = vmatpush1.bf16.msra.mxu1 %v3116_v26  ;;  %v3210_v25 = vld [vmem:[%s4491_s1 + $0x48c] ss:$16 sps:$4 sm:$0xff]   ;;  %v3205_v26 = vld [vmem:[%s4491_s1 + $0x480] ss:$16 sps:$4 sm:$0xff]  }
  0x58   :  { %1861 = vmatprep.subr.bf16.mxu0 %v3121_v27  ;;  %2066 = vmatprep.subr.bf16.mxu1 %v3124_v28  ;;  %v3208_v27 = vld [vmem:[%s4491_s1 + $0x488] ss:$16 sps:$4 sm:$0xff]   ;;  %v3213_v28 = vld [vmem:[%s4491_s1 + $0x4a4] ss:$16 sps:$4 sm:$0xff]  }
  0x5b   :  { %1862 = vmatpush1.bf16.msra.mxu0 %v3119_v31  ;;  %2067 = vmatpush1.bf16.msra.mxu1 %v3122_v32  ;;  %v3214_v31 = vld [vmem:[%s4491_s1 + $0x4a8] ss:$16 sps:$4 sm:$0xff]   ;;  %v3219_v32 = vld [vmem:[%s4491_s1 + $0x4c4] ss:$16 sps:$4 sm:$0xff]  }
  0x5c   :  { %1863 = vmatprep.subr.bf16.mxu0 %v3127_v33  ;;  %2068 = vmatprep.subr.bf16.mxu1 %v3130_v34  ;;  %v3222_v33 = vld [vmem:[%s4491_s1 + $0x4cc] ss:$16 sps:$4 sm:$0xff]   ;;  %v3217_v34 = vld [vmem:[%s4491_s1 + $0x4c0] ss:$16 sps:$4 sm:$0xff]  }
  0x5f   :  { %1864 = vmatpush1.bf16.msra.mxu0 %v3125_v35  ;;  %2069 = vmatpush1.bf16.msra.mxu1 %v3128_v36  ;;  %v3220_v35 = vld [vmem:[%s4491_s1 + $0x4c8] ss:$16 sps:$4 sm:$0xff]   ;;  %v3225_v36 = vld [vmem:[%s4491_s1 + $0x4e4] ss:$16 sps:$4 sm:$0xff]  }
  0x60   :  { %1865 = vmatprep.subr.bf16.mxu0 %v3133_v37  ;;  %2070 = vmatprep.subr.bf16.mxu1 %v3136_v38  ;;  %v3228_v37 = vld [vmem:[%s4491_s1 + $0x4ec] ss:$16 sps:$4 sm:$0xff]   ;;  %v3223_v38 = vld [vmem:[%s4491_s1 + $0x4e0] ss:$16 sps:$4 sm:$0xff]  }
  0x63   :  { %1866 = vmatpush1.bf16.msra.mxu0 %v3131_v39  ;;  %2071 = vmatpush1.bf16.msra.mxu1 %v3134_v40  ;;  %v3226_v39 = vld [vmem:[%s4491_s1 + $0x4e8] ss:$16 sps:$4 sm:$0xff]   ;;  %v3231_v40 = vld [vmem:[%s4491_s1 + $0x504] ss:$16 sps:$4 sm:$0xff]  }
  0x64   :  { %1867 = vmatprep.subr.bf16.mxu0 %v3139_v41  ;;  %2072 = vmatprep.subr.bf16.mxu1 %v3142_v42  ;;  %v3234_v41 = vld [vmem:[%s4491_s1 + $0x50c] ss:$16 sps:$4 sm:$0xff]   ;;  %v3229_v42 = vld [vmem:[%s4491_s1 + $0x500] ss:$16 sps:$4 sm:$0xff]  }
  0x67   :  { %1868 = vmatpush1.bf16.msra.mxu0 %v3137_v43  ;;  %2073 = vmatpush1.bf16.msra.mxu1 %v3140_v44  ;;  %v3232_v43 = vld [vmem:[%s4491_s1 + $0x508] ss:$16 sps:$4 sm:$0xff]   ;;  %v3237_v44 = vld [vmem:[%s4491_s1 + $0x524] ss:$16 sps:$4 sm:$0xff]  }
  0x68   :  { %1869 = vmatprep.subr.bf16.mxu0 %v3145_v45  ;;  %2074 = vmatprep.subr.bf16.mxu1 %v3148_v46  ;;  %v3240_v45 = vld [vmem:[%s4491_s1 + $0x52c] ss:$16 sps:$4 sm:$0xff]   ;;  %v3235_v46 = vld [vmem:[%s4491_s1 + $0x520] ss:$16 sps:$4 sm:$0xff]  }
  0x6b   :  { %1870 = vmatpush1.bf16.msra.mxu0 %v3143_v47  ;;  %2075 = vmatpush1.bf16.msra.mxu1 %v3146_v48  ;;  %v3238_v47 = vld [vmem:[%s4491_s1 + $0x528] ss:$16 sps:$4 sm:$0xff]   ;;  %v3243_v48 = vld [vmem:[%s4491_s1 + $0x544] ss:$16 sps:$4 sm:$0xff]  }
  0x6c   :  { %1871 = vmatprep.subr.bf16.mxu0 %v3151_v49  ;;  %2076 = vmatprep.subr.bf16.mxu1 %v3154_v50  ;;  %v3246_v49 = vld [vmem:[%s4491_s1 + $0x54c] ss:$16 sps:$4 sm:$0xff]   ;;  %v3241_v50 = vld [vmem:[%s4491_s1 + $0x540] ss:$16 sps:$4 sm:$0xff]  }
  0x6f   :  { %1872 = vmatpush1.bf16.msra.mxu0 %v3149_v51  ;;  %2077 = vmatpush1.bf16.msra.mxu1 %v3152_v52  ;;  %v3244_v51 = vld [vmem:[%s4491_s1 + $0x548] ss:$16 sps:$4 sm:$0xff]   ;;  %v3249_v52 = vld [vmem:[%s4491_s1 + $0x564] ss:$16 sps:$4 sm:$0xff]  }
  0x70   :  { %1873 = vmatprep.subr.bf16.mxu0 %v3157_v53  ;;  %2078 = vmatprep.subr.bf16.mxu1 %v3160_v54  ;;  %v3252_v53 = vld [vmem:[%s4491_s1 + $0x56c] ss:$16 sps:$4 sm:$0xff]   ;;  %v3247_v54 = vld [vmem:[%s4491_s1 + $0x560] ss:$16 sps:$4 sm:$0xff]  }
  0x73   :  { %1874 = vmatpush1.bf16.msra.mxu0 %v3155_v55  ;;  %2079 = vmatpush1.bf16.msra.mxu1 %v3158_v56  ;;  %v3250_v55 = vld [vmem:[%s4491_s1 + $0x568] ss:$16 sps:$4 sm:$0xff]   ;;  %v3255_v56 = vld [vmem:[%s4491_s1 + $0x584] ss:$16 sps:$4 sm:$0xff]  }
  0x74   :  { %1875 = vmatprep.subr.bf16.mxu0 %v3163_v57  ;;  %2080 = vmatprep.subr.bf16.mxu1 %v3166_v58  ;;  %v3258_v57 = vld [vmem:[%s4491_s1 + $0x58c] ss:$16 sps:$4 sm:$0xff]   ;;  %v3253_v58 = vld [vmem:[%s4491_s1 + $0x580] ss:$16 sps:$4 sm:$0xff]  }
  0x77   :  { %1876 = vmatpush1.bf16.msra.mxu0 %v3161_v59  ;;  %2081 = vmatpush1.bf16.msra.mxu1 %v3164_v60  ;;  %v3256_v59 = vld [vmem:[%s4491_s1 + $0x588] ss:$16 sps:$4 sm:$0xff]   ;;  %v3261_v60 = vld [vmem:[%s4491_s1 + $0x5a4] ss:$16 sps:$4 sm:$0xff]  }
  0x78   :  { %1877 = vmatprep.subr.bf16.mxu0 %v3169_v61  ;;  %2082 = vmatprep.subr.bf16.mxu1 %v3172_v62  ;;  %v3264_v61 = vld [vmem:[%s4491_s1 + $0x5ac] ss:$16 sps:$4 sm:$0xff]   ;;  %v3259_v62 = vld [vmem:[%s4491_s1 + $0x5a0] ss:$16 sps:$4 sm:$0xff]  }
  0x7b   :  { %1878 = vmatpush1.bf16.msra.mxu0 %v3167_v63  ;;  %2083 = vmatpush1.bf16.msra.mxu1 %v3170_v0  ;;  %v3262_v63 = vld [vmem:[%s4491_s1 + $0x5a8] ss:$16 sps:$4 sm:$0xff]   ;;  %v3267_v0 = vld [vmem:[%s4491_s1 + $0x5c4] ss:$16 sps:$4 sm:$0xff]  }
  0x7c   :  { %1879 = vmatprep.subr.bf16.mxu0 %v3175_v1  ;;  %2084 = vmatprep.subr.bf16.mxu1 %v3178_v2  ;;  %v3270_v1 = vld [vmem:[%s4491_s1 + $0x5cc] ss:$16 sps:$4 sm:$0xff]   ;;  %v3265_v2 = vld [vmem:[%s4491_s1 + $0x5c0] ss:$16 sps:$4 sm:$0xff]  }
  0x7f   :  { %1880 = vmatpush1.bf16.msra.mxu0 %v3173_v3  ;;  %2085 = vmatpush1.bf16.msra.mxu1 %v3176_v4  ;;  %v3268_v3 = vld [vmem:[%s4491_s1 + $0x5c8] ss:$16 sps:$4 sm:$0xff]   ;;  %v3273_v4 = vld [vmem:[%s4491_s1 + $0x5e4] ss:$16 sps:$4 sm:$0xff]  }
  0x80   :  { %1890 = vmatprep.subr.bf16.mxu0 %v3183_v5  ;;  %2095 = vmatprep.subr.bf16.mxu1 %v3186_v6  ;;  %v3276_v5 = vld [vmem:[%s4491_s1 + $0x5ec] ss:$16 sps:$4 sm:$0xff]   ;;  %v3271_v6 = vld [vmem:[%s4491_s1 + $0x5e0] ss:$16 sps:$4 sm:$0xff]  }
  0x82   :  { %1882 = vmatmul.mubr.bf16.vlgmr.msra.gmra.mrb[0].mxu0 %v2576_v7  ;;  %2087 = vmatmul.mubr.bf16.vlgmr.msra.gmra.mrb[0].mxu1 %v2576_v7  ;;  %v3274_v7 = vld [vmem:[%s4491_s1 + $0x5e8] ss:$16 sps:$4 sm:$0xff]  }
  0x83   :  { %1891 = vmatpush1.bf16.msra.mxu0 %v3181_v8  ;;  %2096 = vmatpush1.bf16.msra.mxu1 %v3184_v9  ;;  %v3281_v8 = vld [vmem:[%s4491_s1 + $0x604] ss:$16 sps:$4 sm:$0xff]   ;;  %v3284_v9 = vld [vmem:[%s4491_s1 + $0x60c] ss:$16 sps:$4 sm:$0xff]  }
  0x84   :  { %1892 = vmatprep.subr.bf16.mxu0 %v3189_v10  ;;  %2097 = vmatprep.subr.bf16.mxu1 %v3192_v12  ;;  %v2578_v10 = vcombine.low %v3903_v11, %v3903_v11  ;;  %v3279_v12 = vld [vmem:[%s4491_s1 + $0x600] ss:$16 sps:$4 sm:$0xff]   ;;  %v3287_v11 = vld [vmem:[%s4491_s1 + $0x624] ss:$16 sps:$4 sm:$0xff]  }
  0x85   :  { %1922 = vmatprep.mubr.bf16.mxu0 %v2579_v13  ;;  %2127 = vmatprep.mubr.bf16.mxu1 %v2579_v13  ;;  %v4098_v13 = vld [vmem:[%s4492_s0 + $0x18] sm:$0xff] }
  0x87   :  { %1893 = vmatpush1.bf16.msra.mxu0 %v3187_v14  ;;  %2098 = vmatpush1.bf16.msra.mxu1 %v3190_v15  ;;  %v3282_v14 = vld [vmem:[%s4491_s1 + $0x608] ss:$16 sps:$4 sm:$0xff]   ;;  %v3290_v15 = vld [vmem:[%s4491_s1 + $0x62c] ss:$16 sps:$4 sm:$0xff]  }
  0x88   :  { %1894 = vmatprep.subr.bf16.mxu0 %v3195_v16  ;;  %2099 = vmatprep.subr.bf16.mxu1 %v3198_v17  ;;  %v3285_v16 = vld [vmem:[%s4491_s1 + $0x620] ss:$16 sps:$4 sm:$0xff]   ;;  %v2581_v17 = vcombine.high %v4098_v13, %v4098_v13 }
  0x8b   :  { %1895 = vmatpush1.bf16.msra.mxu0 %v3193_v18  ;;  %2100 = vmatpush1.bf16.msra.mxu1 %v3196_v19  ;;  %v3288_v18 = vld [vmem:[%s4491_s1 + $0x628] ss:$16 sps:$4 sm:$0xff]   ;;  %v3293_v19 = vld [vmem:[%s4491_s1 + $0x644] ss:$16 sps:$4 sm:$0xff]  }
  0x8c   :  { %1896 = vmatprep.subr.bf16.mxu0 %v3201_v20  ;;  %2101 = vmatprep.subr.bf16.mxu1 %v3204_v21  ;;  %v3296_v20 = vld [vmem:[%s4491_s1 + $0x64c] ss:$16 sps:$4 sm:$0xff]   ;;  %v3291_v21 = vld [vmem:[%s4491_s1 + $0x640] ss:$16 sps:$4 sm:$0xff]  }
  0x8f   :  { %1897 = vmatpush1.bf16.msra.mxu0 %v3199_v22  ;;  %2102 = vmatpush1.bf16.msra.mxu1 %v3202_v23  ;;  %v3294_v22 = vld [vmem:[%s4491_s1 + $0x648] ss:$16 sps:$4 sm:$0xff]   ;;  %v3299_v23 = vld [vmem:[%s4491_s1 + $0x664] ss:$16 sps:$4 sm:$0xff]  }
  0x90   :  { %1898 = vmatprep.subr.bf16.mxu0 %v3207_v24  ;;  %2103 = vmatprep.subr.bf16.mxu1 %v3210_v25  ;;  %v3302_v24 = vld [vmem:[%s4491_s1 + $0x66c] ss:$16 sps:$4 sm:$0xff]   ;;  %v3297_v25 = vld [vmem:[%s4491_s1 + $0x660] ss:$16 sps:$4 sm:$0xff]  }
  0x93   :  { %1899 = vmatpush1.bf16.msra.mxu0 %v3205_v26  ;;  %2104 = vmatpush1.bf16.msra.mxu1 %v3208_v27  ;;  %v3300_v26 = vld [vmem:[%s4491_s1 + $0x668] ss:$16 sps:$4 sm:$0xff]   ;;  %v3305_v27 = vld [vmem:[%s4491_s1 + $0x684] ss:$16 sps:$4 sm:$0xff]  }
  0x94   :  { %1900 = vmatprep.subr.bf16.mxu0 %v3213_v28  ;;  %2105 = vmatprep.subr.bf16.mxu1 %v3216_v29  ;;  %v3308_v28 = vld [vmem:[%s4491_s1 + $0x68c] ss:$16 sps:$4 sm:$0xff]   ;;  %v3303_v29 = vld [vmem:[%s4491_s1 + $0x680] ss:$16 sps:$4 sm:$0xff]  }
  0x97   :  { %1901 = vmatpush1.bf16.msra.mxu0 %v3211_v30  ;;  %2106 = vmatpush1.bf16.msra.mxu1 %v3214_v31  ;;  %v3306_v30 = vld [vmem:[%s4491_s1 + $0x688] ss:$16 sps:$4 sm:$0xff]   ;;  %v3311_v31 = vld [vmem:[%s4491_s1 + $0x6a4] ss:$16 sps:$4 sm:$0xff]  }
  0x98   :  { %1902 = vmatprep.subr.bf16.mxu0 %v3219_v32  ;;  %2107 = vmatprep.subr.bf16.mxu1 %v3222_v33  ;;  %v3314_v32 = vld [vmem:[%s4491_s1 + $0x6ac] ss:$16 sps:$4 sm:$0xff]   ;;  %v3309_v33 = vld [vmem:[%s4491_s1 + $0x6a0] ss:$16 sps:$4 sm:$0xff]  }
  0x9b   :  { %1903 = vmatpush1.bf16.msra.mxu0 %v3217_v34  ;;  %2108 = vmatpush1.bf16.msra.mxu1 %v3220_v35  ;;  %v3312_v34 = vld [vmem:[%s4491_s1 + $0x6a8] ss:$16 sps:$4 sm:$0xff]   ;;  %v3317_v35 = vld [vmem:[%s4491_s1 + $0x6c4] ss:$16 sps:$4 sm:$0xff]  }
  0x9c   :  { %1904 = vmatprep.subr.bf16.mxu0 %v3225_v36  ;;  %2109 = vmatprep.subr.bf16.mxu1 %v3228_v37  ;;  %v3320_v36 = vld [vmem:[%s4491_s1 + $0x6cc] ss:$16 sps:$4 sm:$0xff]   ;;  %v3315_v37 = vld [vmem:[%s4491_s1 + $0x6c0] ss:$16 sps:$4 sm:$0xff]  }
  0x9f   :  { %1905 = vmatpush1.bf16.msra.mxu0 %v3223_v38  ;;  %2110 = vmatpush1.bf16.msra.mxu1 %v3226_v39  ;;  %v3318_v38 = vld [vmem:[%s4491_s1 + $0x6c8] ss:$16 sps:$4 sm:$0xff]   ;;  %v3323_v39 = vld [vmem:[%s4491_s1 + $0x6e4] ss:$16 sps:$4 sm:$0xff]  }
  0xa0   :  { %1906 = vmatprep.subr.bf16.mxu0 %v3231_v40  ;;  %2111 = vmatprep.subr.bf16.mxu1 %v3234_v41  ;;  %v3326_v40 = vld [vmem:[%s4491_s1 + $0x6ec] ss:$16 sps:$4 sm:$0xff]   ;;  %v3321_v41 = vld [vmem:[%s4491_s1 + $0x6e0] ss:$16 sps:$4 sm:$0xff]  }
  0xa3   :  { %1907 = vmatpush1.bf16.msra.mxu0 %v3229_v42  ;;  %2112 = vmatpush1.bf16.msra.mxu1 %v3232_v43  ;;  %v3324_v42 = vld [vmem:[%s4491_s1 + $0x6e8] ss:$16 sps:$4 sm:$0xff]   ;;  %v3329_v43 = vld [vmem:[%s4491_s1 + $0x704] ss:$16 sps:$4 sm:$0xff]  }
  0xa4   :  { %1908 = vmatprep.subr.bf16.mxu0 %v3237_v44  ;;  %2113 = vmatprep.subr.bf16.mxu1 %v3240_v45  ;;  %v3332_v44 = vld [vmem:[%s4491_s1 + $0x70c] ss:$16 sps:$4 sm:$0xff]   ;;  %v3327_v45 = vld [vmem:[%s4491_s1 + $0x700] ss:$16 sps:$4 sm:$0xff]  }
  0xa7   :  { %1909 = vmatpush1.bf16.msra.mxu0 %v3235_v46  ;;  %2114 = vmatpush1.bf16.msra.mxu1 %v3238_v47  ;;  %v3330_v46 = vld [vmem:[%s4491_s1 + $0x708] ss:$16 sps:$4 sm:$0xff]   ;;  %v3335_v47 = vld [vmem:[%s4491_s1 + $0x724] ss:$16 sps:$4 sm:$0xff]  }
  0xa8   :  { %1910 = vmatprep.subr.bf16.mxu0 %v3243_v48  ;;  %2115 = vmatprep.subr.bf16.mxu1 %v3246_v49  ;;  %v3338_v48 = vld [vmem:[%s4491_s1 + $0x72c] ss:$16 sps:$4 sm:$0xff]   ;;  %v3333_v49 = vld [vmem:[%s4491_s1 + $0x720] ss:$16 sps:$4 sm:$0xff]  }
  0xab   :  { %1911 = vmatpush1.bf16.msra.mxu0 %v3241_v50  ;;  %2116 = vmatpush1.bf16.msra.mxu1 %v3244_v51  ;;  %v3336_v50 = vld [vmem:[%s4491_s1 + $0x728] ss:$16 sps:$4 sm:$0xff]   ;;  %v3341_v51 = vld [vmem:[%s4491_s1 + $0x744] ss:$16 sps:$4 sm:$0xff]  }
  0xac   :  { %1912 = vmatprep.subr.bf16.mxu0 %v3249_v52  ;;  %2117 = vmatprep.subr.bf16.mxu1 %v3252_v53  ;;  %v3344_v52 = vld [vmem:[%s4491_s1 + $0x74c] ss:$16 sps:$4 sm:$0xff]   ;;  %v3339_v53 = vld [vmem:[%s4491_s1 + $0x740] ss:$16 sps:$4 sm:$0xff]  }
  0xaf   :  { %1913 = vmatpush1.bf16.msra.mxu0 %v3247_v54  ;;  %2118 = vmatpush1.bf16.msra.mxu1 %v3250_v55  ;;  %v3342_v54 = vld [vmem:[%s4491_s1 + $0x748] ss:$16 sps:$4 sm:$0xff]   ;;  %v3347_v55 = vld [vmem:[%s4491_s1 + $0x764] ss:$16 sps:$4 sm:$0xff]  }
  0xb0   :  { %1914 = vmatprep.subr.bf16.mxu0 %v3255_v56  ;;  %2119 = vmatprep.subr.bf16.mxu1 %v3258_v57  ;;  %v3350_v56 = vld [vmem:[%s4491_s1 + $0x76c] ss:$16 sps:$4 sm:$0xff]   ;;  %v3345_v57 = vld [vmem:[%s4491_s1 + $0x760] ss:$16 sps:$4 sm:$0xff]  }
  0xb3   :  { %1915 = vmatpush1.bf16.msra.mxu0 %v3253_v58  ;;  %2120 = vmatpush1.bf16.msra.mxu1 %v3256_v59  ;;  %v3348_v58 = vld [vmem:[%s4491_s1 + $0x768] ss:$16 sps:$4 sm:$0xff]   ;;  %v3353_v59 = vld [vmem:[%s4491_s1 + $0x784] ss:$16 sps:$4 sm:$0xff]  }
  0xb4   :  { %1916 = vmatprep.subr.bf16.mxu0 %v3261_v60  ;;  %2121 = vmatprep.subr.bf16.mxu1 %v3264_v61  ;;  %v3356_v60 = vld [vmem:[%s4491_s1 + $0x78c] ss:$16 sps:$4 sm:$0xff]   ;;  %v3351_v61 = vld [vmem:[%s4491_s1 + $0x780] ss:$16 sps:$4 sm:$0xff]  }
  0xb7   :  { %1917 = vmatpush1.bf16.msra.mxu0 %v3259_v62  ;;  %2122 = vmatpush1.bf16.msra.mxu1 %v3262_v63  ;;  %v3354_v62 = vld [vmem:[%s4491_s1 + $0x788] ss:$16 sps:$4 sm:$0xff]   ;;  %v3359_v63 = vld [vmem:[%s4491_s1 + $0x7a4] ss:$16 sps:$4 sm:$0xff]  }
  0xb8   :  { %1918 = vmatprep.subr.bf16.mxu0 %v3267_v0  ;;  %2123 = vmatprep.subr.bf16.mxu1 %v3270_v1  ;;  %v3362_v0 = vld [vmem:[%s4491_s1 + $0x7ac] ss:$16 sps:$4 sm:$0xff]   ;;  %v3357_v1 = vld [vmem:[%s4491_s1 + $0x7a0] ss:$16 sps:$4 sm:$0xff]  }
  0xbb   :  { %1919 = vmatpush1.bf16.msra.mxu0 %v3265_v2  ;;  %2124 = vmatpush1.bf16.msra.mxu1 %v3268_v3  ;;  %v3360_v2 = vld [vmem:[%s4491_s1 + $0x7a8] ss:$16 sps:$4 sm:$0xff]   ;;  %v3365_v3 = vld [vmem:[%s4491_s1 + $0x7c4] ss:$16 sps:$4 sm:$0xff]  }
  0xbc   :  { %1920 = vmatprep.subr.bf16.mxu0 %v3273_v4  ;;  %2125 = vmatprep.subr.bf16.mxu1 %v3276_v5  ;;  %v3368_v4 = vld [vmem:[%s4491_s1 + $0x7cc] ss:$16 sps:$4 sm:$0xff]   ;;  %v3363_v5 = vld [vmem:[%s4491_s1 + $0x7c0] ss:$16 sps:$4 sm:$0xff]  }
  0xbf   :  { %1921 = vmatpush1.bf16.msra.mxu0 %v3271_v6  ;;  %2126 = vmatpush1.bf16.msra.mxu1 %v3274_v7  ;;  %v3366_v6 = vld [vmem:[%s4491_s1 + $0x7c8] ss:$16 sps:$4 sm:$0xff]   ;;  %v3371_v7 = vld [vmem:[%s4491_s1 + $0x7e4] ss:$16 sps:$4 sm:$0xff]  }
  0xc0   :  { %1931 = vmatprep.subr.bf16.mxu0 %v3281_v8  ;;  %2136 = vmatprep.subr.bf16.mxu1 %v3284_v9  ;;  %v3374_v8 = vld [vmem:[%s4491_s1 + $0x7ec] ss:$16 sps:$4 sm:$0xff]   ;;  %v3369_v9 = vld [vmem:[%s4491_s1 + $0x7e0] ss:$16 sps:$4 sm:$0xff]  }
  0xc2   :  { %1923 = vmatmul.mubr.bf16.vlgmr.msra.gmra.mrb[0].mxu0 %v2578_v10  ;;  %2128 = vmatmul.mubr.bf16.vlgmr.msra.gmra.mrb[0].mxu1 %v2578_v10  ;;  %v3372_v10 = vld [vmem:[%s4491_s1 + $0x7e8] ss:$16 sps:$4 sm:$0xff]  }
  0xc3   :  { %1932 = vmatpush1.bf16.msra.mxu0 %v3279_v12  ;;  %2137 = vmatpush1.bf16.msra.mxu1 %v3282_v14  ;;  %v3379_v12 = vld [vmem:[%s4491_s1 + $0x804] ss:$16 sps:$4 sm:$0xff]   ;;  %v3382_v14 = vld [vmem:[%s4491_s1 + $0x80c] ss:$16 sps:$4 sm:$0xff]  }
  0xc4   :  { %1933 = vmatprep.subr.bf16.mxu0 %v3287_v11  ;;  %2138 = vmatprep.subr.bf16.mxu1 %v3290_v15  ;;  %v2580_v11 = vcombine.low %v4098_v13, %v4098_v13  ;;  %v3377_v15 = vld [vmem:[%s4491_s1 + $0x800] ss:$16 sps:$4 sm:$0xff]   ;;  %v3388_v13 = vld [vmem:[%s4491_s1 + $0x82c] ss:$16 sps:$4 sm:$0xff]  }
  0xc5   :  { %1963 = vmatprep.mubr.bf16.mxu0 %v2581_v17  ;;  %2168 = vmatprep.mubr.bf16.mxu1 %v2581_v17  ;;  %v3385_v17 = vld [vmem:[%s4491_s1 + $0x824] ss:$16 sps:$4 sm:$0xff]  }
  0xc7   :  { %1934 = vmatpush1.bf16.msra.mxu0 %v3285_v16  ;;  %2139 = vmatpush1.bf16.msra.mxu1 %v3288_v18  ;;  %v3380_v16 = vld [vmem:[%s4491_s1 + $0x808] ss:$16 sps:$4 sm:$0xff]   ;;  %v3383_v18 = vld [vmem:[%s4491_s1 + $0x820] ss:$16 sps:$4 sm:$0xff]  }
  0xc8   :  { %1935 = vmatprep.subr.bf16.mxu0 %v3293_v19  ;;  %2140 = vmatprep.subr.bf16.mxu1 %v3296_v20  ;;  %v3386_v19 = vld [vmem:[%s4491_s1 + $0x828] ss:$16 sps:$4 sm:$0xff]   ;;  %v3391_v20 = vld [vmem:[%s4491_s1 + $0x844] ss:$16 sps:$4 sm:$0xff]  }
  0xcb   :  { %1936 = vmatpush1.bf16.msra.mxu0 %v3291_v21  ;;  %2141 = vmatpush1.bf16.msra.mxu1 %v3294_v22  ;;  %v3394_v21 = vld [vmem:[%s4491_s1 + $0x84c] ss:$16 sps:$4 sm:$0xff]   ;;  %v3458_v22 = vmov 0  }
  0xcc   :  { %1937 = vmatprep.subr.bf16.mxu0 %v3299_v23  ;;  %2142 = vmatprep.subr.bf16.mxu1 %v3302_v24  ;;  %v3389_v23 = vld [vmem:[%s4491_s1 + $0x840] ss:$16 sps:$4 sm:$0xff]   ;;  %v3392_v24 = vld [vmem:[%s4491_s1 + $0x848] ss:$16 sps:$4 sm:$0xff]  }
  0xcf   :  { %1938 = vmatpush1.bf16.msra.mxu0 %v3297_v25  ;;  %2143 = vmatpush1.bf16.msra.mxu1 %v3300_v26  ;;  %v3397_v25 = vld [vmem:[%s4491_s1 + $0x864] ss:$16 sps:$4 sm:$0xff]   ;;  %v3400_v26 = vld [vmem:[%s4491_s1 + $0x86c] ss:$16 sps:$4 sm:$0xff]  }
  0xd0   :  { %1939 = vmatprep.subr.bf16.mxu0 %v3305_v27  ;;  %2144 = vmatprep.subr.bf16.mxu1 %v3308_v28  ;;  %v3395_v27 = vld [vmem:[%s4491_s1 + $0x860] ss:$16 sps:$4 sm:$0xff]   ;;  %v3398_v28 = vld [vmem:[%s4491_s1 + $0x868] ss:$16 sps:$4 sm:$0xff]  }
  0xd3   :  { %1940 = vmatpush1.bf16.msra.mxu0 %v3303_v29  ;;  %2145 = vmatpush1.bf16.msra.mxu1 %v3306_v30  ;;  %v3403_v29 = vld [vmem:[%s4491_s1 + $0x884] ss:$16 sps:$4 sm:$0xff]   ;;  %v3406_v30 = vld [vmem:[%s4491_s1 + $0x88c] ss:$16 sps:$4 sm:$0xff]  }
  0xd4   :  { %1941 = vmatprep.subr.bf16.mxu0 %v3311_v31  ;;  %2146 = vmatprep.subr.bf16.mxu1 %v3314_v32  ;;  %v3401_v31 = vld [vmem:[%s4491_s1 + $0x880] ss:$16 sps:$4 sm:$0xff]   ;;  %v3404_v32 = vld [vmem:[%s4491_s1 + $0x888] ss:$16 sps:$4 sm:$0xff]  }
  0xd7   :  { %1942 = vmatpush1.bf16.msra.mxu0 %v3309_v33  ;;  %2147 = vmatpush1.bf16.msra.mxu1 %v3312_v34  ;;  %v3409_v33 = vld [vmem:[%s4491_s1 + $0x8a4] ss:$16 sps:$4 sm:$0xff]   ;;  %v3412_v34 = vld [vmem:[%s4491_s1 + $0x8ac] ss:$16 sps:$4 sm:$0xff]  }
  0xd8   :  { %1943 = vmatprep.subr.bf16.mxu0 %v3317_v35  ;;  %2148 = vmatprep.subr.bf16.mxu1 %v3320_v36  ;;  %v3407_v35 = vld [vmem:[%s4491_s1 + $0x8a0] ss:$16 sps:$4 sm:$0xff]   ;;  %v3410_v36 = vld [vmem:[%s4491_s1 + $0x8a8] ss:$16 sps:$4 sm:$0xff]  }
  0xdb   :  { %1944 = vmatpush1.bf16.msra.mxu0 %v3315_v37  ;;  %2149 = vmatpush1.bf16.msra.mxu1 %v3318_v38  ;;  %v3415_v37 = vld [vmem:[%s4491_s1 + $0x8c4] ss:$16 sps:$4 sm:$0xff]   ;;  %v3418_v38 = vld [vmem:[%s4491_s1 + $0x8cc] ss:$16 sps:$4 sm:$0xff]  }
  0xdc   :  { %1945 = vmatprep.subr.bf16.mxu0 %v3323_v39  ;;  %2150 = vmatprep.subr.bf16.mxu1 %v3326_v40  ;;  %v3413_v39 = vld [vmem:[%s4491_s1 + $0x8c0] ss:$16 sps:$4 sm:$0xff]   ;;  %v3416_v40 = vld [vmem:[%s4491_s1 + $0x8c8] ss:$16 sps:$4 sm:$0xff]  }
  0xdf   :  { %1946 = vmatpush1.bf16.msra.mxu0 %v3321_v41  ;;  %2151 = vmatpush1.bf16.msra.mxu1 %v3324_v42  ;;  %v3421_v41 = vld [vmem:[%s4491_s1 + $0x8e4] ss:$16 sps:$4 sm:$0xff]   ;;  %v3424_v42 = vld [vmem:[%s4491_s1 + $0x8ec] ss:$16 sps:$4 sm:$0xff]  }
  0xe0   :  { %1947 = vmatprep.subr.bf16.mxu0 %v3329_v43  ;;  %2152 = vmatprep.subr.bf16.mxu1 %v3332_v44  ;;  %v3419_v43 = vld [vmem:[%s4491_s1 + $0x8e0] ss:$16 sps:$4 sm:$0xff]   ;;  %v3422_v44 = vld [vmem:[%s4491_s1 + $0x8e8] ss:$16 sps:$4 sm:$0xff]  }
  0xe3   :  { %1948 = vmatpush1.bf16.msra.mxu0 %v3327_v45  ;;  %2153 = vmatpush1.bf16.msra.mxu1 %v3330_v46  ;;  %v3426_v45 = vld [vmem:[%s4493_s3 + $0x40] sm:$0xff]  }
  0xe4   :  { %1949 = vmatprep.subr.bf16.mxu0 %v3335_v47  ;;  %2154 = vmatprep.subr.bf16.mxu1 %v3338_v48  ;;  %v3427_v46 = vld [vmem:[%s4493_s3 + $0xc0] sm:$0xff]  }
  0xe5   :  { %v3425_v47 = vld [vmem:[%s4492_s0 + $0x20] ss:$0 sps:$4 sm:$0xff]  }
  0xe6   :  { %v3428_v48 = vld [vmem:[%s4493_s3] sm:$0xff]  }
  0xe7   :  { %1950 = vmatpush1.bf16.msra.mxu0 %v3333_v49  ;;  %2155 = vmatpush1.bf16.msra.mxu1 %v3336_v50  ;;  %v3429_v49 = vld [vmem:[%s4493_s3 + $0x80] sm:$0xff]   ;;  %v3430_v50 = vld [vmem:[%s4493_s3 + $0x48] sm:$0xff]  }
  0xe8   :  { %1951 = vmatprep.subr.bf16.mxu0 %v3341_v51  ;;  %2156 = vmatprep.subr.bf16.mxu1 %v3344_v52  ;;  %v3431_v51 = vld [vmem:[%s4493_s3 + $0xc8] sm:$0xff]  }
  0xe9   :  { %v3432_v52 = vld [vmem:[%s4493_s3 + $0x8] sm:$0xff]  }
  0xeb   :  { %1952 = vmatpush1.bf16.msra.mxu0 %v3339_v53  ;;  %2157 = vmatpush1.bf16.msra.mxu1 %v3342_v54  ;;  %v3433_v53 = vld [vmem:[%s4493_s3 + $0x88] sm:$0xff]   ;;  %v3434_v54 = vld [vmem:[%s4493_s3 + $0x50] sm:$0xff]  }
  0xec   :  { %1953 = vmatprep.subr.bf16.mxu0 %v3347_v55  ;;  %2158 = vmatprep.subr.bf16.mxu1 %v3350_v56  ;;  %v3435_v55 = vld [vmem:[%s4493_s3 + $0xd0] sm:$0xff]  }
  0xed   :  { %v3436_v56 = vld [vmem:[%s4493_s3 + $0x10] sm:$0xff]  }
  0xef   :  { %1954 = vmatpush1.bf16.msra.mxu0 %v3345_v57  ;;  %2159 = vmatpush1.bf16.msra.mxu1 %v3348_v58  ;;  %v3437_v57 = vld [vmem:[%s4493_s3 + $0x90] sm:$0xff]   ;;  %v3438_v58 = vld [vmem:[%s4493_s3 + $0x58] sm:$0xff]  }
  0xf0   :  { %1955 = vmatprep.subr.bf16.mxu0 %v3353_v59  ;;  %2160 = vmatprep.subr.bf16.mxu1 %v3356_v60  ;;  %v3439_v59 = vld [vmem:[%s4493_s3 + $0xd8] sm:$0xff]  }
  0xf1   :  { %v3440_v60 = vld [vmem:[%s4493_s3 + $0x18] sm:$0xff]  }
  0xf3   :  { %1956 = vmatpush1.bf16.msra.mxu0 %v3351_v61  ;;  %2161 = vmatpush1.bf16.msra.mxu1 %v3354_v62  ;;  %v3441_v61 = vld [vmem:[%s4493_s3 + $0x98] sm:$0xff]   ;;  %v3442_v62 = vld [vmem:[%s4493_s3 + $0x60] sm:$0xff]  }
  0xf4   :  { %1957 = vmatprep.subr.bf16.mxu0 %v3359_v63  ;;  %2162 = vmatprep.subr.bf16.mxu1 %v3362_v0  ;;  %v3443_v63 = vld [vmem:[%s4493_s3 + $0xe0] sm:$0xff]  }
  0xf5   :  { %v3444_v0 = vld [vmem:[%s4493_s3 + $0x20] sm:$0xff]  }
  0xf7   :  { %1958 = vmatpush1.bf16.msra.mxu0 %v3357_v1  ;;  %2163 = vmatpush1.bf16.msra.mxu1 %v3360_v2  ;;  %v3445_v1 = vld [vmem:[%s4493_s3 + $0xa0] sm:$0xff]   ;;  %v3446_v2 = vld [vmem:[%s4493_s3 + $0x68] sm:$0xff]  }
  0xf8   :  { %1959 = vmatprep.subr.bf16.mxu0 %v3365_v3  ;;  %2164 = vmatprep.subr.bf16.mxu1 %v3368_v4  ;;  %v3447_v3 = vld [vmem:[%s4493_s3 + $0xe8] sm:$0xff]  }
  0xf9   :  { %v3448_v4 = vld [vmem:[%s4493_s3 + $0x28] sm:$0xff]  }
  0xfb   :  { %1960 = vmatpush1.bf16.msra.mxu0 %v3363_v5  ;;  %2165 = vmatpush1.bf16.msra.mxu1 %v3366_v6  ;;  %v3449_v5 = vld [vmem:[%s4493_s3 + $0xa8] sm:$0xff]   ;;  %v3450_v6 = vld [vmem:[%s4493_s3 + $0x70] sm:$0xff]  }
  0xfc   :  { %1961 = vmatprep.subr.bf16.mxu0 %v3371_v7  ;;  %2166 = vmatprep.subr.bf16.mxu1 %v3374_v8  ;;  %v3451_v7 = vld [vmem:[%s4493_s3 + $0xf0] sm:$0xff]  }
  0xfd   :  { %v3452_v8 = vld [vmem:[%s4493_s3 + $0x30] sm:$0xff]  }
  0xff   :  { %1962 = vmatpush1.bf16.msra.mxu0 %v3369_v9  ;;  %2167 = vmatpush1.bf16.msra.mxu1 %v3372_v10  ;;  %v3453_v9 = vld [vmem:[%s4493_s3 + $0xb0] sm:$0xff]   ;;  %v3454_v10 = vld [vmem:[%s4493_s3 + $0x78] sm:$0xff]  }
 0x100   :  { %1972 = vmatprep.subr.bf16.mxu0 %v3379_v12  ;;  %2177 = vmatprep.subr.bf16.mxu1 %v3382_v14  ;;  %v3455_v12 = vld [vmem:[%s4493_s3 + $0xf8] sm:$0xff]  }
 0x101   :  { %v3456_v14 = vld [vmem:[%s4493_s3 + $0x38] sm:$0xff]  }
 0x102   :  { %1964 = vmatmul.mubr.bf16.vlgmr.msra.gmra.mrb[0].mxu0 %v2580_v11  ;;  %2169 = vmatmul.mubr.bf16.vlgmr.msra.gmra.mrb[0].mxu1 %v2580_v11  ;;  %v3457_v11 = vld [vmem:[%s4493_s3 + $0xb8] sm:$0xff]  }
 0x103   :  { %1973 = vmatpush1.bf16.msra.mxu0 %v3377_v15  ;;  %2178 = vmatpush1.bf16.msra.mxu1 %v3380_v16  ;;  %v316_v15 = vlaneseq }
 0x104   :  { %1974 = vmatprep.subr.bf16.mxu0 %v3385_v17  ;;  %2179 = vmatprep.subr.bf16.mxu1 %v3388_v13 }
 0x105   :  { %2004 = vmatprep.mubr.bf16.mxu0 %v3458_v22  ;;  %2209 = vmatprep.mubr.bf16.mxu1 %v3458_v22  ;;  %v317_v16 = vshrl.u32 %v316_v15, 7 }
 0x107   :  { %1975 = vmatpush1.bf16.msra.mxu0 %v3383_v18  ;;  %2180 = vmatpush1.bf16.msra.mxu1 %v3386_v19  ;;  %v318_v17 = vsub.s32 0, %v317_v16  ;;  %v326_v13 = vsub.s32 2, %v317_v16  ;;  %v314_v18 = vld [vmem:[%s4494_s2] sm:$0xf]  ;;  %v322_v19 = vsub.s32 1, %v317_v16 }
 0x108   :  { %1976 = vmatprep.subr.bf16.mxu0 %v3391_v20  ;;  %2181 = vmatprep.subr.bf16.mxu1 %v3394_v21  ;;  %v330_v20 = vsub.s32 3, %v317_v16 }
 0x109   :  { %v319_v21 = vrot.slane %v314_v18, %v318_v17  ;;  %v327_v22 = vrot.slane %v314_v18, %v326_v13 }
 0x10b   :  { %1977 = vmatpush1.bf16.msra.mxu0 %v3389_v23  ;;  %2182 = vmatpush1.bf16.msra.mxu1 %v3392_v24  ;;  %v323_v23 = vrot.slane %v314_v18, %v322_v19  ;;  %v331_v24 = vrot.slane %v314_v18, %v330_v20 }
 0x10c   :  { %1978 = vmatprep.subr.bf16.mxu0 %v3397_v25  ;;  %2183 = vmatprep.subr.bf16.mxu1 %v3400_v26 }
 0x10f   :  { %1979 = vmatpush1.bf16.msra.mxu0 %v3395_v27  ;;  %2184 = vmatpush1.bf16.msra.mxu1 %v3398_v28 }
 0x110   :  { %1980 = vmatprep.subr.bf16.mxu0 %v3403_v29  ;;  %2185 = vmatprep.subr.bf16.mxu1 %v3406_v30 }
 0x113   :  { %1981 = vmatpush1.bf16.msra.mxu0 %v3401_v31  ;;  %2186 = vmatpush1.bf16.msra.mxu1 %v3404_v32 }
 0x114   :  { %1982 = vmatprep.subr.bf16.mxu0 %v3409_v33  ;;  %2187 = vmatprep.subr.bf16.mxu1 %v3412_v34 }
 0x117   :  { %1983 = vmatpush1.bf16.msra.mxu0 %v3407_v35  ;;  %2188 = vmatpush1.bf16.msra.mxu1 %v3410_v36 }
 0x118   :  { %1984 = vmatprep.subr.bf16.mxu0 %v3415_v37  ;;  %2189 = vmatprep.subr.bf16.mxu1 %v3418_v38 }
 0x11b   :  { %1985 = vmatpush1.bf16.msra.mxu0 %v3413_v39  ;;  %2190 = vmatpush1.bf16.msra.mxu1 %v3416_v40 }
 0x11c   :  { %1986 = vmatprep.subr.bf16.mxu0 %v3421_v41  ;;  %2191 = vmatprep.subr.bf16.mxu1 %v3424_v42 }
 0x11f   :  { %1987 = vmatpush1.bf16.msra.mxu0 %v3419_v43  ;;  %2192 = vmatpush1.bf16.msra.mxu1 %v3422_v44 }
 0x120   :  { %2904 = vmatprep.subr.bf16.mxu0 %v3426_v45  ;;  %2926 = vmatprep.subr.bf16.mxu1 %v3427_v46 }
 0x122   :  { %2005 = vmatmul.mubr.bf16.vlgmr.msra.gmra.mrb[0].mxu0 %v3425_v47  ;;  %2210 = vmatmul.mubr.bf16.vlgmr.msra.gmra.mrb[0].mxu1 %v3425_v47  ;;  %v2871_v47 = vld [vmem:[%s4495_s4] ss:$0 sm:$0xff] }
 0x123   :  { %2905 = vmatpush3.bf16.msra.mxu0 %v3428_v48  ;;  %2927 = vmatpush3.bf16.msra.mxu1 %v3429_v49 }
 0x124   :  { %2906 = vmatprep.subr.bf16.mxu0 %v3430_v50  ;;  %2928 = vmatprep.subr.bf16.mxu1 %v3431_v51 }
 0x127   :  { %2907 = vmatpush3.bf16.msra.mxu0 %v3432_v52  ;;  %2929 = vmatpush3.bf16.msra.mxu1 %v3433_v53 }
 0x128   :  { %2908 = vmatprep.subr.bf16.mxu0 %v3434_v54  ;;  %2930 = vmatprep.subr.bf16.mxu1 %v3435_v55 }
 0x12b   :  { %2909 = vmatpush3.bf16.msra.mxu0 %v3436_v56  ;;  %2931 = vmatpush3.bf16.msra.mxu1 %v3437_v57 }
 0x12c   :  { %2910 = vmatprep.subr.bf16.mxu0 %v3438_v58  ;;  %2932 = vmatprep.subr.bf16.mxu1 %v3439_v59 }
 0x12f   :  { %2911 = vmatpush3.bf16.msra.mxu0 %v3440_v60  ;;  %2933 = vmatpush3.bf16.msra.mxu1 %v3441_v61 }
 0x130   :  { %2912 = vmatprep.subr.bf16.mxu0 %v3442_v62  ;;  %2934 = vmatprep.subr.bf16.mxu1 %v3443_v63 }
 0x133   :  { %2913 = vmatpush3.bf16.msra.mxu0 %v3444_v0  ;;  %2935 = vmatpush3.bf16.msra.mxu1 %v3445_v1 }
 0x134   :  { %2914 = vmatprep.subr.bf16.mxu0 %v3446_v2  ;;  %2936 = vmatprep.subr.bf16.mxu1 %v3447_v3 }
 0x137   :  { %2915 = vmatpush3.bf16.msra.mxu0 %v3448_v4  ;;  %2937 = vmatpush3.bf16.msra.mxu1 %v3449_v5 }
 0x138   :  { %2916 = vmatprep.subr.bf16.mxu0 %v3450_v6  ;;  %2938 = vmatprep.subr.bf16.mxu1 %v3451_v7 }
 0x13b   :  { %2917 = vmatpush3.bf16.msra.mxu0 %v3452_v8  ;;  %2939 = vmatpush3.bf16.msra.mxu1 %v3453_v9 }
 0x13c   :  { %2918 = vmatprep.subr.bf16.mxu0 %v3454_v10  ;;  %2940 = vmatprep.subr.bf16.mxu1 %v3455_v12 }
 0x13f   :  { %2919 = vmatpush3.bf16.msra.mxu0 %v3456_v14  ;;  %2941 = vmatpush3.bf16.msra.mxu1 %v3457_v11 }
 0x1f5   :  { %v2006_v25 = vpop.f32.mrb[0].mxu0  ;;  %v2211_v26 = vpop.f32.mrb[0].mxu1 }
 0x1f6   :  { %v2948_v27 = vadd.f32 %v2006_v25, %v319_v21  ;;  %v2950_v28 = vadd.f32 %v2211_v26, %v327_v22  ;;  %v2008_v29 = vpop.f32.mrb[1].mxu0  ;;  %v2213_v30 = vpop.f32.mrb[1].mxu1 }
 0x1f7   :  { %v2949_v31 = vadd.f32 %v2008_v29, %v323_v23  ;;  %v2951_v32 = vadd.f32 %v2213_v30, %v331_v24  ;;  %v2010_v33 = vpop.f32.mrb[2].mxu0  ;;  %v2215_v34 = vpop.f32.mrb[2].mxu1 }
 0x1f8   :  { %v2218_v35 = vmax.f32 %v2948_v27, 0.0  ;;  %v2220_v36 = vmax.f32 %v2950_v28, 0.0  ;;  %v2011_v37 = vpop.f32.mrb[3].mxu0  ;;  %v2216_v38 = vpop.f32.mrb[3].mxu1 }
 0x1f9   :  { %v2219_v39 = vmax.f32 %v2949_v31, 0.0  ;;  %v2221_v40 = vmax.f32 %v2951_v32, 0.0 }
 0x1fa   :  { %v2222_v43 = vpack.c.bf16 %v2218_v35, %v2218_v35  ;;  %v2224_v44 = vpack.c.bf16 %v2220_v36, %v2220_v36 }
 0x1fb   :  { %v2223_v41 = vpack.c.bf16 %v2219_v39, %v2219_v39  ;;  %v2225_v42 = vpack.c.bf16 %v2221_v40, %v2221_v40 }
 0x1fd   :  { %2521 = vmatprep.mubr.bf16.mxu0 %v2223_v41  ;;  %2561 = vmatprep.mubr.bf16.mxu1 %v2225_v42 }
 0x1fe   :  { %2522 = vmatmul.mubr.bf16.vlgmr.msra.gmra.mrb[4].mxu0 %v2222_v43  ;;  %2562 = vmatmul.mubr.bf16.vlgmr.msra.gmra.mrb[4].mxu1 %v2224_v44 }
 0x2d1   :  { %v2920_v45 = vpop.f32.mrb[4].mxu0  ;;  %v2942_v46 = vpop.f32.mrb[4].mxu1 }
 0x2d2   :  { %v2921_v48 = vpop.f32.mrb[5].mxu0  ;;  %v2943_v49 = vpop.f32.mrb[5].mxu1 }
 0x2d3   :  { %v2922_v50 = vadd.f32 %v2921_v48, %v2920_v45  ;;  %v2944_v51 = vadd.f32 %v2943_v49, %v2942_v46  ;;  %v2923_v52 = vpop.f32.mrb[6].mxu0  ;;  %v2945_v53 = vpop.f32.mrb[6].mxu1 }
 0x2d4   :  { %v2924_v54 = vpop.f32.mrb[7].mxu0  ;;  %v2946_v55 = vpop.f32.mrb[7].mxu1 }
 0x2d5   :  { %v2524_v56 = vadd.f32 %v2922_v50, %v2871_v47 }
 0x2d7   :  { %v2564_v57 = vadd.f32 %v2944_v51, %v2524_v56 }
 0x2d9   :  { %2569 = vst [vmem:[%s4496_s5] sm:$0xff] %v2564_v57 }

</bundles_post_ra>
